<compile_context>
chip_gen: v6e
topology: v6e:2x2x1
jax: 0.10.0
libtpu: 0.0.40
codegen_flags: <defaults>
</compile_context>

<pallas_src>
import functools

import jax
import jax.numpy as jnp
from jax.experimental import pallas as pl
from jax.experimental.pallas import tpu as pltpu


def _sigmoid(x):
    # Exact sigmoid (exp + divide); operands here are tiny (a few vregs), so the
    # EUP-approx reciprocal trick buys nothing and would loosen the test tolerance.
    return 1.0 / (1.0 + jnp.exp(-x))


def _cbam_kernel(K, H, W, block_b, x_ref, w1t_ref, w2_ref, cmask_ref,
                 wsp_ref, bsp_ref, out_ref, pmax_ref, pmean_ref):
    # x_ref:    (block_b, C, H*W)  VMEM (lane-dense)
    # w1t_ref:  (C, Cr) VMEM   (SE conv1 weight, transposed)
    # w2_ref:   (C, Cr) VMEM   (SE conv2 weight)
    # cmask_ref:(K, H*W) VMEM  (per-kw column-validity 0/1 masks)
    # wsp_ref:  (2*K*K,) SMEM  (spatial conv weights, idx = c*K*K + kh*K + kw)
    # bsp_ref:  (1,) SMEM      (spatial conv bias)
    # out_ref:  (block_b, C, H*W) VMEM
    # pmax_ref / pmean_ref: (1, Lpad) f32 VMEM row-padded flat maps
    HW = H * W
    p = K // 2
    base = p                       # left guard so the earliest tap start is index 0
    inv_hw = 1.0 / float(HW)
    C = x_ref.shape[1]
    inv_c = 1.0 / float(C)

    # Hoisted loop invariants.
    w1t = w1t_ref[...].astype(jnp.float32)        # (C, Cr)
    w2 = w2_ref[...].astype(jnp.float32)          # (C, Cr)
    zero_row = jnp.zeros((1, HW), jnp.float32)
    bias_row = jnp.full((1, HW), bsp_ref[0], dtype=jnp.float32)

    for bi in range(block_b):
        x = x_ref[bi].astype(jnp.float32)          # (C, HW), dense

        # ---------------- Channel attention (VPU/XLU, no MXU) ----------------
        maxv = jnp.max(x, axis=1, keepdims=True)                    # (C, 1)
        avgv = jnp.sum(x, axis=1, keepdims=True) * inv_hw           # (C, 1)
        h = (jnp.maximum(jnp.sum(w1t * maxv, axis=0, keepdims=True), 0.0) +
             jnp.maximum(jnp.sum(w1t * avgv, axis=0, keepdims=True), 0.0))   # (1, Cr)
        ca = _sigmoid(jnp.sum(w2 * h, axis=1, keepdims=True))       # (C, 1)

        out = x * ca                                                 # (C, HW)

        # ---------------- Spatial attention ----------------
        maxc = jnp.max(out, axis=0, keepdims=True)                   # (1, HW)
        meanc = jnp.sum(out, axis=0, keepdims=True) * inv_c          # (1, HW)
        # `x` and `out` die here; the residual path re-reads x_ref below.

        # Row-padded flat lines (zero guard rows + zero tail); interior is one
        # contiguous lane-dense store per map.
        if bi == 0:
            pmax_ref[...] = jnp.zeros(pmax_ref.shape, pmax_ref.dtype)
            pmean_ref[...] = jnp.zeros(pmean_ref.shape, pmean_ref.dtype)
        lo = base + p * W
        pmax_ref[:, lo:lo + HW] = maxc
        pmean_ref[:, lo:lo + HW] = meanc
        pads = (pmax_ref, pmean_ref)               # channel 0 = max, 1 = mean

        # Shift-and-FMA conv: for each (kw, channel) group, sum the K row-shifted
        # windows (zero row padding handles kh out-of-range for free), then apply
        # the column-validity mask once.  Four round-robin accumulators keep the
        # VALU slots fed instead of one ~200-op serial chain.
        accs = [bias_row, zero_row, zero_row, zero_row]
        t = 0
        for kw in range(K):
            cm = cmask_ref[kw:kw + 1, :]                             # (1, HW)
            for c in range(2):
                g = None
                for kh in range(K):
                    wgt = wsp_ref[c * K * K + kh * K + kw]           # SMEM scalar
                    start = base + kh * W + kw - p
                    win = pads[c][:, start:start + HW]               # (1, HW)
                    term = wgt * win
                    g = term if g is None else g + term
                accs[t % 4] = accs[t % 4] + cm * g
                t += 1
        sa = _sigmoid((accs[0] + accs[1]) + (accs[2] + accs[3]))     # (1, HW)

        # Re-read x for the residual so it is not held live across the conv.
        xr = x_ref[bi].astype(jnp.float32)
        out_ref[bi] = (xr * ca * sa + xr).astype(out_ref.dtype)


def _pick_block_b(batch):
    """Largest divisor of `batch` that is <= 8 while keeping >= 2 grid steps
    (so both v7x TensorCores get work); v5e/v6e just get bigger DMAs per step."""
    best = 1
    for cand in range(1, min(batch, 8) + 1):
        if batch % cand == 0 and (batch // cand) >= min(2, batch):
            best = cand
    return best


def cbam_block(x, w_se1, w_se2, w_sp, b_sp, block_b=None):
    """x: (B,C,H,W); w_se1: (C//r, C); w_se2: (C, C//r); w_sp: (1,2,K,K); b_sp: (1,)"""
    B, C, H, W = x.shape
    HW = H * W
    Cr = w_se1.shape[0]
    K = w_sp.shape[-1]
    p = K // 2

    # TODO(synk): the module's default kernel_size=49 would unroll 2*49*49 taps
    # here; for K > ~9 switch the tap loops to lax.fori_loop / an im2col matmul.
    assert K % 2 == 1 and K <= 15, "small odd spatial kernel expected"
    assert HW % 128 == 0, "H*W must be a multiple of 128 for the lane-dense layout"

    if block_b is None:
        block_b = _pick_block_b(B)
    assert B % block_b == 0

    # Flat padded line length: guard (p) + (H + 2p) rows of stride W, rounded up
    # to a lane multiple so the furthest tap window stays in (zeroed) bounds.
    need = (K - 1) * (W + 1) + HW
    lpad = -(-need // 128) * 128

    x3 = x.reshape(B, C, HW)
    w1t = jnp.asarray(w_se1, jnp.float32).T                 # (C, Cr)
    w2 = jnp.asarray(w_se2, jnp.float32)                    # (C, Cr)
    wsp_flat = jnp.asarray(w_sp, jnp.float32).reshape(-1)   # idx = c*K*K + kh*K + kw
    bsp = jnp.asarray(b_sp, jnp.float32).reshape(1)

    # Column-validity masks (output column j valid for offset kw-p iff
    # 0 <= j + kw - p < W); computed once on the host side.
    cols = jnp.arange(HW, dtype=jnp.int32) % W
    offs = jnp.arange(K, dtype=jnp.int32) - p
    shifted = cols[None, :] + offs[:, None]
    cmask = ((shifted >= 0) & (shifted < W)).astype(jnp.float32)    # (K, HW)

    kernel = functools.partial(_cbam_kernel, K, H, W, block_b)

    out3 = pl.pallas_call(
        kernel,
        out_shape=jax.ShapeDtypeStruct((B, C, HW), x.dtype),
        grid_spec=pltpu.PrefetchScalarGridSpec(
            num_scalar_prefetch=0,
            grid=(B // block_b,),
            in_specs=[
                pl.BlockSpec((block_b, C, HW), lambda b: (b, 0, 0)),   # x (lane-dense)
                pl.BlockSpec((C, Cr), lambda b: (0, 0)),               # SE conv1 weight^T
                pl.BlockSpec((C, Cr), lambda b: (0, 0)),               # SE conv2 weight
                pl.BlockSpec((K, HW), lambda b: (0, 0)),               # column masks
                pl.BlockSpec(memory_space=pltpu.MemorySpace.SMEM),     # spatial conv weights
                pl.BlockSpec(memory_space=pltpu.MemorySpace.SMEM),     # spatial conv bias
            ],
            out_specs=pl.BlockSpec((block_b, C, HW), lambda b: (b, 0, 0)),
            scratch_shapes=[
                pltpu.VMEM((1, lpad), jnp.float32),    # row-padded max map (flat)
                pltpu.VMEM((1, lpad), jnp.float32),    # row-padded mean map (flat)
            ],
        ),
        compiler_params=pltpu.CompilerParams(
            dimension_semantics=("parallel",)),
    )(x3, w1t, w2, cmask, wsp_flat, bsp)

    return out3.reshape(B, C, H, W)


def cbam_ref(x, w_se1, w_se2, w_sp, b_sp):
    """Pure-JAX reference matching the PyTorch CBAMBlock forward."""
    maxp = jnp.max(x, axis=(2, 3), keepdims=True)                      # (B,C,1,1)
    avgp = jnp.mean(x, axis=(2, 3), keepdims=True)

    def se(v):
        h = jnp.einsum("rc,bcij->brij", w_se1, v)
        h = jnp.maximum(h, 0.0)
        return jnp.einsum("cr,brij->bcij", w_se2, h)

    ca = _sigmoid(se(maxp) + se(avgp))                                 # (B,C,1,1)
    out = x * ca

    maxc = jnp.max(out, axis=1, keepdims=True)                         # (B,1,H,W)
    meanc = jnp.mean(out, axis=1, keepdims=True)
    stacked = jnp.concatenate([maxc, meanc], axis=1)                   # (B,2,H,W)
    conv = jax.lax.conv_general_dilated(
        stacked, w_sp, window_strides=(1, 1), padding="SAME",
        dimension_numbers=("NCHW", "OIHW", "NCHW"))                    # (B,1,H,W)
    sa = _sigmoid(conv + b_sp.reshape(1, 1, 1, 1))
    return out * sa + x


if __name__ == "__main__":
    # Small deterministic shapes: batch=2, channel=64, reduction=16, H=W=16, K=7.
    B, C, H, W = 2, 64, 16, 16
    reduction = 16
    K = 7
    Cr = C // reduction

    key = jax.random.PRNGKey(0)
    kx, k1, k2, k3, k4 = jax.random.split(key, 5)

    x = jax.random.normal(kx, (B, C, H, W), dtype=jnp.float32)
    w_se1 = jax.random.normal(k1, (Cr, C), dtype=jnp.float32) * 0.1      # Conv2d(C, C//r, 1, bias=False)
    w_se2 = jax.random.normal(k2, (C, Cr), dtype=jnp.float32) * 0.1      # Conv2d(C//r, C, 1, bias=False)
    w_sp = jax.random.normal(k3, (1, 2, K, K), dtype=jnp.float32) * 0.1  # Conv2d(2, 1, K, pad=K//2)
    b_sp = jax.random.normal(k4, (1,), dtype=jnp.float32) * 0.1

    out = cbam_block(x, w_se1, w_se2, w_sp, b_sp)
    out = jax.block_until_ready(out)

    ref = cbam_ref(x, w_se1, w_se2, w_sp, b_sp)
    assert out.shape == x.shape
    err = float(jnp.max(jnp.abs(out - ref)))
    assert err < 5e-4, err

    print("KERNEL_OK")
</pallas_src>

<mosaic_0001>
module attributes {stable_mosaic.version = 11 : i64} {
  func.func @_cbam_kernel(%arg0: i32, %arg1: memref<1x64x256xf32, #tpu.memory_space<vmem>>, %arg2: memref<64x4xf32, #tpu.memory_space<vmem>>, %arg3: memref<64x4xf32, #tpu.memory_space<vmem>>, %arg4: memref<7x256xf32, #tpu.memory_space<vmem>>, %arg5: memref<98xf32, #tpu.memory_space<smem>>, %arg6: memref<1xf32, #tpu.memory_space<smem>>, %arg7: memref<1x64x256xf32, #tpu.memory_space<vmem>>, %arg8: memref<1x384xf32, #tpu.memory_space<vmem>>, %arg9: memref<1x384xf32, #tpu.memory_space<vmem>>) attributes {dimension_semantics = [#tpu.dimension_semantics<parallel>], iteration_bounds = array<i64: 2>, scalar_prefetch = 0 : i64, scratch_operands = 2 : i64, tpu.core_type = #tpu.core_type<tc>, window_params = [{transform_indices = @transform_0, window_bounds = array<i64: 1, 64, 256>}, {pipeline_mode = #tpu.pipeline_mode<synchronous>, transform_indices = @transform_1, window_bounds = array<i64: 64, 4>}, {pipeline_mode = #tpu.pipeline_mode<synchronous>, transform_indices = @transform_2, window_bounds = array<i64: 64, 4>}, {pipeline_mode = #tpu.pipeline_mode<synchronous>, transform_indices = @transform_3, window_bounds = array<i64: 7, 256>}, {transform_indices = @transform_4, window_bounds = array<i64: 98>}, {transform_indices = @transform_5, window_bounds = array<i64: 1>}, {transform_indices = @transform_6, window_bounds = array<i64: 1, 64, 256>}]} {
    %c0 = arith.constant 0 : index
    %c0_0 = arith.constant 0 : index
    %0 = vector.load %arg2[%c0, %c0_0] : memref<64x4xf32, #tpu.memory_space<vmem>>, vector<64x4xf32>
    %c0_1 = arith.constant 0 : index
    %c0_2 = arith.constant 0 : index
    %1 = vector.load %arg3[%c0_1, %c0_2] : memref<64x4xf32, #tpu.memory_space<vmem>>, vector<64x4xf32>
    %cst = arith.constant 0.000000e+00 : f32
    %2 = vector.broadcast %cst : f32 to vector<1x256xf32>
    %c0_3 = arith.constant 0 : index
    %3 = memref.load %arg6[%c0_3] : memref<1xf32, #tpu.memory_space<smem>>
    %4 = vector.broadcast %3 : f32 to vector<1x256xf32>
    %c0_4 = arith.constant 0 : index
    %c0_5 = arith.constant 0 : index
    %c0_6 = arith.constant 0 : index
    %5 = vector.load %arg1[%c0_4, %c0_5, %c0_6] : memref<1x64x256xf32, #tpu.memory_space<vmem>>, vector<1x64x256xf32>
    %6 = vector.shape_cast %5 : vector<1x64x256xf32> to vector<64x256xf32>
    %cst_7 = arith.constant dense<0xFF800000> : vector<64xf32>
    %7 = vector.multi_reduction <maximumf>, %6, %cst_7 [1] : vector<64x256xf32> to vector<64xf32>
    %8 = vector.shape_cast %7 : vector<64xf32> to vector<64x1xf32>
    %cst_8 = arith.constant dense<0.000000e+00> : vector<64xf32>
    %9 = vector.multi_reduction <add>, %6, %cst_8 [1] : vector<64x256xf32> to vector<64xf32>
    %10 = vector.shape_cast %9 : vector<64xf32> to vector<64x1xf32>
    %cst_9 = arith.constant 3.906250e-03 : f32
    %11 = vector.broadcast %cst_9 : f32 to vector<64x1xf32>
    %12 = arith.mulf %10, %11 : vector<64x1xf32>
    %13 = vector.broadcast %8 : vector<64x1xf32> to vector<64x4xf32>
    %14 = arith.mulf %0, %13 : vector<64x4xf32>
    %cst_10 = arith.constant dense<0.000000e+00> : vector<4xf32>
    %15 = vector.multi_reduction <add>, %14, %cst_10 [0] : vector<64x4xf32> to vector<4xf32>
    %16 = vector.shape_cast %15 : vector<4xf32> to vector<1x4xf32>
    %cst_11 = arith.constant 0.000000e+00 : f32
    %17 = vector.broadcast %cst_11 : f32 to vector<1x4xf32>
    %18 = arith.maximumf %16, %17 : vector<1x4xf32>
    %19 = vector.broadcast %12 : vector<64x1xf32> to vector<64x4xf32>
    %20 = arith.mulf %0, %19 : vector<64x4xf32>
    %cst_12 = arith.constant dense<0.000000e+00> : vector<4xf32>
    %21 = vector.multi_reduction <add>, %20, %cst_12 [0] : vector<64x4xf32> to vector<4xf32>
    %22 = vector.shape_cast %21 : vector<4xf32> to vector<1x4xf32>
    %cst_13 = arith.constant 0.000000e+00 : f32
    %23 = vector.broadcast %cst_13 : f32 to vector<1x4xf32>
    %24 = arith.maximumf %22, %23 : vector<1x4xf32>
    %25 = arith.addf %18, %24 : vector<1x4xf32>
    %26 = vector.broadcast %25 : vector<1x4xf32> to vector<64x4xf32>
    %27 = arith.mulf %1, %26 : vector<64x4xf32>
    %cst_14 = arith.constant dense<0.000000e+00> : vector<64xf32>
    %28 = vector.multi_reduction <add>, %27, %cst_14 [1] : vector<64x4xf32> to vector<64xf32>
    %29 = vector.shape_cast %28 : vector<64xf32> to vector<64x1xf32>
    %cst_15 = arith.constant 0.000000e+00 : f32
    %30 = vector.broadcast %cst_15 : f32 to vector<64x1xf32>
    %31 = arith.subf %30, %29 : vector<64x1xf32>
    %32 = math.exp %31 : vector<64x1xf32>
    %cst_16 = arith.constant 1.000000e+00 : f32
    %33 = vector.broadcast %cst_16 : f32 to vector<64x1xf32>
    %34 = arith.addf %33, %32 : vector<64x1xf32>
    %cst_17 = arith.constant 1.000000e+00 : f32
    %35 = vector.broadcast %cst_17 : f32 to vector<64x1xf32>
    %36 = arith.divf %35, %34 : vector<64x1xf32>
    %37 = vector.broadcast %36 : vector<64x1xf32> to vector<64x256xf32>
    %38 = arith.mulf %6, %37 : vector<64x256xf32>
    %cst_18 = arith.constant dense<0xFF800000> : vector<256xf32>
    %39 = vector.multi_reduction <maximumf>, %38, %cst_18 [0] : vector<64x256xf32> to vector<256xf32>
    %40 = vector.shape_cast %39 : vector<256xf32> to vector<1x256xf32>
    %cst_19 = arith.constant dense<0.000000e+00> : vector<256xf32>
    %41 = vector.multi_reduction <add>, %38, %cst_19 [0] : vector<64x256xf32> to vector<256xf32>
    %42 = vector.shape_cast %41 : vector<256xf32> to vector<1x256xf32>
    %cst_20 = arith.constant 1.562500e-02 : f32
    %43 = vector.broadcast %cst_20 : f32 to vector<1x256xf32>
    %44 = arith.mulf %42, %43 : vector<1x256xf32>
    %cst_21 = arith.constant 0.000000e+00 : f32
    %45 = vector.broadcast %cst_21 : f32 to vector<1x384xf32>
    %c0_22 = arith.constant 0 : index
    %c0_23 = arith.constant 0 : index
    %46 = vector.load %arg8[%c0_22, %c0_23] : memref<1x384xf32, #tpu.memory_space<vmem>>, vector<1x384xf32>
    tpu.vector_store %arg8[%c0_22, %c0_23], %45 {strides = array<i32>} : memref<1x384xf32, #tpu.memory_space<vmem>>, vector<1x384xf32>,
    %cst_24 = arith.constant 0.000000e+00 : f32
    %47 = vector.broadcast %cst_24 : f32 to vector<1x384xf32>
    %c0_25 = arith.constant 0 : index
    %c0_26 = arith.constant 0 : index
    %48 = vector.load %arg9[%c0_25, %c0_26] : memref<1x384xf32, #tpu.memory_space<vmem>>, vector<1x384xf32>
    tpu.vector_store %arg9[%c0_25, %c0_26], %47 {strides = array<i32>} : memref<1x384xf32, #tpu.memory_space<vmem>>, vector<1x384xf32>,
    %c0_27 = arith.constant 0 : index
    %c51 = arith.constant 51 : index
    %49 = vector.load %arg8[%c0_27, %c51] : memref<1x384xf32, #tpu.memory_space<vmem>>, vector<1x256xf32>
    tpu.vector_store %arg8[%c0_27, %c51], %40 {strides = array<i32>} : memref<1x384xf32, #tpu.memory_space<vmem>>, vector<1x256xf32>,
    %c0_28 = arith.constant 0 : index
    %c51_29 = arith.constant 51 : index
    %50 = vector.load %arg9[%c0_28, %c51_29] : memref<1x384xf32, #tpu.memory_space<vmem>>, vector<1x256xf32>
    tpu.vector_store %arg9[%c0_28, %c51_29], %44 {strides = array<i32>} : memref<1x384xf32, #tpu.memory_space<vmem>>, vector<1x256xf32>,
    %c0_30 = arith.constant 0 : index
    %c0_31 = arith.constant 0 : index
    %51 = vector.load %arg4[%c0_30, %c0_31] : memref<7x256xf32, #tpu.memory_space<vmem>>, vector<1x256xf32>
    %c0_32 = arith.constant 0 : index
    %52 = memref.load %arg5[%c0_32] : memref<98xf32, #tpu.memory_space<smem>>
    %c0_33 = arith.constant 0 : index
    %c0_34 = arith.constant 0 : index
    %53 = vector.load %arg8[%c0_33, %c0_34] : memref<1x384xf32, #tpu.memory_space<vmem>>, vector<1x256xf32>
    %54 = vector.broadcast %52 : f32 to vector<1x256xf32>
    %55 = arith.mulf %54, %53 : vector<1x256xf32>
    %c7 = arith.constant 7 : index
    %56 = memref.load %arg5[%c7] : memref<98xf32, #tpu.memory_space<smem>>
    %c0_35 = arith.constant 0 : index
    %c16 = arith.constant 16 : index
    %57 = vector.load %arg8[%c0_35, %c16] : memref<1x384xf32, #tpu.memory_space<vmem>>, vector<1x256xf32>
    %58 = vector.broadcast %56 : f32 to vector<1x256xf32>
    %59 = arith.mulf %58, %57 : vector<1x256xf32>
    %60 = arith.addf %55, %59 : vector<1x256xf32>
    %c14 = arith.constant 14 : index
    %61 = memref.load %arg5[%c14] : memref<98xf32, #tpu.memory_space<smem>>
    %c0_36 = arith.constant 0 : index
    %c32 = arith.constant 32 : index
    %62 = vector.load %arg8[%c0_36, %c32] : memref<1x384xf32, #tpu.memory_space<vmem>>, vector<1x256xf32>
    %63 = vector.broadcast %61 : f32 to vector<1x256xf32>
    %64 = arith.mulf %63, %62 : vector<1x256xf32>
    %65 = arith.addf %60, %64 : vector<1x256xf32>
    %c21 = arith.constant 21 : index
    %66 = memref.load %arg5[%c21] : memref<98xf32, #tpu.memory_space<smem>>
    %c0_37 = arith.constant 0 : index
    %c48 = arith.constant 48 : index
    %67 = vector.load %arg8[%c0_37, %c48] : memref<1x384xf32, #tpu.memory_space<vmem>>, vector<1x256xf32>
    %68 = vector.broadcast %66 : f32 to vector<1x256xf32>
    %69 = arith.mulf %68, %67 : vector<1x256xf32>
    %70 = arith.addf %65, %69 : vector<1x256xf32>
    %c28 = arith.constant 28 : index
    %71 = memref.load %arg5[%c28] : memref<98xf32, #tpu.memory_space<smem>>
    %c0_38 = arith.constant 0 : index
    %c64 = arith.constant 64 : index
    %72 = vector.load %arg8[%c0_38, %c64] : memref<1x384xf32, #tpu.memory_space<vmem>>, vector<1x256xf32>
    %73 = vector.broadcast %71 : f32 to vector<1x256xf32>
    %74 = arith.mulf %73, %72 : vector<1x256xf32>
    %75 = arith.addf %70, %74 : vector<1x256xf32>
    %c35 = arith.constant 35 : index
    %76 = memref.load %arg5[%c35] : memref<98xf32, #tpu.memory_space<smem>>
    %c0_39 = arith.constant 0 : index
    %c80 = arith.constant 80 : index
    %77 = vector.load %arg8[%c0_39, %c80] : memref<1x384xf32, #tpu.memory_space<vmem>>, vector<1x256xf32>
    %78 = vector.broadcast %76 : f32 to vector<1x256xf32>
    %79 = arith.mulf %78, %77 : vector<1x256xf32>
    %80 = arith.addf %75, %79 : vector<1x256xf32>
    %c42 = arith.constant 42 : index
    %81 = memref.load %arg5[%c42] : memref<98xf32, #tpu.memory_space<smem>>
    %c0_40 = arith.constant 0 : index
    %c96 = arith.constant 96 : index
    %82 = vector.load %arg8[%c0_40, %c96] : memref<1x384xf32, #tpu.memory_space<vmem>>, vector<1x256xf32>
    %83 = vector.broadcast %81 : f32 to vector<1x256xf32>
    %84 = arith.mulf %83, %82 : vector<1x256xf32>
    %85 = arith.addf %80, %84 : vector<1x256xf32>
    %86 = arith.mulf %51, %85 : vector<1x256xf32>
    %87 = arith.addf %4, %86 : vector<1x256xf32>
    %c49 = arith.constant 49 : index
    %88 = memref.load %arg5[%c49] : memref<98xf32, #tpu.memory_space<smem>>
    %c0_41 = arith.constant 0 : index
    %c0_42 = arith.constant 0 : index
    %89 = vector.load %arg9[%c0_41, %c0_42] : memref<1x384xf32, #tpu.memory_space<vmem>>, vector<1x256xf32>
    %90 = vector.broadcast %88 : f32 to vector<1x256xf32>
    %91 = arith.mulf %90, %89 : vector<1x256xf32>
    %c56 = arith.constant 56 : index
    %92 = memref.load %arg5[%c56] : memref<98xf32, #tpu.memory_space<smem>>
    %c0_43 = arith.constant 0 : index
    %c16_44 = arith.constant 16 : index
    %93 = vector.load %arg9[%c0_43, %c16_44] : memref<1x384xf32, #tpu.memory_space<vmem>>, vector<1x256xf32>
    %94 = vector.broadcast %92 : f32 to vector<1x256xf32>
    %95 = arith.mulf %94, %93 : vector<1x256xf32>
    %96 = arith.addf %91, %95 : vector<1x256xf32>
    %c63 = arith.constant 63 : index
    %97 = memref.load %arg5[%c63] : memref<98xf32, #tpu.memory_space<smem>>
    %c0_45 = arith.constant 0 : index
    %c32_46 = arith.constant 32 : index
    %98 = vector.load %arg9[%c0_45, %c32_46] : memref<1x384xf32, #tpu.memory_space<vmem>>, vector<1x256xf32>
    %99 = vector.broadcast %97 : f32 to vector<1x256xf32>
    %100 = arith.mulf %99, %98 : vector<1x256xf32>
    %101 = arith.addf %96, %100 : vector<1x256xf32>
    %c70 = arith.constant 70 : index
    %102 = memref.load %arg5[%c70] : memref<98xf32, #tpu.memory_space<smem>>
    %c0_47 = arith.constant 0 : index
    %c48_48 = arith.constant 48 : index
    %103 = vector.load %arg9[%c0_47, %c48_48] : memref<1x384xf32, #tpu.memory_space<vmem>>, vector<1x256xf32>
    %104 = vector.broadcast %102 : f32 to vector<1x256xf32>
    %105 = arith.mulf %104, %103 : vector<1x256xf32>
    %106 = arith.addf %101, %105 : vector<1x256xf32>
    %c77 = arith.constant 77 : index
    %107 = memref.load %arg5[%c77] : memref<98xf32, #tpu.memory_space<smem>>
    %c0_49 = arith.constant 0 : index
    %c64_50 = arith.constant 64 : index
    %108 = vector.load %arg9[%c0_49, %c64_50] : memref<1x384xf32, #tpu.memory_space<vmem>>, vector<1x256xf32>
    %109 = vector.broadcast %107 : f32 to vector<1x256xf32>
    %110 = arith.mulf %109, %108 : vector<1x256xf32>
    %111 = arith.addf %106, %110 : vector<1x256xf32>
    %c84 = arith.constant 84 : index
    %112 = memref.load %arg5[%c84] : memref<98xf32, #tpu.memory_space<smem>>
    %c0_51 = arith.constant 0 : index
    %c80_52 = arith.constant 80 : index
    %113 = vector.load %arg9[%c0_51, %c80_52] : memref<1x384xf32, #tpu.memory_space<vmem>>, vector<1x256xf32>
    %114 = vector.broadcast %112 : f32 to vector<1x256xf32>
    %115 = arith.mulf %114, %113 : vector<1x256xf32>
    %116 = arith.addf %111, %115 : vector<1x256xf32>
    %c91 = arith.constant 91 : index
    %117 = memref.load %arg5[%c91] : memref<98xf32, #tpu.memory_space<smem>>
    %c0_53 = arith.constant 0 : index
    %c96_54 = arith.constant 96 : index
    %118 = vector.load %arg9[%c0_53, %c96_54] : memref<1x384xf32, #tpu.memory_space<vmem>>, vector<1x256xf32>
    %119 = vector.broadcast %117 : f32 to vector<1x256xf32>
    %120 = arith.mulf %119, %118 : vector<1x256xf32>
    %121 = arith.addf %116, %120 : vector<1x256xf32>
    %122 = arith.mulf %51, %121 : vector<1x256xf32>
    %123 = arith.addf %2, %122 : vector<1x256xf32>
    %c1 = arith.constant 1 : index
    %c0_55 = arith.constant 0 : index
    %124 = vector.load %arg4[%c1, %c0_55] : memref<7x256xf32, #tpu.memory_space<vmem>>, vector<1x256xf32>
    %c1_56 = arith.constant 1 : index
    %125 = memref.load %arg5[%c1_56] : memref<98xf32, #tpu.memory_space<smem>>
    %c0_57 = arith.constant 0 : index
    %c1_58 = arith.constant 1 : index
    %126 = vector.load %arg8[%c0_57, %c1_58] : memref<1x384xf32, #tpu.memory_space<vmem>>, vector<1x256xf32>
    %127 = vector.broadcast %125 : f32 to vector<1x256xf32>
    %128 = arith.mulf %127, %126 : vector<1x256xf32>
    %c8 = arith.constant 8 : index
    %129 = memref.load %arg5[%c8] : memref<98xf32, #tpu.memory_space<smem>>
    %c0_59 = arith.constant 0 : index
    %c17 = arith.constant 17 : index
    %130 = vector.load %arg8[%c0_59, %c17] : memref<1x384xf32, #tpu.memory_space<vmem>>, vector<1x256xf32>
    %131 = vector.broadcast %129 : f32 to vector<1x256xf32>
    %132 = arith.mulf %131, %130 : vector<1x256xf32>
    %133 = arith.addf %128, %132 : vector<1x256xf32>
    %c15 = arith.constant 15 : index
    %134 = memref.load %arg5[%c15] : memref<98xf32, #tpu.memory_space<smem>>
    %c0_60 = arith.constant 0 : index
    %c33 = arith.constant 33 : index
    %135 = vector.load %arg8[%c0_60, %c33] : memref<1x384xf32, #tpu.memory_space<vmem>>, vector<1x256xf32>
    %136 = vector.broadcast %134 : f32 to vector<1x256xf32>
    %137 = arith.mulf %136, %135 : vector<1x256xf32>
    %138 = arith.addf %133, %137 : vector<1x256xf32>
    %c22 = arith.constant 22 : index
    %139 = memref.load %arg5[%c22] : memref<98xf32, #tpu.memory_space<smem>>
    %c0_61 = arith.constant 0 : index
    %c49_62 = arith.constant 49 : index
    %140 = vector.load %arg8[%c0_61, %c49_62] : memref<1x384xf32, #tpu.memory_space<vmem>>, vector<1x256xf32>
    %141 = vector.broadcast %139 : f32 to vector<1x256xf32>
    %142 = arith.mulf %141, %140 : vector<1x256xf32>
    %143 = arith.addf %138, %142 : vector<1x256xf32>
    %c29 = arith.constant 29 : index
    %144 = memref.load %arg5[%c29] : memref<98xf32, #tpu.memory_space<smem>>
    %c0_63 = arith.constant 0 : index
    %c65 = arith.constant 65 : index
    %145 = vector.load %arg8[%c0_63, %c65] : memref<1x384xf32, #tpu.memory_space<vmem>>, vector<1x256xf32>
    %146 = vector.broadcast %144 : f32 to vector<1x256xf32>
    %147 = arith.mulf %146, %145 : vector<1x256xf32>
    %148 = arith.addf %143, %147 : vector<1x256xf32>
    %c36 = arith.constant 36 : index
    %149 = memref.load %arg5[%c36] : memref<98xf32, #tpu.memory_space<smem>>
    %c0_64 = arith.constant 0 : index
    %c81 = arith.constant 81 : index
    %150 = vector.load %arg8[%c0_64, %c81] : memref<1x384xf32, #tpu.memory_space<vmem>>, vector<1x256xf32>
    %151 = vector.broadcast %149 : f32 to vector<1x256xf32>
    %152 = arith.mulf %151, %150 : vector<1x256xf32>
    %153 = arith.addf %148, %152 : vector<1x256xf32>
    %c43 = arith.constant 43 : index
    %154 = memref.load %arg5[%c43] : memref<98xf32, #tpu.memory_space<smem>>
    %c0_65 = arith.constant 0 : index
    %c97 = arith.constant 97 : index
    %155 = vector.load %arg8[%c0_65, %c97] : memref<1x384xf32, #tpu.memory_space<vmem>>, vector<1x256xf32>
    %156 = vector.broadcast %154 : f32 to vector<1x256xf32>
    %157 = arith.mulf %156, %155 : vector<1x256xf32>
    %158 = arith.addf %153, %157 : vector<1x256xf32>
    %159 = arith.mulf %124, %158 : vector<1x256xf32>
    %160 = arith.addf %2, %159 : vector<1x256xf32>
    %c50 = arith.constant 50 : index
    %161 = memref.load %arg5[%c50] : memref<98xf32, #tpu.memory_space<smem>>
    %c0_66 = arith.constant 0 : index
    %c1_67 = arith.constant 1 : index
    %162 = vector.load %arg9[%c0_66, %c1_67] : memref<1x384xf32, #tpu.memory_space<vmem>>, vector<1x256xf32>
    %163 = vector.broadcast %161 : f32 to vector<1x256xf32>
    %164 = arith.mulf %163, %162 : vector<1x256xf32>
    %c57 = arith.constant 57 : index
    %165 = memref.load %arg5[%c57] : memref<98xf32, #tpu.memory_space<smem>>
    %c0_68 = arith.constant 0 : index
    %c17_69 = arith.constant 17 : index
    %166 = vector.load %arg9[%c0_68, %c17_69] : memref<1x384xf32, #tpu.memory_space<vmem>>, vector<1x256xf32>
    %167 = vector.broadcast %165 : f32 to vector<1x256xf32>
    %168 = arith.mulf %167, %166 : vector<1x256xf32>
    %169 = arith.addf %164, %168 : vector<1x256xf32>
    %c64_70 = arith.constant 64 : index
    %170 = memref.load %arg5[%c64_70] : memref<98xf32, #tpu.memory_space<smem>>
    %c0_71 = arith.constant 0 : index
    %c33_72 = arith.constant 33 : index
    %171 = vector.load %arg9[%c0_71, %c33_72] : memref<1x384xf32, #tpu.memory_space<vmem>>, vector<1x256xf32>
    %172 = vector.broadcast %170 : f32 to vector<1x256xf32>
    %173 = arith.mulf %172, %171 : vector<1x256xf32>
    %174 = arith.addf %169, %173 : vector<1x256xf32>
    %c71 = arith.constant 71 : index
    %175 = memref.load %arg5[%c71] : memref<98xf32, #tpu.memory_space<smem>>
    %c0_73 = arith.constant 0 : index
    %c49_74 = arith.constant 49 : index
    %176 = vector.load %arg9[%c0_73, %c49_74] : memref<1x384xf32, #tpu.memory_space<vmem>>, vector<1x256xf32>
    %177 = vector.broadcast %175 : f32 to vector<1x256xf32>
    %178 = arith.mulf %177, %176 : vector<1x256xf32>
    %179 = arith.addf %174, %178 : vector<1x256xf32>
    %c78 = arith.constant 78 : index
    %180 = memref.load %arg5[%c78] : memref<98xf32, #tpu.memory_space<smem>>
    %c0_75 = arith.constant 0 : index
    %c65_76 = arith.constant 65 : index
    %181 = vector.load %arg9[%c0_75, %c65_76] : memref<1x384xf32, #tpu.memory_space<vmem>>, vector<1x256xf32>
    %182 = vector.broadcast %180 : f32 to vector<1x256xf32>
    %183 = arith.mulf %182, %181 : vector<1x256xf32>
    %184 = arith.addf %179, %183 : vector<1x256xf32>
    %c85 = arith.constant 85 : index
    %185 = memref.load %arg5[%c85] : memref<98xf32, #tpu.memory_space<smem>>
    %c0_77 = arith.constant 0 : index
    %c81_78 = arith.constant 81 : index
    %186 = vector.load %arg9[%c0_77, %c81_78] : memref<1x384xf32, #tpu.memory_space<vmem>>, vector<1x256xf32>
    %187 = vector.broadcast %185 : f32 to vector<1x256xf32>
    %188 = arith.mulf %187, %186 : vector<1x256xf32>
    %189 = arith.addf %184, %188 : vector<1x256xf32>
    %c92 = arith.constant 92 : index
    %190 = memref.load %arg5[%c92] : memref<98xf32, #tpu.memory_space<smem>>
    %c0_79 = arith.constant 0 : index
    %c97_80 = arith.constant 97 : index
    %191 = vector.load %arg9[%c0_79, %c97_80] : memref<1x384xf32, #tpu.memory_space<vmem>>, vector<1x256xf32>
    %192 = vector.broadcast %190 : f32 to vector<1x256xf32>
    %193 = arith.mulf %192, %191 : vector<1x256xf32>
    %194 = arith.addf %189, %193 : vector<1x256xf32>
    %195 = arith.mulf %124, %194 : vector<1x256xf32>
    %196 = arith.addf %2, %195 : vector<1x256xf32>
    %c2 = arith.constant 2 : index
    %c0_81 = arith.constant 0 : index
    %197 = vector.load %arg4[%c2, %c0_81] : memref<7x256xf32, #tpu.memory_space<vmem>>, vector<1x256xf32>
    %c2_82 = arith.constant 2 : index
    %198 = memref.load %arg5[%c2_82] : memref<98xf32, #tpu.memory_space<smem>>
    %c0_83 = arith.constant 0 : index
    %c2_84 = arith.constant 2 : index
    %199 = vector.load %arg8[%c0_83, %c2_84] : memref<1x384xf32, #tpu.memory_space<vmem>>, vector<1x256xf32>
    %200 = vector.broadcast %198 : f32 to vector<1x256xf32>
    %201 = arith.mulf %200, %199 : vector<1x256xf32>
    %c9 = arith.constant 9 : index
    %202 = memref.load %arg5[%c9] : memref<98xf32, #tpu.memory_space<smem>>
    %c0_85 = arith.constant 0 : index
    %c18 = arith.constant 18 : index
    %203 = vector.load %arg8[%c0_85, %c18] : memref<1x384xf32, #tpu.memory_space<vmem>>, vector<1x256xf32>
    %204 = vector.broadcast %202 : f32 to vector<1x256xf32>
    %205 = arith.mulf %204, %203 : vector<1x256xf32>
    %206 = arith.addf %201, %205 : vector<1x256xf32>
    %c16_86 = arith.constant 16 : index
    %207 = memref.load %arg5[%c16_86] : memref<98xf32, #tpu.memory_space<smem>>
    %c0_87 = arith.constant 0 : index
    %c34 = arith.constant 34 : index
    %208 = vector.load %arg8[%c0_87, %c34] : memref<1x384xf32, #tpu.memory_space<vmem>>, vector<1x256xf32>
    %209 = vector.broadcast %207 : f32 to vector<1x256xf32>
    %210 = arith.mulf %209, %208 : vector<1x256xf32>
    %211 = arith.addf %206, %210 : vector<1x256xf32>
    %c23 = arith.constant 23 : index
    %212 = memref.load %arg5[%c23] : memref<98xf32, #tpu.memory_space<smem>>
    %c0_88 = arith.constant 0 : index
    %c50_89 = arith.constant 50 : index
    %213 = vector.load %arg8[%c0_88, %c50_89] : memref<1x384xf32, #tpu.memory_space<vmem>>, vector<1x256xf32>
    %214 = vector.broadcast %212 : f32 to vector<1x256xf32>
    %215 = arith.mulf %214, %213 : vector<1x256xf32>
    %216 = arith.addf %211, %215 : vector<1x256xf32>
    %c30 = arith.constant 30 : index
    %217 = memref.load %arg5[%c30] : memref<98xf32, #tpu.memory_space<smem>>
    %c0_90 = arith.constant 0 : index
    %c66 = arith.constant 66 : index
    %218 = vector.load %arg8[%c0_90, %c66] : memref<1x384xf32, #tpu.memory_space<vmem>>, vector<1x256xf32>
    %219 = vector.broadcast %217 : f32 to vector<1x256xf32>
    %220 = arith.mulf %219, %218 : vector<1x256xf32>
    %221 = arith.addf %216, %220 : vector<1x256xf32>
    %c37 = arith.constant 37 : index
    %222 = memref.load %arg5[%c37] : memref<98xf32, #tpu.memory_space<smem>>
    %c0_91 = arith.constant 0 : index
    %c82 = arith.constant 82 : index
    %223 = vector.load %arg8[%c0_91, %c82] : memref<1x384xf32, #tpu.memory_space<vmem>>, vector<1x256xf32>
    %224 = vector.broadcast %222 : f32 to vector<1x256xf32>
    %225 = arith.mulf %224, %223 : vector<1x256xf32>
    %226 = arith.addf %221, %225 : vector<1x256xf32>
    %c44 = arith.constant 44 : index
    %227 = memref.load %arg5[%c44] : memref<98xf32, #tpu.memory_space<smem>>
    %c0_92 = arith.constant 0 : index
    %c98 = arith.constant 98 : index
    %228 = vector.load %arg8[%c0_92, %c98] : memref<1x384xf32, #tpu.memory_space<vmem>>, vector<1x256xf32>
    %229 = vector.broadcast %227 : f32 to vector<1x256xf32>
    %230 = arith.mulf %229, %228 : vector<1x256xf32>
    %231 = arith.addf %226, %230 : vector<1x256xf32>
    %232 = arith.mulf %197, %231 : vector<1x256xf32>
    %233 = arith.addf %87, %232 : vector<1x256xf32>
    %c51_93 = arith.constant 51 : index
    %234 = memref.load %arg5[%c51_93] : memref<98xf32, #tpu.memory_space<smem>>
    %c0_94 = arith.constant 0 : index
    %c2_95 = arith.constant 2 : index
    %235 = vector.load %arg9[%c0_94, %c2_95] : memref<1x384xf32, #tpu.memory_space<vmem>>, vector<1x256xf32>
    %236 = vector.broadcast %234 : f32 to vector<1x256xf32>
    %237 = arith.mulf %236, %235 : vector<1x256xf32>
    %c58 = arith.constant 58 : index
    %238 = memref.load %arg5[%c58] : memref<98xf32, #tpu.memory_space<smem>>
    %c0_96 = arith.constant 0 : index
    %c18_97 = arith.constant 18 : index
    %239 = vector.load %arg9[%c0_96, %c18_97] : memref<1x384xf32, #tpu.memory_space<vmem>>, vector<1x256xf32>
    %240 = vector.broadcast %238 : f32 to vector<1x256xf32>
    %241 = arith.mulf %240, %239 : vector<1x256xf32>
    %242 = arith.addf %237, %241 : vector<1x256xf32>
    %c65_98 = arith.constant 65 : index
    %243 = memref.load %arg5[%c65_98] : memref<98xf32, #tpu.memory_space<smem>>
    %c0_99 = arith.constant 0 : index
    %c34_100 = arith.constant 34 : index
    %244 = vector.load %arg9[%c0_99, %c34_100] : memref<1x384xf32, #tpu.memory_space<vmem>>, vector<1x256xf32>
    %245 = vector.broadcast %243 : f32 to vector<1x256xf32>
    %246 = arith.mulf %245, %244 : vector<1x256xf32>
    %247 = arith.addf %242, %246 : vector<1x256xf32>
    %c72 = arith.constant 72 : index
    %248 = memref.load %arg5[%c72] : memref<98xf32, #tpu.memory_space<smem>>
    %c0_101 = arith.constant 0 : index
    %c50_102 = arith.constant 50 : index
    %249 = vector.load %arg9[%c0_101, %c50_102] : memref<1x384xf32, #tpu.memory_space<vmem>>, vector<1x256xf32>
    %250 = vector.broadcast %248 : f32 to vector<1x256xf32>
    %251 = arith.mulf %250, %249 : vector<1x256xf32>
    %252 = arith.addf %247, %251 : vector<1x256xf32>
    %c79 = arith.constant 79 : index
    %253 = memref.load %arg5[%c79] : memref<98xf32, #tpu.memory_space<smem>>
    %c0_103 = arith.constant 0 : index
    %c66_104 = arith.constant 66 : index
    %254 = vector.load %arg9[%c0_103, %c66_104] : memref<1x384xf32, #tpu.memory_space<vmem>>, vector<1x256xf32>
    %255 = vector.broadcast %253 : f32 to vector<1x256xf32>
    %256 = arith.mulf %255, %254 : vector<1x256xf32>
    %257 = arith.addf %252, %256 : vector<1x256xf32>
    %c86 = arith.constant 86 : index
    %258 = memref.load %arg5[%c86] : memref<98xf32, #tpu.memory_space<smem>>
    %c0_105 = arith.constant 0 : index
    %c82_106 = arith.constant 82 : index
    %259 = vector.load %arg9[%c0_105, %c82_106] : memref<1x384xf32, #tpu.memory_space<vmem>>, vector<1x256xf32>
    %260 = vector.broadcast %258 : f32 to vector<1x256xf32>
    %261 = arith.mulf %260, %259 : vector<1x256xf32>
    %262 = arith.addf %257, %261 : vector<1x256xf32>
    %c93 = arith.constant 93 : index
    %263 = memref.load %arg5[%c93] : memref<98xf32, #tpu.memory_space<smem>>
    %c0_107 = arith.constant 0 : index
    %c98_108 = arith.constant 98 : index
    %264 = vector.load %arg9[%c0_107, %c98_108] : memref<1x384xf32, #tpu.memory_space<vmem>>, vector<1x256xf32>
    %265 = vector.broadcast %263 : f32 to vector<1x256xf32>
    %266 = arith.mulf %265, %264 : vector<1x256xf32>
    %267 = arith.addf %262, %266 : vector<1x256xf32>
    %268 = arith.mulf %197, %267 : vector<1x256xf32>
    %269 = arith.addf %123, %268 : vector<1x256xf32>
    %c3 = arith.constant 3 : index
    %c0_109 = arith.constant 0 : index
    %270 = vector.load %arg4[%c3, %c0_109] : memref<7x256xf32, #tpu.memory_space<vmem>>, vector<1x256xf32>
    %c3_110 = arith.constant 3 : index
    %271 = memref.load %arg5[%c3_110] : memref<98xf32, #tpu.memory_space<smem>>
    %c0_111 = arith.constant 0 : index
    %c3_112 = arith.constant 3 : index
    %272 = vector.load %arg8[%c0_111, %c3_112] : memref<1x384xf32, #tpu.memory_space<vmem>>, vector<1x256xf32>
    %273 = vector.broadcast %271 : f32 to vector<1x256xf32>
    %274 = arith.mulf %273, %272 : vector<1x256xf32>
    %c10 = arith.constant 10 : index
    %275 = memref.load %arg5[%c10] : memref<98xf32, #tpu.memory_space<smem>>
    %c0_113 = arith.constant 0 : index
    %c19 = arith.constant 19 : index
    %276 = vector.load %arg8[%c0_113, %c19] : memref<1x384xf32, #tpu.memory_space<vmem>>, vector<1x256xf32>
    %277 = vector.broadcast %275 : f32 to vector<1x256xf32>
    %278 = arith.mulf %277, %276 : vector<1x256xf32>
    %279 = arith.addf %274, %278 : vector<1x256xf32>
    %c17_114 = arith.constant 17 : index
    %280 = memref.load %arg5[%c17_114] : memref<98xf32, #tpu.memory_space<smem>>
    %c0_115 = arith.constant 0 : index
    %c35_116 = arith.constant 35 : index
    %281 = vector.load %arg8[%c0_115, %c35_116] : memref<1x384xf32, #tpu.memory_space<vmem>>, vector<1x256xf32>
    %282 = vector.broadcast %280 : f32 to vector<1x256xf32>
    %283 = arith.mulf %282, %281 : vector<1x256xf32>
    %284 = arith.addf %279, %283 : vector<1x256xf32>
    %c24 = arith.constant 24 : index
    %285 = memref.load %arg5[%c24] : memref<98xf32, #tpu.memory_space<smem>>
    %c0_117 = arith.constant 0 : index
    %c51_118 = arith.constant 51 : index
    %286 = vector.load %arg8[%c0_117, %c51_118] : memref<1x384xf32, #tpu.memory_space<vmem>>, vector<1x256xf32>
    %287 = vector.broadcast %285 : f32 to vector<1x256xf32>
    %288 = arith.mulf %287, %286 : vector<1x256xf32>
    %289 = arith.addf %284, %288 : vector<1x256xf32>
    %c31 = arith.constant 31 : index
    %290 = memref.load %arg5[%c31] : memref<98xf32, #tpu.memory_space<smem>>
    %c0_119 = arith.constant 0 : index
    %c67 = arith.constant 67 : index
    %291 = vector.load %arg8[%c0_119, %c67] : memref<1x384xf32, #tpu.memory_space<vmem>>, vector<1x256xf32>
    %292 = vector.broadcast %290 : f32 to vector<1x256xf32>
    %293 = arith.mulf %292, %291 : vector<1x256xf32>
    %294 = arith.addf %289, %293 : vector<1x256xf32>
    %c38 = arith.constant 38 : index
    %295 = memref.load %arg5[%c38] : memref<98xf32, #tpu.memory_space<smem>>
    %c0_120 = arith.constant 0 : index
    %c83 = arith.constant 83 : index
    %296 = vector.load %arg8[%c0_120, %c83] : memref<1x384xf32, #tpu.memory_space<vmem>>, vector<1x256xf32>
    %297 = vector.broadcast %295 : f32 to vector<1x256xf32>
    %298 = arith.mulf %297, %296 : vector<1x256xf32>
    %299 = arith.addf %294, %298 : vector<1x256xf32>
    %c45 = arith.constant 45 : index
    %300 = memref.load %arg5[%c45] : memref<98xf32, #tpu.memory_space<smem>>
    %c0_121 = arith.constant 0 : index
    %c99 = arith.constant 99 : index
    %301 = vector.load %arg8[%c0_121, %c99] : memref<1x384xf32, #tpu.memory_space<vmem>>, vector<1x256xf32>
    %302 = vector.broadcast %300 : f32 to vector<1x256xf32>
    %303 = arith.mulf %302, %301 : vector<1x256xf32>
    %304 = arith.addf %299, %303 : vector<1x256xf32>
    %305 = arith.mulf %270, %304 : vector<1x256xf32>
    %306 = arith.addf %160, %305 : vector<1x256xf32>
    %c52 = arith.constant 52 : index
    %307 = memref.load %arg5[%c52] : memref<98xf32, #tpu.memory_space<smem>>
    %c0_122 = arith.constant 0 : index
    %c3_123 = arith.constant 3 : index
    %308 = vector.load %arg9[%c0_122, %c3_123] : memref<1x384xf32, #tpu.memory_space<vmem>>, vector<1x256xf32>
    %309 = vector.broadcast %307 : f32 to vector<1x256xf32>
    %310 = arith.mulf %309, %308 : vector<1x256xf32>
    %c59 = arith.constant 59 : index
    %311 = memref.load %arg5[%c59] : memref<98xf32, #tpu.memory_space<smem>>
    %c0_124 = arith.constant 0 : index
    %c19_125 = arith.constant 19 : index
    %312 = vector.load %arg9[%c0_124, %c19_125] : memref<1x384xf32, #tpu.memory_space<vmem>>, vector<1x256xf32>
    %313 = vector.broadcast %311 : f32 to vector<1x256xf32>
    %314 = arith.mulf %313, %312 : vector<1x256xf32>
    %315 = arith.addf %310, %314 : vector<1x256xf32>
    %c66_126 = arith.constant 66 : index
    %316 = memref.load %arg5[%c66_126] : memref<98xf32, #tpu.memory_space<smem>>
    %c0_127 = arith.constant 0 : index
    %c35_128 = arith.constant 35 : index
    %317 = vector.load %arg9[%c0_127, %c35_128] : memref<1x384xf32, #tpu.memory_space<vmem>>, vector<1x256xf32>
    %318 = vector.broadcast %316 : f32 to vector<1x256xf32>
    %319 = arith.mulf %318, %317 : vector<1x256xf32>
    %320 = arith.addf %315, %319 : vector<1x256xf32>
    %c73 = arith.constant 73 : index
    %321 = memref.load %arg5[%c73] : memref<98xf32, #tpu.memory_space<smem>>
    %c0_129 = arith.constant 0 : index
    %c51_130 = arith.constant 51 : index
    %322 = vector.load %arg9[%c0_129, %c51_130] : memref<1x384xf32, #tpu.memory_space<vmem>>, vector<1x256xf32>
    %323 = vector.broadcast %321 : f32 to vector<1x256xf32>
    %324 = arith.mulf %323, %322 : vector<1x256xf32>
    %325 = arith.addf %320, %324 : vector<1x256xf32>
    %c80_131 = arith.constant 80 : index
    %326 = memref.load %arg5[%c80_131] : memref<98xf32, #tpu.memory_space<smem>>
    %c0_132 = arith.constant 0 : index
    %c67_133 = arith.constant 67 : index
    %327 = vector.load %arg9[%c0_132, %c67_133] : memref<1x384xf32, #tpu.memory_space<vmem>>, vector<1x256xf32>
    %328 = vector.broadcast %326 : f32 to vector<1x256xf32>
    %329 = arith.mulf %328, %327 : vector<1x256xf32>
    %330 = arith.addf %325, %329 : vector<1x256xf32>
    %c87 = arith.constant 87 : index
    %331 = memref.load %arg5[%c87] : memref<98xf32, #tpu.memory_space<smem>>
    %c0_134 = arith.constant 0 : index
    %c83_135 = arith.constant 83 : index
    %332 = vector.load %arg9[%c0_134, %c83_135] : memref<1x384xf32, #tpu.memory_space<vmem>>, vector<1x256xf32>
    %333 = vector.broadcast %331 : f32 to vector<1x256xf32>
    %334 = arith.mulf %333, %332 : vector<1x256xf32>
    %335 = arith.addf %330, %334 : vector<1x256xf32>
    %c94 = arith.constant 94 : index
    %336 = memref.load %arg5[%c94] : memref<98xf32, #tpu.memory_space<smem>>
    %c0_136 = arith.constant 0 : index
    %c99_137 = arith.constant 99 : index
    %337 = vector.load %arg9[%c0_136, %c99_137] : memref<1x384xf32, #tpu.memory_space<vmem>>, vector<1x256xf32>
    %338 = vector.broadcast %336 : f32 to vector<1x256xf32>
    %339 = arith.mulf %338, %337 : vector<1x256xf32>
    %340 = arith.addf %335, %339 : vector<1x256xf32>
    %341 = arith.mulf %270, %340 : vector<1x256xf32>
    %342 = arith.addf %196, %341 : vector<1x256xf32>
    %c4 = arith.constant 4 : index
    %c0_138 = arith.constant 0 : index
    %343 = vector.load %arg4[%c4, %c0_138] : memref<7x256xf32, #tpu.memory_space<vmem>>, vector<1x256xf32>
    %c4_139 = arith.constant 4 : index
    %344 = memref.load %arg5[%c4_139] : memref<98xf32, #tpu.memory_space<smem>>
    %c0_140 = arith.constant 0 : index
    %c4_141 = arith.constant 4 : index
    %345 = vector.load %arg8[%c0_140, %c4_141] : memref<1x384xf32, #tpu.memory_space<vmem>>, vector<1x256xf32>
    %346 = vector.broadcast %344 : f32 to vector<1x256xf32>
    %347 = arith.mulf %346, %345 : vector<1x256xf32>
    %c11 = arith.constant 11 : index
    %348 = memref.load %arg5[%c11] : memref<98xf32, #tpu.memory_space<smem>>
    %c0_142 = arith.constant 0 : index
    %c20 = arith.constant 20 : index
    %349 = vector.load %arg8[%c0_142, %c20] : memref<1x384xf32, #tpu.memory_space<vmem>>, vector<1x256xf32>
    %350 = vector.broadcast %348 : f32 to vector<1x256xf32>
    %351 = arith.mulf %350, %349 : vector<1x256xf32>
    %352 = arith.addf %347, %351 : vector<1x256xf32>
    %c18_143 = arith.constant 18 : index
    %353 = memref.load %arg5[%c18_143] : memref<98xf32, #tpu.memory_space<smem>>
    %c0_144 = arith.constant 0 : index
    %c36_145 = arith.constant 36 : index
    %354 = vector.load %arg8[%c0_144, %c36_145] : memref<1x384xf32, #tpu.memory_space<vmem>>, vector<1x256xf32>
    %355 = vector.broadcast %353 : f32 to vector<1x256xf32>
    %356 = arith.mulf %355, %354 : vector<1x256xf32>
    %357 = arith.addf %352, %356 : vector<1x256xf32>
    %c25 = arith.constant 25 : index
    %358 = memref.load %arg5[%c25] : memref<98xf32, #tpu.memory_space<smem>>
    %c0_146 = arith.constant 0 : index
    %c52_147 = arith.constant 52 : index
    %359 = vector.load %arg8[%c0_146, %c52_147] : memref<1x384xf32, #tpu.memory_space<vmem>>, vector<1x256xf32>
    %360 = vector.broadcast %358 : f32 to vector<1x256xf32>
    %361 = arith.mulf %360, %359 : vector<1x256xf32>
    %362 = arith.addf %357, %361 : vector<1x256xf32>
    %c32_148 = arith.constant 32 : index
    %363 = memref.load %arg5[%c32_148] : memref<98xf32, #tpu.memory_space<smem>>
    %c0_149 = arith.constant 0 : index
    %c68 = arith.constant 68 : index
    %364 = vector.load %arg8[%c0_149, %c68] : memref<1x384xf32, #tpu.memory_space<vmem>>, vector<1x256xf32>
    %365 = vector.broadcast %363 : f32 to vector<1x256xf32>
    %366 = arith.mulf %365, %364 : vector<1x256xf32>
    %367 = arith.addf %362, %366 : vector<1x256xf32>
    %c39 = arith.constant 39 : index
    %368 = memref.load %arg5[%c39] : memref<98xf32, #tpu.memory_space<smem>>
    %c0_150 = arith.constant 0 : index
    %c84_151 = arith.constant 84 : index
    %369 = vector.load %arg8[%c0_150, %c84_151] : memref<1x384xf32, #tpu.memory_space<vmem>>, vector<1x256xf32>
    %370 = vector.broadcast %368 : f32 to vector<1x256xf32>
    %371 = arith.mulf %370, %369 : vector<1x256xf32>
    %372 = arith.addf %367, %371 : vector<1x256xf32>
    %c46 = arith.constant 46 : index
    %373 = memref.load %arg5[%c46] : memref<98xf32, #tpu.memory_space<smem>>
    %c0_152 = arith.constant 0 : index
    %c100 = arith.constant 100 : index
    %374 = vector.load %arg8[%c0_152, %c100] : memref<1x384xf32, #tpu.memory_space<vmem>>, vector<1x256xf32>
    %375 = vector.broadcast %373 : f32 to vector<1x256xf32>
    %376 = arith.mulf %375, %374 : vector<1x256xf32>
    %377 = arith.addf %372, %376 : vector<1x256xf32>
    %378 = arith.mulf %343, %377 : vector<1x256xf32>
    %379 = arith.addf %233, %378 : vector<1x256xf32>
    %c53 = arith.constant 53 : index
    %380 = memref.load %arg5[%c53] : memref<98xf32, #tpu.memory_space<smem>>
    %c0_153 = arith.constant 0 : index
    %c4_154 = arith.constant 4 : index
    %381 = vector.load %arg9[%c0_153, %c4_154] : memref<1x384xf32, #tpu.memory_space<vmem>>, vector<1x256xf32>
    %382 = vector.broadcast %380 : f32 to vector<1x256xf32>
    %383 = arith.mulf %382, %381 : vector<1x256xf32>
    %c60 = arith.constant 60 : index
    %384 = memref.load %arg5[%c60] : memref<98xf32, #tpu.memory_space<smem>>
    %c0_155 = arith.constant 0 : index
    %c20_156 = arith.constant 20 : index
    %385 = vector.load %arg9[%c0_155, %c20_156] : memref<1x384xf32, #tpu.memory_space<vmem>>, vector<1x256xf32>
    %386 = vector.broadcast %384 : f32 to vector<1x256xf32>
    %387 = arith.mulf %386, %385 : vector<1x256xf32>
    %388 = arith.addf %383, %387 : vector<1x256xf32>
    %c67_157 = arith.constant 67 : index
    %389 = memref.load %arg5[%c67_157] : memref<98xf32, #tpu.memory_space<smem>>
    %c0_158 = arith.constant 0 : index
    %c36_159 = arith.constant 36 : index
    %390 = vector.load %arg9[%c0_158, %c36_159] : memref<1x384xf32, #tpu.memory_space<vmem>>, vector<1x256xf32>
    %391 = vector.broadcast %389 : f32 to vector<1x256xf32>
    %392 = arith.mulf %391, %390 : vector<1x256xf32>
    %393 = arith.addf %388, %392 : vector<1x256xf32>
    %c74 = arith.constant 74 : index
    %394 = memref.load %arg5[%c74] : memref<98xf32, #tpu.memory_space<smem>>
    %c0_160 = arith.constant 0 : index
    %c52_161 = arith.constant 52 : index
    %395 = vector.load %arg9[%c0_160, %c52_161] : memref<1x384xf32, #tpu.memory_space<vmem>>, vector<1x256xf32>
    %396 = vector.broadcast %394 : f32 to vector<1x256xf32>
    %397 = arith.mulf %396, %395 : vector<1x256xf32>
    %398 = arith.addf %393, %397 : vector<1x256xf32>
    %c81_162 = arith.constant 81 : index
    %399 = memref.load %arg5[%c81_162] : memref<98xf32, #tpu.memory_space<smem>>
    %c0_163 = arith.constant 0 : index
    %c68_164 = arith.constant 68 : index
    %400 = vector.load %arg9[%c0_163, %c68_164] : memref<1x384xf32, #tpu.memory_space<vmem>>, vector<1x256xf32>
    %401 = vector.broadcast %399 : f32 to vector<1x256xf32>
    %402 = arith.mulf %401, %400 : vector<1x256xf32>
    %403 = arith.addf %398, %402 : vector<1x256xf32>
    %c88 = arith.constant 88 : index
    %404 = memref.load %arg5[%c88] : memref<98xf32, #tpu.memory_space<smem>>
    %c0_165 = arith.constant 0 : index
    %c84_166 = arith.constant 84 : index
    %405 = vector.load %arg9[%c0_165, %c84_166] : memref<1x384xf32, #tpu.memory_space<vmem>>, vector<1x256xf32>
    %406 = vector.broadcast %404 : f32 to vector<1x256xf32>
    %407 = arith.mulf %406, %405 : vector<1x256xf32>
    %408 = arith.addf %403, %407 : vector<1x256xf32>
    %c95 = arith.constant 95 : index
    %409 = memref.load %arg5[%c95] : memref<98xf32, #tpu.memory_space<smem>>
    %c0_167 = arith.constant 0 : index
    %c100_168 = arith.constant 100 : index
    %410 = vector.load %arg9[%c0_167, %c100_168] : memref<1x384xf32, #tpu.memory_space<vmem>>, vector<1x256xf32>
    %411 = vector.broadcast %409 : f32 to vector<1x256xf32>
    %412 = arith.mulf %411, %410 : vector<1x256xf32>
    %413 = arith.addf %408, %412 : vector<1x256xf32>
    %414 = arith.mulf %343, %413 : vector<1x256xf32>
    %415 = arith.addf %269, %414 : vector<1x256xf32>
    %c5 = arith.constant 5 : index
    %c0_169 = arith.constant 0 : index
    %416 = vector.load %arg4[%c5, %c0_169] : memref<7x256xf32, #tpu.memory_space<vmem>>, vector<1x256xf32>
    %c5_170 = arith.constant 5 : index
    %417 = memref.load %arg5[%c5_170] : memref<98xf32, #tpu.memory_space<smem>>
    %c0_171 = arith.constant 0 : index
    %c5_172 = arith.constant 5 : index
    %418 = vector.load %arg8[%c0_171, %c5_172] : memref<1x384xf32, #tpu.memory_space<vmem>>, vector<1x256xf32>
    %419 = vector.broadcast %417 : f32 to vector<1x256xf32>
    %420 = arith.mulf %419, %418 : vector<1x256xf32>
    %c12 = arith.constant 12 : index
    %421 = memref.load %arg5[%c12] : memref<98xf32, #tpu.memory_space<smem>>
    %c0_173 = arith.constant 0 : index
    %c21_174 = arith.constant 21 : index
    %422 = vector.load %arg8[%c0_173, %c21_174] : memref<1x384xf32, #tpu.memory_space<vmem>>, vector<1x256xf32>
    %423 = vector.broadcast %421 : f32 to vector<1x256xf32>
    %424 = arith.mulf %423, %422 : vector<1x256xf32>
    %425 = arith.addf %420, %424 : vector<1x256xf32>
    %c19_175 = arith.constant 19 : index
    %426 = memref.load %arg5[%c19_175] : memref<98xf32, #tpu.memory_space<smem>>
    %c0_176 = arith.constant 0 : index
    %c37_177 = arith.constant 37 : index
    %427 = vector.load %arg8[%c0_176, %c37_177] : memref<1x384xf32, #tpu.memory_space<vmem>>, vector<1x256xf32>
    %428 = vector.broadcast %426 : f32 to vector<1x256xf32>
    %429 = arith.mulf %428, %427 : vector<1x256xf32>
    %430 = arith.addf %425, %429 : vector<1x256xf32>
    %c26 = arith.constant 26 : index
    %431 = memref.load %arg5[%c26] : memref<98xf32, #tpu.memory_space<smem>>
    %c0_178 = arith.constant 0 : index
    %c53_179 = arith.constant 53 : index
    %432 = vector.load %arg8[%c0_178, %c53_179] : memref<1x384xf32, #tpu.memory_space<vmem>>, vector<1x256xf32>
    %433 = vector.broadcast %431 : f32 to vector<1x256xf32>
    %434 = arith.mulf %433, %432 : vector<1x256xf32>
    %435 = arith.addf %430, %434 : vector<1x256xf32>
    %c33_180 = arith.constant 33 : index
    %436 = memref.load %arg5[%c33_180] : memref<98xf32, #tpu.memory_space<smem>>
    %c0_181 = arith.constant 0 : index
    %c69 = arith.constant 69 : index
    %437 = vector.load %arg8[%c0_181, %c69] : memref<1x384xf32, #tpu.memory_space<vmem>>, vector<1x256xf32>
    %438 = vector.broadcast %436 : f32 to vector<1x256xf32>
    %439 = arith.mulf %438, %437 : vector<1x256xf32>
    %440 = arith.addf %435, %439 : vector<1x256xf32>
    %c40 = arith.constant 40 : index
    %441 = memref.load %arg5[%c40] : memref<98xf32, #tpu.memory_space<smem>>
    %c0_182 = arith.constant 0 : index
    %c85_183 = arith.constant 85 : index
    %442 = vector.load %arg8[%c0_182, %c85_183] : memref<1x384xf32, #tpu.memory_space<vmem>>, vector<1x256xf32>
    %443 = vector.broadcast %441 : f32 to vector<1x256xf32>
    %444 = arith.mulf %443, %442 : vector<1x256xf32>
    %445 = arith.addf %440, %444 : vector<1x256xf32>
    %c47 = arith.constant 47 : index
    %446 = memref.load %arg5[%c47] : memref<98xf32, #tpu.memory_space<smem>>
    %c0_184 = arith.constant 0 : index
    %c101 = arith.constant 101 : index
    %447 = vector.load %arg8[%c0_184, %c101] : memref<1x384xf32, #tpu.memory_space<vmem>>, vector<1x256xf32>
    %448 = vector.broadcast %446 : f32 to vector<1x256xf32>
    %449 = arith.mulf %448, %447 : vector<1x256xf32>
    %450 = arith.addf %445, %449 : vector<1x256xf32>
    %451 = arith.mulf %416, %450 : vector<1x256xf32>
    %452 = arith.addf %306, %451 : vector<1x256xf32>
    %c54 = arith.constant 54 : index
    %453 = memref.load %arg5[%c54] : memref<98xf32, #tpu.memory_space<smem>>
    %c0_185 = arith.constant 0 : index
    %c5_186 = arith.constant 5 : index
    %454 = vector.load %arg9[%c0_185, %c5_186] : memref<1x384xf32, #tpu.memory_space<vmem>>, vector<1x256xf32>
    %455 = vector.broadcast %453 : f32 to vector<1x256xf32>
    %456 = arith.mulf %455, %454 : vector<1x256xf32>
    %c61 = arith.constant 61 : index
    %457 = memref.load %arg5[%c61] : memref<98xf32, #tpu.memory_space<smem>>
    %c0_187 = arith.constant 0 : index
    %c21_188 = arith.constant 21 : index
    %458 = vector.load %arg9[%c0_187, %c21_188] : memref<1x384xf32, #tpu.memory_space<vmem>>, vector<1x256xf32>
    %459 = vector.broadcast %457 : f32 to vector<1x256xf32>
    %460 = arith.mulf %459, %458 : vector<1x256xf32>
    %461 = arith.addf %456, %460 : vector<1x256xf32>
    %c68_189 = arith.constant 68 : index
    %462 = memref.load %arg5[%c68_189] : memref<98xf32, #tpu.memory_space<smem>>
    %c0_190 = arith.constant 0 : index
    %c37_191 = arith.constant 37 : index
    %463 = vector.load %arg9[%c0_190, %c37_191] : memref<1x384xf32, #tpu.memory_space<vmem>>, vector<1x256xf32>
    %464 = vector.broadcast %462 : f32 to vector<1x256xf32>
    %465 = arith.mulf %464, %463 : vector<1x256xf32>
    %466 = arith.addf %461, %465 : vector<1x256xf32>
    %c75 = arith.constant 75 : index
    %467 = memref.load %arg5[%c75] : memref<98xf32, #tpu.memory_space<smem>>
    %c0_192 = arith.constant 0 : index
    %c53_193 = arith.constant 53 : index
    %468 = vector.load %arg9[%c0_192, %c53_193] : memref<1x384xf32, #tpu.memory_space<vmem>>, vector<1x256xf32>
    %469 = vector.broadcast %467 : f32 to vector<1x256xf32>
    %470 = arith.mulf %469, %468 : vector<1x256xf32>
    %471 = arith.addf %466, %470 : vector<1x256xf32>
    %c82_194 = arith.constant 82 : index
    %472 = memref.load %arg5[%c82_194] : memref<98xf32, #tpu.memory_space<smem>>
    %c0_195 = arith.constant 0 : index
    %c69_196 = arith.constant 69 : index
    %473 = vector.load %arg9[%c0_195, %c69_196] : memref<1x384xf32, #tpu.memory_space<vmem>>, vector<1x256xf32>
    %474 = vector.broadcast %472 : f32 to vector<1x256xf32>
    %475 = arith.mulf %474, %473 : vector<1x256xf32>
    %476 = arith.addf %471, %475 : vector<1x256xf32>
    %c89 = arith.constant 89 : index
    %477 = memref.load %arg5[%c89] : memref<98xf32, #tpu.memory_space<smem>>
    %c0_197 = arith.constant 0 : index
    %c85_198 = arith.constant 85 : index
    %478 = vector.load %arg9[%c0_197, %c85_198] : memref<1x384xf32, #tpu.memory_space<vmem>>, vector<1x256xf32>
    %479 = vector.broadcast %477 : f32 to vector<1x256xf32>
    %480 = arith.mulf %479, %478 : vector<1x256xf32>
    %481 = arith.addf %476, %480 : vector<1x256xf32>
    %c96_199 = arith.constant 96 : index
    %482 = memref.load %arg5[%c96_199] : memref<98xf32, #tpu.memory_space<smem>>
    %c0_200 = arith.constant 0 : index
    %c101_201 = arith.constant 101 : index
    %483 = vector.load %arg9[%c0_200, %c101_201] : memref<1x384xf32, #tpu.memory_space<vmem>>, vector<1x256xf32>
    %484 = vector.broadcast %482 : f32 to vector<1x256xf32>
    %485 = arith.mulf %484, %483 : vector<1x256xf32>
    %486 = arith.addf %481, %485 : vector<1x256xf32>
    %487 = arith.mulf %416, %486 : vector<1x256xf32>
    %488 = arith.addf %342, %487 : vector<1x256xf32>
    %c6 = arith.constant 6 : index
    %c0_202 = arith.constant 0 : index
    %489 = vector.load %arg4[%c6, %c0_202] : memref<7x256xf32, #tpu.memory_space<vmem>>, vector<1x256xf32>
    %c6_203 = arith.constant 6 : index
    %490 = memref.load %arg5[%c6_203] : memref<98xf32, #tpu.memory_space<smem>>
    %c0_204 = arith.constant 0 : index
    %c6_205 = arith.constant 6 : index
    %491 = vector.load %arg8[%c0_204, %c6_205] : memref<1x384xf32, #tpu.memory_space<vmem>>, vector<1x256xf32>
    %492 = vector.broadcast %490 : f32 to vector<1x256xf32>
    %493 = arith.mulf %492, %491 : vector<1x256xf32>
    %c13 = arith.constant 13 : index
    %494 = memref.load %arg5[%c13] : memref<98xf32, #tpu.memory_space<smem>>
    %c0_206 = arith.constant 0 : index
    %c22_207 = arith.constant 22 : index
    %495 = vector.load %arg8[%c0_206, %c22_207] : memref<1x384xf32, #tpu.memory_space<vmem>>, vector<1x256xf32>
    %496 = vector.broadcast %494 : f32 to vector<1x256xf32>
    %497 = arith.mulf %496, %495 : vector<1x256xf32>
    %498 = arith.addf %493, %497 : vector<1x256xf32>
    %c20_208 = arith.constant 20 : index
    %499 = memref.load %arg5[%c20_208] : memref<98xf32, #tpu.memory_space<smem>>
    %c0_209 = arith.constant 0 : index
    %c38_210 = arith.constant 38 : index
    %500 = vector.load %arg8[%c0_209, %c38_210] : memref<1x384xf32, #tpu.memory_space<vmem>>, vector<1x256xf32>
    %501 = vector.broadcast %499 : f32 to vector<1x256xf32>
    %502 = arith.mulf %501, %500 : vector<1x256xf32>
    %503 = arith.addf %498, %502 : vector<1x256xf32>
    %c27 = arith.constant 27 : index
    %504 = memref.load %arg5[%c27] : memref<98xf32, #tpu.memory_space<smem>>
    %c0_211 = arith.constant 0 : index
    %c54_212 = arith.constant 54 : index
    %505 = vector.load %arg8[%c0_211, %c54_212] : memref<1x384xf32, #tpu.memory_space<vmem>>, vector<1x256xf32>
    %506 = vector.broadcast %504 : f32 to vector<1x256xf32>
    %507 = arith.mulf %506, %505 : vector<1x256xf32>
    %508 = arith.addf %503, %507 : vector<1x256xf32>
    %c34_213 = arith.constant 34 : index
    %509 = memref.load %arg5[%c34_213] : memref<98xf32, #tpu.memory_space<smem>>
    %c0_214 = arith.constant 0 : index
    %c70_215 = arith.constant 70 : index
    %510 = vector.load %arg8[%c0_214, %c70_215] : memref<1x384xf32, #tpu.memory_space<vmem>>, vector<1x256xf32>
    %511 = vector.broadcast %509 : f32 to vector<1x256xf32>
    %512 = arith.mulf %511, %510 : vector<1x256xf32>
    %513 = arith.addf %508, %512 : vector<1x256xf32>
    %c41 = arith.constant 41 : index
    %514 = memref.load %arg5[%c41] : memref<98xf32, #tpu.memory_space<smem>>
    %c0_216 = arith.constant 0 : index
    %c86_217 = arith.constant 86 : index
    %515 = vector.load %arg8[%c0_216, %c86_217] : memref<1x384xf32, #tpu.memory_space<vmem>>, vector<1x256xf32>
    %516 = vector.broadcast %514 : f32 to vector<1x256xf32>
    %517 = arith.mulf %516, %515 : vector<1x256xf32>
    %518 = arith.addf %513, %517 : vector<1x256xf32>
    %c48_218 = arith.constant 48 : index
    %519 = memref.load %arg5[%c48_218] : memref<98xf32, #tpu.memory_space<smem>>
    %c0_219 = arith.constant 0 : index
    %c102 = arith.constant 102 : index
    %520 = vector.load %arg8[%c0_219, %c102] : memref<1x384xf32, #tpu.memory_space<vmem>>, vector<1x256xf32>
    %521 = vector.broadcast %519 : f32 to vector<1x256xf32>
    %522 = arith.mulf %521, %520 : vector<1x256xf32>
    %523 = arith.addf %518, %522 : vector<1x256xf32>
    %524 = arith.mulf %489, %523 : vector<1x256xf32>
    %525 = arith.addf %379, %524 : vector<1x256xf32>
    %c55 = arith.constant 55 : index
    %526 = memref.load %arg5[%c55] : memref<98xf32, #tpu.memory_space<smem>>
    %c0_220 = arith.constant 0 : index
    %c6_221 = arith.constant 6 : index
    %527 = vector.load %arg9[%c0_220, %c6_221] : memref<1x384xf32, #tpu.memory_space<vmem>>, vector<1x256xf32>
    %528 = vector.broadcast %526 : f32 to vector<1x256xf32>
    %529 = arith.mulf %528, %527 : vector<1x256xf32>
    %c62 = arith.constant 62 : index
    %530 = memref.load %arg5[%c62] : memref<98xf32, #tpu.memory_space<smem>>
    %c0_222 = arith.constant 0 : index
    %c22_223 = arith.constant 22 : index
    %531 = vector.load %arg9[%c0_222, %c22_223] : memref<1x384xf32, #tpu.memory_space<vmem>>, vector<1x256xf32>
    %532 = vector.broadcast %530 : f32 to vector<1x256xf32>
    %533 = arith.mulf %532, %531 : vector<1x256xf32>
    %534 = arith.addf %529, %533 : vector<1x256xf32>
    %c69_224 = arith.constant 69 : index
    %535 = memref.load %arg5[%c69_224] : memref<98xf32, #tpu.memory_space<smem>>
    %c0_225 = arith.constant 0 : index
    %c38_226 = arith.constant 38 : index
    %536 = vector.load %arg9[%c0_225, %c38_226] : memref<1x384xf32, #tpu.memory_space<vmem>>, vector<1x256xf32>
    %537 = vector.broadcast %535 : f32 to vector<1x256xf32>
    %538 = arith.mulf %537, %536 : vector<1x256xf32>
    %539 = arith.addf %534, %538 : vector<1x256xf32>
    %c76 = arith.constant 76 : index
    %540 = memref.load %arg5[%c76] : memref<98xf32, #tpu.memory_space<smem>>
    %c0_227 = arith.constant 0 : index
    %c54_228 = arith.constant 54 : index
    %541 = vector.load %arg9[%c0_227, %c54_228] : memref<1x384xf32, #tpu.memory_space<vmem>>, vector<1x256xf32>
    %542 = vector.broadcast %540 : f32 to vector<1x256xf32>
    %543 = arith.mulf %542, %541 : vector<1x256xf32>
    %544 = arith.addf %539, %543 : vector<1x256xf32>
    %c83_229 = arith.constant 83 : index
    %545 = memref.load %arg5[%c83_229] : memref<98xf32, #tpu.memory_space<smem>>
    %c0_230 = arith.constant 0 : index
    %c70_231 = arith.constant 70 : index
    %546 = vector.load %arg9[%c0_230, %c70_231] : memref<1x384xf32, #tpu.memory_space<vmem>>, vector<1x256xf32>
    %547 = vector.broadcast %545 : f32 to vector<1x256xf32>
    %548 = arith.mulf %547, %546 : vector<1x256xf32>
    %549 = arith.addf %544, %548 : vector<1x256xf32>
    %c90 = arith.constant 90 : index
    %550 = memref.load %arg5[%c90] : memref<98xf32, #tpu.memory_space<smem>>
    %c0_232 = arith.constant 0 : index
    %c86_233 = arith.constant 86 : index
    %551 = vector.load %arg9[%c0_232, %c86_233] : memref<1x384xf32, #tpu.memory_space<vmem>>, vector<1x256xf32>
    %552 = vector.broadcast %550 : f32 to vector<1x256xf32>
    %553 = arith.mulf %552, %551 : vector<1x256xf32>
    %554 = arith.addf %549, %553 : vector<1x256xf32>
    %c97_234 = arith.constant 97 : index
    %555 = memref.load %arg5[%c97_234] : memref<98xf32, #tpu.memory_space<smem>>
    %c0_235 = arith.constant 0 : index
    %c102_236 = arith.constant 102 : index
    %556 = vector.load %arg9[%c0_235, %c102_236] : memref<1x384xf32, #tpu.memory_space<vmem>>, vector<1x256xf32>
    %557 = vector.broadcast %555 : f32 to vector<1x256xf32>
    %558 = arith.mulf %557, %556 : vector<1x256xf32>
    %559 = arith.addf %554, %558 : vector<1x256xf32>
    %560 = arith.mulf %489, %559 : vector<1x256xf32>
    %561 = arith.addf %415, %560 : vector<1x256xf32>
    %562 = arith.addf %525, %561 : vector<1x256xf32>
    %563 = arith.addf %452, %488 : vector<1x256xf32>
    %564 = arith.addf %562, %563 : vector<1x256xf32>
    %cst_237 = arith.constant 0.000000e+00 : f32
    %565 = vector.broadcast %cst_237 : f32 to vector<1x256xf32>
    %566 = arith.subf %565, %564 : vector<1x256xf32>
    %567 = math.exp %566 : vector<1x256xf32>
    %cst_238 = arith.constant 1.000000e+00 : f32
    %568 = vector.broadcast %cst_238 : f32 to vector<1x256xf32>
    %569 = arith.addf %568, %567 : vector<1x256xf32>
    %cst_239 = arith.constant 1.000000e+00 : f32
    %570 = vector.broadcast %cst_239 : f32 to vector<1x256xf32>
    %571 = arith.divf %570, %569 : vector<1x256xf32>
    %c0_240 = arith.constant 0 : index
    %c0_241 = arith.constant 0 : index
    %c0_242 = arith.constant 0 : index
    %572 = vector.load %arg1[%c0_240, %c0_241, %c0_242] : memref<1x64x256xf32, #tpu.memory_space<vmem>>, vector<1x64x256xf32>
    %573 = vector.shape_cast %572 : vector<1x64x256xf32> to vector<64x256xf32>
    %574 = vector.broadcast %36 : vector<64x1xf32> to vector<64x256xf32>
    %575 = arith.mulf %573, %574 : vector<64x256xf32>
    %576 = vector.broadcast %571 : vector<1x256xf32> to vector<64x256xf32>
    %577 = arith.mulf %575, %576 : vector<64x256xf32>
    %578 = arith.addf %577, %573 : vector<64x256xf32>
    %c0_243 = arith.constant 0 : index
    %c0_244 = arith.constant 0 : index
    %c0_245 = arith.constant 0 : index
    %579 = vector.load %arg7[%c0_243, %c0_244, %c0_245] : memref<1x64x256xf32, #tpu.memory_space<vmem>>, vector<1x64x256xf32>
    %580 = vector.shape_cast %579 : vector<1x64x256xf32> to vector<64x256xf32>
    %581 = vector.shape_cast %578 : vector<64x256xf32> to vector<1x64x256xf32>
    tpu.vector_store %arg7[%c0_243, %c0_244, %c0_245], %581 {strides = array<i32>} : memref<1x64x256xf32, #tpu.memory_space<vmem>>, vector<1x64x256xf32>,
    return
  }
  func.func @transform_0(%arg0: i32) -> (i32, i32, i32) {
    %c0_i32 = arith.constant 0 : i32
    %c0_i32_0 = arith.constant 0 : i32
    %c0_i32_1 = arith.constant 0 : i32
    return %arg0, %c0_i32, %c0_i32_0 : i32, i32, i32
  }
  func.func @transform_1(%arg0: i32) -> (i32, i32) {
    %c0_i32 = arith.constant 0 : i32
    %c0_i32_0 = arith.constant 0 : i32
    %c0_i32_1 = arith.constant 0 : i32
    return %c0_i32, %c0_i32_0 : i32, i32
  }
  func.func @transform_2(%arg0: i32) -> (i32, i32) {
    %c0_i32 = arith.constant 0 : i32
    %c0_i32_0 = arith.constant 0 : i32
    %c0_i32_1 = arith.constant 0 : i32
    return %c0_i32, %c0_i32_0 : i32, i32
  }
  func.func @transform_3(%arg0: i32) -> (i32, i32) {
    %c0_i32 = arith.constant 0 : i32
    %c0_i32_0 = arith.constant 0 : i32
    %c0_i32_1 = arith.constant 0 : i32
    return %c0_i32, %c0_i32_0 : i32, i32
  }
  func.func @transform_4(%arg0: i32) -> i32 {
    %c0_i32 = arith.constant 0 : i32
    %c0_i32_0 = arith.constant 0 : i32
    return %c0_i32 : i32
  }
  func.func @transform_5(%arg0: i32) -> i32 {
    %c0_i32 = arith.constant 0 : i32
    %c0_i32_0 = arith.constant 0 : i32
    return %c0_i32 : i32
  }
  func.func @transform_6(%arg0: i32) -> (i32, i32, i32) {
    %c0_i32 = arith.constant 0 : i32
    %c0_i32_0 = arith.constant 0 : i32
    %c0_i32_1 = arith.constant 0 : i32
    return %arg0, %c0_i32, %c0_i32_0 : i32, i32, i32
  }
}

</mosaic_0001>

<bundles_post_ra>
// kernel: tpu_custom_call.1
= control target key start
LH: loop header
LB: loop body
LE: loop exit
PB: predicated region body
PF: predicated region fallthrough
CT: control target
= control target key end

     0   :  { %s3253_s0 = inlined_call_operand.hbm [shape: f32[2,64,256], index: 0, kind: input, shape index: {}]   ;;  %s3254_s1 = inlined_call_operand.vmem [shape: f32[64,4], index: 1, kind: input, shape index: {}]   ;;  %s3255_s2 = inlined_call_operand.vmem [shape: f32[64,4], index: 2, kind: input, shape index: {}]   ;;  %s3256_s3 = inlined_call_operand.vmem [shape: f32[7,256], index: 3, kind: input, shape index: {}]   ;;  %s3257_s4 = inlined_call_operand.vmem [shape: f32[98], index: 4, kind: input, shape index: {}]   ;;  %s3258_s5 = inlined_call_operand.<no memory space> [shape: f32[1], index: 5, kind: input, shape index: {}]   ;;  %s3259_s6 = inlined_call_operand.hbm [shape: f32[2,64,256], index: 6, kind: output, shape index: {}]  }
   0x1   :  { %11 = sst [smem:[#allocation4]] %s3258_s5 }
   0x2   :  { %12 = vsyncpa [#allocation6], 0 }
   0x3   :  { %14 = vsyncpa [#allocation6 + $0x1], 0 }
   0x4   :  { %15 = vsyncpa [#allocation8], 0 }
   0x5   :  { %16 = vsyncpa [#allocation7], 0 }
   0x6   :  { %18 = vsyncpa [#allocation7 + $0x1], 0  ;;  %s2261_s23 = smov 0   ;;  %s2263_s24 = smov 0  }
   0x7   :  { %s2265_s25 = smov 0   ;;  %s2267_s26 = smov 0  }
   0x8 LB: > { %s2282_s5 = sadd.s32 4294967295, %s2199_s26   ;;  %s1853_s27 = sadd.s32 4294967294, %s2199_s26   ;;  %s2199_s26 = sphi %s2267_s26, %s3291_s26   ;;  %s2195_s25 = sphi %s2265_s25, %s3290_s25   ;;  %s2191_s24 = sphi %s2263_s24, %s3289_s24   ;;  %s2187_s23 = sphi %s2261_s23, %s3288_s23  }
   0x9   : > { %s2286_s28 = sadd.s32 1, %s2199_s26   ;;  %s31_s29 = sadd.s32 1, %s2195_s25 }
   0xa   : > { %s28_s30 = ssub.s32 %s2199_s26, %s2286_s28  ;;  %p38_p0 = scmp.ne.s32.totalorder %s2195_s25, %s2191_s24 }
   0xb   : > { %p29_p1 = scmp.eq.s32.totalorder %s28_s30, 0  ;;  %p39_p2 = scmp.eq.s32.totalorder %s2199_s26, 0 }
   0xc   : > { %p44_p3 = scmp.ne.s32.totalorder %s2191_s24, %s2187_s23  ;;  %p3261_p4 = scmp.eq.s32.totalorder %s2282_s5, 0 }
   0xd   : > { %s2298_s7 = scalar_select %p29_p1, %s2195_s25, %s31_s29  }
   0xe   : > { %p2300_p5 = por %p39_p2, %p38_p0  ;;  %p2306_p6 = por %p3261_p4, %p44_p3 }
   0xf   : > { %p173_p7 = scmp.eq.s32.totalorder %s2282_s5, 1  ;;  %p179_p8 = scmp.eq.s32.totalorder %s1853_s27, 1 }
  0x10   : > { %s3269_s9 = scalar_select %p2306_p6, 1, 0 }
  0x11   : > { %p1854_p9 = scmp.ge.s32.totalorder %s2199_s26, 1  ;;  %p186_p10 = scmp.lt.s32.totalorder %s2199_s26, 3 }
  0x12   : > { %p2313_p11 = por %p173_p7, %p38_p0  ;;  %p2317_p12 = por %p179_p8, %p44_p3 }
  0x13   : > { %p2321_p13 = pnand %p1854_p9, %p186_p10  ;;  %s208_s15 = sshll.u32 %s3257_s4, 4  ;;  %s209_s15 = int_to_ptr.vmem [resolvable:$true] %s208_s15 }
  0x14   : > { %s3270_s10 = scalar_select %p2313_p11, 1, 0 }
  0x15   : > { %s3271_s11 = scalar_select %p2317_p12, 1, 0 }
  0x16   : > { %s3272_s12 = scalar_select %p2321_p13, 1, 0 }
  0x17   : > { %p1982_p1 = pneg %p2321_p13  ;;  %p1995_p2 = scmp.lt.s32.totalorder %s2199_s26, 2 }
  0x18   : > { %s222_s17 = sand.u32 1, %s2195_s25   ;;  %s2088_s20 = scalar_lea.vmem %s209_s15, 16 }
  0x19   : > { %p2334_p7 = pnand %p1982_p1, %p3261_p4  ;;  %p2341_p3 = pnand %p1995_p2, %p2300_p5 }
  0x1a   : > { %s1857_s19 = sshll.u32 %s222_s17, 7  ;;  %p2089_p8 = scmp.ne.s32.totalorder %s209_s15, %s2088_s20 }
  0x1b   : > { %p2090_p9 = pneg %p2334_p7  ;;  %p2096_p12 = scmp.lt.s32.totalorder %s209_s15, %s209_s15 }
  0x1c   : > { %p2097_p11 = scmp.lt.s32.totalorder %s2088_s20, %s2088_s20 }
  0x1d   : > { %p2091_p10 = pnand %p2090_p9, %p2089_p8 }
  0x1e   : > { %p2098_p1 = por %p2097_p11, %p2096_p12 }
  0x1f   : > { %p2092_p0 = pneg %p2091_p10 }
  0x21   : > { %p2099_p4 = pnand %p2098_p1, %p2092_p0 }
  0x23   : > { %2102 = shalt.err (!%p2099_p4)
}
  0x24   : > { %s2201_s21 = smov [#allocation9]   ;;  %s1972_s22 = sshll.u32 %s2199_s26, 11 }
  0x25   : > { %1985 = dma.vmem_to_smem (!%p2334_p7), %s209_s15, 16, %s2201_s21, [#allocation8]  }
  0x26   : > { %s226_s27 = scalar_lea.vmem [#allocation5], %s1857_s19  ;;  %s2353_s13 = scalar_lea.hbm %s3253_s0, %s1972_s22 }
  0x27   : > { %s233_s29 = sshll.u32 %s226_s27, 4  ;;  %s2357_s14 = scalar_lea.sflag [#allocation6], %s222_s17  ;;  %s2355_s29 = int_to_ptr.vmem [resolvable:$true] %s233_s29 }
  0x28   : > { %s2103_s20 = scalar_lea.hbm %s2353_s13, 2048  ;;  %p2105_p5 = pneg %p2341_p3 }
  0x29   : > { %p2104_p4 = scmp.ne.s32.totalorder %s2353_s13, %s2103_s20  ;;  %s2108_s19 = scalar_lea.hbm %s3253_s0, 4096 }
  0x2a   : > { %p2109_p0 = scmp.lt.s32.totalorder %s2353_s13, %s3253_s0  ;;  %p2110_p2 = scmp.lt.s32.totalorder %s2108_s19, %s2103_s20 }
  0x2b   : > { %p2106_p11 = pnand %p2105_p5, %p2104_p4 }
  0x2c   : > { %p2111_p7 = por %p2110_p2, %p2109_p0 }
  0x2d   : > { %p2107_p12 = pneg %p2106_p11 }
  0x2f   : > { %p2112_p8 = pnand %p2111_p7, %p2107_p12 }
  0x31   : > { %2115 = shalt.err (!%p2112_p8)
}
  0x32   : > { %s2116_s17 = scalar_lea.vmem %s2355_s29, 2048  ;;  %s2202_s27 = smov [#allocation5]  }
  0x33   : > { %p2117_p9 = scmp.ne.s32.totalorder %s2355_s29, %s2116_s17  ;;  %s2121_s30 = sshll.u32 %s2202_s27, 4  ;;  %s2122_s30 = int_to_ptr.vmem [resolvable:$false] %s2121_s30 }
  0x34   : > { %s2123_s8 = scalar_lea.vmem %s2122_s30, 4096  ;;  %p2124_p4 = scmp.lt.s32.totalorder %s2355_s29, %s2122_s30 }
  0x35   : > { %p2119_p10 = pnand %p2117_p9, %p2105_p5  ;;  %p2125_p11 = scmp.lt.s32.totalorder %s2123_s8, %s2116_s17 }
  0x37   : > { %p2120_p1 = pneg %p2119_p10  ;;  %p2126_p6 = por %p2125_p11, %p2124_p4 }
  0x39   : > { %p2127_p13 = pnand %p2126_p6, %p2120_p1 }
  0x3b   : > { %2130 = shalt.err (!%p2127_p13)
}
  0x3c   : > { %s2203_s20 = smov 256   ;;  %s2204_s15 = smov 16  }
  0x3d   : > { %1989 = dma.hbm_to_vmem [thread:$0]  (!%p2341_p3), %s2353_s13, 2048, %s2355_s29, %s2357_s14, %s2203_s20, %s2203_s20, %s2204_s15  }
  0x3e   : > { %p3275_p5 = scmp.ne.s32.totalorder %s3272_s12, 0 }
  0x3f   : > { %s2381_s16 = sand.u32 (!%p3275_p5), 1, %s2191_s24   ;;  %p3276_p6 = scmp.ne.s32.totalorder (!%p3275_p5), %s3269_s9, 0 }
  0x40   : > { %245 = sbr.rel (%p3275_p5) target bundleno = 1066 (0x42a), region = 44  ;;  %s3264_s19 = sshll.u32 (!%p3275_p5), %s2381_s16, 7 }
  0x41   : > { %s248_s21 = scalar_lea.sflag (!%p3275_p5), [#allocation6], %s2381_s16  ;;  %s2387_s22 = scalar_lea.vmem (!%p3275_p5), [#allocation5], %s3264_s19 }
  0x45   : > { %2174 = dma.done.wait (%p3276_p6), %s248_s21, 2048  }
  0x46   : > { %2176 = vsyncadd (%p3276_p6), %s248_s21, 4294965248  ;;  %p3277_p13 = scmp.eq.s32.totalorder %s2282_s5, 0 }
  0x48   : > { %2178 = dma.done.wait (%p3277_p13), [#allocation8], 16   ;;  %p3278_p3 = pmov %p3277_p13 }
  0x4a   : > { %2180 = vsyncadd (%p3278_p3), [#allocation8], 4294967280 }
  0x4b   : > { %260 = sfence }
  0x4c   : > { %v2398_v0 = vld [vmem:[%s2387_s22] sm:$0xff]  ;;  %v2401_v1 = vld [vmem:[%s2387_s22 + $0x8] sm:$0xff]  ;;  %v2404_v2 = vld [vmem:[%s2387_s22 + $0x10] sm:$0xff]  ;;  %vm383_vm0 = vcmask 31744   ;;  %s2207_s17 = smov 51   ;;  %vm613_vm4 = vcmask 416768  }
  0x4d   : > { %v343_v3 = vadd.f32 %v2401_v1, %v2398_v0  ;;  %v319_v4 = vmax.f32 %v2398_v0, %v2401_v1  ;;  %v2411_v5 = vld [vmem:[%s2387_s22 + $0x18] sm:$0xff]  ;;  %v2418_v8 = vld [vmem:[%s2387_s22 + $0x20] sm:$0xff]  ;;  %v2421_v9 = vld [vmem:[%s2387_s22 + $0x28] sm:$0xff]  ;;  %s1866_s27 = sld [smem:[#allocation9 + $0x15]]  ;;  %s3266_s18 = smov 80   ;;  %vm656_vm6 = vcmask 916480  }
  0x4e   : > { %v346_v6 = vadd.f32 %v2411_v5, %v2404_v2  ;;  %v322_v7 = vmax.f32 %v2404_v2, %v2411_v5  ;;  %v349_v10 = vadd.f32 %v2421_v9, %v2418_v8  ;;  %v325_v11 = vmax.f32 %v2418_v8, %v2421_v9  ;;  %v2428_v12 = vld [vmem:[%s2387_s22 + $0x30] sm:$0xff]  ;;  %v2431_v13 = vld [vmem:[%s2387_s22 + $0x38] sm:$0xff]  ;;  %v2438_v16 = vld [vmem:[%s2387_s22 + $0x40] sm:$0xff]  ;;  %s1864_s30 = sld [smem:[#allocation9 + $0x7]]  ;;  %s3265_s29 = smov 112  }
  0x4f   : > { %344 = vadd.xlane.f32.xlu0 %v343_v3  ;;  %320 = vmax.xlane.f32.xlu1 %v319_v4  ;;  %v352_v14 = vadd.f32 %v2431_v13, %v2428_v12  ;;  %v328_v15 = vmax.f32 %v2428_v12, %v2431_v13  ;;  %v2441_v17 = vld [vmem:[%s2387_s22 + $0x48] sm:$0xff]  ;;  %v2448_v20 = vld [vmem:[%s2387_s22 + $0x50] sm:$0xff]  ;;  %v2451_v21 = vld [vmem:[%s2387_s22 + $0x58] sm:$0xff]  ;;  %s1901_s8 = sld [smem:[#allocation9 + $0x3a]]  ;;  %s2213_s19 = smov 32   ;;  %vm667_vm7 = vcmask 785408  }
  0x50   : > { %v355_v18 = vadd.f32 %v2441_v17, %v2438_v16  ;;  %v331_v19 = vmax.f32 %v2438_v16, %v2441_v17  ;;  %v358_v22 = vadd.f32 %v2451_v21, %v2448_v20  ;;  %v334_v23 = vmax.f32 %v2448_v20, %v2451_v21  ;;  %v2458_v24 = vld [vmem:[%s2387_s22 + $0x60] sm:$0xff]  ;;  %v2461_v25 = vld [vmem:[%s2387_s22 + $0x68] sm:$0xff]  ;;  %v2468_v28 = vld [vmem:[%s2387_s22 + $0x70] sm:$0xff]  ;;  %s1865_s20 = sld [smem:[#allocation9 + $0xe]]  ;;  %p3285_p0 = scmp.ne.s32.totalorder %s3270_s10, 0 }
  0x51   : > { %v361_v26 = vadd.f32 %v2461_v25, %v2458_v24  ;;  %v337_v27 = vmax.f32 %v2458_v24, %v2461_v25  ;;  %v2471_v29 = vld [vmem:[%s2387_s22 + $0x78] sm:$0xff]  ;;  %v286_v38 = vld [vmem:[%s3254_s1 + $0x8] sm:$0xff]  ;;  %v287_v43 = vld [vmem:[%s3254_s1 + $0x10] sm:$0xff]  ;;  %s1886_s15 = sld [smem:[#allocation9 + $0x39]]  ;;  %vm678_vm8 = vcmask 654336   ;;  %vm689_vm9 = vcmask 523264  }
  0x52   : > { %v364_v30 = vadd.f32 %v2471_v29, %v2468_v28  ;;  %v340_v31 = vmax.f32 %v2468_v28, %v2471_v29  ;;  %v285_v39 = vld [vmem:[%s3254_s1] sm:$0xff]  ;;  %v288_v48 = vld [vmem:[%s3254_s1 + $0x18] sm:$0xff]  ;;  %v290_v61 = vld [vmem:[%s3254_s1 + $0x28] sm:$0xff]  ;;  %s1894_s21 = sld [smem:[#allocation9 + $0x9]]  ;;  %vm700_vm10 = vcmask 392192   ;;  %vm711_vm11 = vcmask 261120  }
  0x53   : > { %347 = vadd.xlane.f32.xlu0 %v346_v6  ;;  %323 = vmax.xlane.f32.xlu1 %v322_v7  ;;  %v289_v56 = vld [vmem:[%s3254_s1 + $0x20] sm:$0xff]  ;;  %s1902_s9 = sld [smem:[#allocation9 + $0x41]]  ;;  %vm998_vm12 = vcmask 1031168   ;;  %vm853_vm13 = vcmask 1039360   ;;  %vm1143_vm14 = vcmask 1022976   ;;  %vm1288_vm15 = vcmask 1014784  }
  0x54   : > { %s1879_s12 = sld [smem:[#allocation9 + $0x8]] }
  0x55   : > { %s1916_s13 = sld [smem:[#allocation9 + $0x3b]] }
  0x56   : > { %s1895_s14 = sld [smem:[#allocation9 + $0x10]] }
  0x57   : > { %350 = vadd.xlane.f32.xlu0 %v349_v10  ;;  %326 = vmax.xlane.f32.xlu1 %v325_v11 }
  0x5b   : > { %353 = vadd.xlane.f32.xlu0 %v352_v14  ;;  %329 = vmax.xlane.f32.xlu1 %v328_v15 }
  0x5f   : > { %356 = vadd.xlane.f32.xlu0 %v355_v18  ;;  %332 = vmax.xlane.f32.xlu1 %v331_v19 }
  0x63   : > { %359 = vadd.xlane.f32.xlu0 %v358_v22  ;;  %335 = vmax.xlane.f32.xlu1 %v334_v23 }
  0x67   : > { %362 = vadd.xlane.f32.xlu0 %v361_v26  ;;  %338 = vmax.xlane.f32.xlu1 %v337_v27  ;;  %v291_v27 = vld [vmem:[%s3254_s1 + $0x30] sm:$0xff] }
  0x6b   : > { %365 = vadd.xlane.f32.xlu0 %v364_v30  ;;  %341 = vmax.xlane.f32.xlu1 %v340_v31 }
  0xd8   : > { %v345_v32 = vpop.xlane.xlu0 %344  ;;  %v321_v33 = vpop.xlane.xlu1 %320 }
  0xd9   : > { %v367_v41 = vmul.f32 0.00390625, %v345_v32  ;;  %v375_v47 = vmul.f32 %v321_v33, %v285_v39 }
  0xdb   : > { %v406_v52 = vmul.f32 %v367_v41, %v285_v39  ;;  %v384_v60 = vsel %vm383_vm0, %v375_v47, 0.0 }
  0xdc   : > { %v348_v34 = vpop.xlane.xlu0 %347  ;;  %v324_v35 = vpop.xlane.xlu1 %323 }
  0xdd   : > { %v368_v40 = vmul.f32 0.00390625, %v348_v34  ;;  %v376_v46 = vmul.f32 %v324_v35, %v286_v38  ;;  %v414_v6 = vsel %vm383_vm0, %v406_v52, 0.0 }
  0xdf   : > { %v407_v49 = vmul.f32 %v368_v40, %v286_v38  ;;  %v385_v57 = vsel %vm383_vm0, %v376_v46, 0.0 }
  0xe0   : > { %v351_v36 = vpop.xlane.xlu0 %350  ;;  %v327_v37 = vpop.xlane.xlu1 %326  ;;  %v386_v7 = vadd.f32 %v385_v57, %v384_v60 }
  0xe1   : > { %v369_v42 = vmul.f32 0.00390625, %v351_v36  ;;  %v377_v50 = vmul.f32 %v327_v37, %v287_v43  ;;  %v415_v62 = vsel %vm383_vm0, %v407_v49, 0.0 }
  0xe2   : > { %v416_v23 = vadd.f32 %v415_v62, %v414_v6 }
  0xe3   : > { %v408_v53 = vmul.f32 %v369_v42, %v287_v43  ;;  %v387_v63 = vsel %vm383_vm0, %v377_v50, 0.0  ;;  %v292_v43 = vld [vmem:[%s3254_s1 + $0x38] sm:$0xff] }
  0xe4   : > { %v354_v44 = vpop.xlane.xlu0 %353  ;;  %v330_v45 = vpop.xlane.xlu1 %329  ;;  %v388_v26 = vadd.f32 %v387_v63, %v386_v7 }
  0xe5   : > { %v370_v51 = vmul.f32 0.00390625, %v354_v44  ;;  %v378_v58 = vmul.f32 %v330_v45, %v288_v48  ;;  %v417_v10 = vsel %vm383_vm0, %v408_v53, 0.0 }
  0xe6   : > { %v418_v33 = vadd.f32 %v417_v10, %v416_v23 }
  0xe7   : > { %v409_v3 = vmul.f32 %v370_v51, %v288_v48  ;;  %v389_v15 = vsel %vm383_vm0, %v378_v58, 0.0 }
  0xe8   : > { %v357_v54 = vpop.xlane.xlu0 %356  ;;  %v333_v55 = vpop.xlane.xlu1 %332  ;;  %v390_v34 = vadd.f32 %v389_v15, %v388_v26  ;;  %v294_v26 = vld [vmem:[%s3255_s2 + $0x8] sm:$0xff] }
  0xe9   : > { %v371_v59 = vmul.f32 0.00390625, %v357_v54  ;;  %v379_v4 = vmul.f32 %v333_v55, %v289_v56  ;;  %v419_v30 = vsel %vm383_vm0, %v409_v3, 0.0 }
  0xea   : > { %v420_v41 = vadd.f32 %v419_v30, %v418_v33 }
  0xeb   : > { %v410_v18 = vmul.f32 %v371_v59, %v289_v56  ;;  %v391_v31 = vsel %vm383_vm0, %v379_v4, 0.0 }
  0xec   : > { %v360_v11 = vpop.xlane.xlu0 %359  ;;  %v336_v14 = vpop.xlane.xlu1 %335  ;;  %v392_v42 = vadd.f32 %v391_v31, %v390_v34  ;;  %v296_v31 = vld [vmem:[%s3255_s2 + $0x18] sm:$0xff] }
  0xed   : > { %v372_v19 = vmul.f32 0.00390625, %v360_v11  ;;  %v380_v22 = vmul.f32 %v336_v14, %v290_v61  ;;  %v421_v37 = vsel %vm383_vm0, %v410_v18, 0.0 }
  0xee   : > { %v422_v47 = vadd.f32 %v421_v37, %v420_v41 }
  0xef   : > { %v411_v32 = vmul.f32 %v372_v19, %v290_v61  ;;  %v393_v38 = vsel %vm383_vm0, %v380_v22, 0.0 }
  0xf0   : > { %v363_v35 = vpop.xlane.xlu0 %362  ;;  %v339_v36 = vpop.xlane.xlu1 %338  ;;  %v394_v48 = vadd.f32 %v393_v38, %v392_v42 }
  0xf1   : > { %v373_v39 = vmul.f32 0.00390625, %v363_v35  ;;  %v381_v40 = vmul.f32 %v339_v36, %v291_v27  ;;  %v423_v44 = vsel %vm383_vm0, %v411_v32, 0.0  ;;  %v295_v32 = vld [vmem:[%s3255_s2 + $0x10] sm:$0xff] }
  0xf2   : > { %v424_v54 = vadd.f32 %v423_v44, %v422_v47 }
  0xf3   : > { %v395_v45 = vsel %vm383_vm0, %v381_v40, 0.0  ;;  %v412_v46 = vmul.f32 %v373_v39, %v291_v27  ;;  %v293_v27 = vld [vmem:[%s3255_s2] sm:$0xff]  ;;  %v298_v39 = vld [vmem:[%s3255_s2 + $0x28] sm:$0xff] }
  0xf4   : > { %v366_v49 = vpop.xlane.xlu0 %365  ;;  %v342_v50 = vpop.xlane.xlu1 %341  ;;  %v396_v55 = vadd.f32 %v395_v45, %v394_v48  ;;  %v297_v40 = vld [vmem:[%s3255_s2 + $0x20] sm:$0xff]  ;;  %v300_v45 = vld [vmem:[%s3255_s2 + $0x38] sm:$0xff] }
  0xf5   : > { %v425_v51 = vsel %vm383_vm0, %v412_v46, 0.0  ;;  %v374_v52 = vmul.f32 0.00390625, %v366_v49  ;;  %v382_v53 = vmul.f32 %v342_v50, %v292_v43  ;;  %v299_v46 = vld [vmem:[%s3255_s2 + $0x30] sm:$0xff] }
  0xf6   : > { %v426_v58 = vadd.f32 %v425_v51, %v424_v54  ;;  %v2205_v54 = vmov 0.0  }
  0xf7   : > { %v397_v56 = vsel %vm383_vm0, %v382_v53, 0.0  ;;  %v413_v57 = vmul.f32 %v374_v52, %v292_v43  ;;  %v587_v53 = vlaneseq }
  0xf8   : > { %v398_v59 = vadd.f32 %v397_v56, %v396_v55 }
  0xf9   : > { %v427_v60 = vsel %vm383_vm0, %v413_v57, 0.0  ;;  %vm589_vm1 = vcmp.lt.s32.totalorder %v587_v53, 384  ;;  %vm2603_vm2 = vcmp.ge.s32.totalorder %v587_v53, 51  ;;  %vm617_vm3 = vcmp.lt.s32.totalorder %v587_v53, 307 }
  0xfa   : > { %v399_v61 = vrot.slane %v398_v59, 4  ;;  %v428_v62 = vadd.f32 %v427_v60, %v426_v58  ;;  %591 = vst.msk [vmem:[#allocation2] sm:$0x7] %vm589_vm1, %v2205_v54  ;;  %592 = vst.msk [vmem:[#allocation3] sm:$0x7] %vm589_vm1, %v2205_v54  ;;  %vm1578_vm1 = vcmask 998400  }
  0xfb   : > { %vm618_vm5 = vmand %vm2603_vm2, %vm617_vm3 }
  0xfc   : > { %v400_v63 = vadd.f32 %v399_v61, %v398_v59  ;;  %v429_v3 = vrot.slane %v428_v62, 4 }
  0xfe   : > { %v401_v4 = vrot.slane %v400_v63, 2  ;;  %v430_v6 = vadd.f32 %v429_v3, %v428_v62 }
 0x100   : > { %v402_v7 = vadd.f32 %v401_v4, %v400_v63  ;;  %v431_v10 = vrot.slane %v430_v6, 2 }
 0x102   : > { %v403_v11 = vrot.slane %v402_v7, 1  ;;  %v432_v14 = vadd.f32 %v431_v10, %v430_v6 }
 0x104   : > { %v404_v15 = vadd.f32 %v403_v11, %v402_v7  ;;  %v433_v18 = vrot.slane %v432_v14, 1 }
 0x106   : > { %v434_v19 = vadd.f32 %v433_v18, %v432_v14  ;;  %v405_v22 = vmax.f32 %v404_v15, 0.0 }
 0x108   : > { %v435_v23 = vmax.f32 %v434_v19, 0.0 }
 0x10a   : > { %v436_v30 = vadd.f32 %v435_v23, %v405_v22 }
 0x10c   : > { %v438_v33 = vmul.f32 %v436_v30, %v294_v26  ;;  %v437_v34 = vmul.f32 %v436_v30, %v293_v27  ;;  %v440_v37 = vmul.f32 %v436_v30, %v296_v31  ;;  %v439_v38 = vmul.f32 %v436_v30, %v295_v32 }
 0x10d   : > { %v442_v43 = vmul.f32 %v436_v30, %v298_v39  ;;  %v441_v44 = vmul.f32 %v436_v30, %v297_v40  ;;  %v444_v49 = vmul.f32 %v436_v30, %v300_v45  ;;  %v443_v50 = vmul.f32 %v436_v30, %v299_v46 }
 0x10e   : > { %v448_v35 = vsel %vm383_vm0, %v438_v33, 0.0  ;;  %v445_v36 = vsel %vm383_vm0, %v437_v34, 0.0  ;;  %v454_v41 = vsel %vm383_vm0, %v440_v37, 0.0  ;;  %v451_v42 = vsel %vm383_vm0, %v439_v38, 0.0 }
 0x10f   : > { %449 = vadd.xlane.f32.xlu1 %v448_v35  ;;  %446 = vadd.xlane.f32.xlu0 %v445_v36  ;;  %v460_v47 = vsel %vm383_vm0, %v442_v43, 0.0  ;;  %v457_v48 = vsel %vm383_vm0, %v441_v44, 0.0  ;;  %v466_v51 = vsel %vm383_vm0, %v444_v49, 0.0  ;;  %v463_v52 = vsel %vm383_vm0, %v443_v50, 0.0 }
 0x110   : > { %vm1433_vm0 = vcmask 1006592  }
 0x113   : > { %455 = vadd.xlane.f32.xlu1 %v454_v41  ;;  %452 = vadd.xlane.f32.xlu0 %v451_v42 }
 0x117   : > { %461 = vadd.xlane.f32.xlu1 %v460_v47  ;;  %458 = vadd.xlane.f32.xlu0 %v457_v48 }
 0x11b   : > { %467 = vadd.xlane.f32.xlu1 %v466_v51  ;;  %464 = vadd.xlane.f32.xlu0 %v463_v52 }
 0x198   : > { %v450_v55 = vpop.xlane.xlu1 %449  ;;  %v447_v56 = vpop.xlane.xlu0 %446 }
 0x199   : > { %v470_v57 = vsub.f32 0.0, %v450_v55  ;;  %v469_v58 = vsub.f32 0.0, %v447_v56 }
 0x19b   : > { %v479_v59 = vmul.f32 1.442695, %v470_v57  ;;  %v477_v60 = vmul.f32 1.442695, %v469_v58 }
 0x19c   : > { %v456_v61 = vpop.xlane.xlu1 %455  ;;  %v453_v62 = vpop.xlane.xlu0 %452 }
 0x19d   : > { %2050 = vpow2.f32 %v479_v59  ;;  %v472_v63 = vsub.f32 0.0, %v456_v61  ;;  %v471_v3 = vsub.f32 0.0, %v453_v62 }
 0x19e   : > { %2052 = vpow2.f32 %v477_v60 }
 0x19f   : > { %v483_v4 = vmul.f32 1.442695, %v472_v63  ;;  %v481_v6 = vmul.f32 1.442695, %v471_v3 }
 0x1a0   : > { %v462_v7 = vpop.xlane.xlu1 %461  ;;  %v459_v10 = vpop.xlane.xlu0 %458 }
 0x1a1   : > { %2054 = vpow2.f32 %v483_v4  ;;  %v474_v11 = vsub.f32 0.0, %v462_v7  ;;  %v473_v14 = vsub.f32 0.0, %v459_v10 }
 0x1a2   : > { %2056 = vpow2.f32 %v481_v6 }
 0x1a3   : > { %v487_v15 = vmul.f32 1.442695, %v474_v11  ;;  %v485_v18 = vmul.f32 1.442695, %v473_v14 }
 0x1a4   : > { %v468_v19 = vpop.xlane.xlu1 %467  ;;  %v465_v22 = vpop.xlane.xlu0 %464 }
 0x1a5   : > { %2058 = vpow2.f32 %v487_v15  ;;  %v476_v23 = vsub.f32 0.0, %v468_v19  ;;  %v475_v26 = vsub.f32 0.0, %v465_v22 }
 0x1a6   : > { %2060 = vpow2.f32 %v485_v18 }
 0x1a7   : > { %v491_v27 = vmul.f32 1.442695, %v476_v23  ;;  %v489_v30 = vmul.f32 1.442695, %v475_v26 }
 0x1a9   : > { %2062 = vpow2.f32 %v491_v27 }
 0x1aa   : > { %v2051_v31 = vpop.eup %2050  ;;  %2064 = vpow2.f32 %v489_v30 }
 0x1ab   : > { %v2053_v32 = vpop.eup %2052  ;;  %v494_v33 = vadd.f32 1.0, %v2051_v31 }
 0x1ac   : > { %v493_v34 = vadd.f32 1.0, %v2053_v32 }
 0x1ad   : > { %2066 = vrcp.f32 %v494_v33 }
 0x1ae   : > { %v2055_v35 = vpop.eup %2054  ;;  %2068 = vrcp.f32 %v493_v34 }
 0x1af   : > { %v2057_v36 = vpop.eup %2056  ;;  %v496_v37 = vadd.f32 1.0, %v2055_v35 }
 0x1b0   : > { %v495_v38 = vadd.f32 1.0, %v2057_v36 }
 0x1b1   : > { %2070 = vrcp.f32 %v496_v37 }
 0x1b2   : > { %v2059_v39 = vpop.eup %2058  ;;  %2072 = vrcp.f32 %v495_v38 }
 0x1b3   : > { %v2061_v40 = vpop.eup %2060  ;;  %v498_v41 = vadd.f32 1.0, %v2059_v39 }
 0x1b4   : > { %v497_v42 = vadd.f32 1.0, %v2061_v40 }
 0x1b5   : > { %2074 = vrcp.f32 %v498_v41 }
 0x1b6   : > { %v2063_v43 = vpop.eup %2062  ;;  %2076 = vrcp.f32 %v497_v42  ;;  %v2206_v42 = vmov 1966171168  }
 0x1b7   : > { %v2065_v44 = vpop.eup %2064  ;;  %v500_v45 = vadd.f32 1.0, %v2063_v43  ;;  %v597_v43 = vunpack.c.l.s4 %v2206_v42  ;;  %v1152_v42 = vstv %s1916_s13  ;;  %s1932_s13 = sld [smem:[#allocation9 + $0x43]] }
 0x1b8   : > { %v499_v46 = vadd.f32 1.0, %v2065_v44 }
 0x1b9   : > { %2078 = vrcp.f32 %v500_v45 }
 0x1ba   : > { %v2550_v47 = vpop.eup %2066  ;;  %2080 = vrcp.f32 %v499_v46 }
 0x1bb   : > { %v2552_v48 = vpop.eup %2068  ;;  %v519_v51 = vmul.f32 %v2550_v47, %v2404_v2  ;;  %v520_v52 = vmul.f32 %v2550_v47, %v2411_v5 }
 0x1bc   : > { %v517_v49 = vmul.f32 %v2552_v48, %v2398_v0  ;;  %v518_v50 = vmul.f32 %v2552_v48, %v2401_v1 }
 0x1be   : > { %v2562_v54 = vpop.eup %2070  ;;  %v559_v0 = vadd.f32 %v519_v51, %v517_v49  ;;  %v572_v58 = vadd.f32 %v520_v52, %v518_v50 }
 0x1bf   : > { %v2564_v55 = vpop.eup %2072  ;;  %v523_v1 = vmul.f32 %v2562_v54, %v2428_v12  ;;  %v524_v2 = vmul.f32 %v2562_v54, %v2431_v13 }
 0x1c0   : > { %v521_v56 = vmul.f32 %v2564_v55, %v2418_v8  ;;  %v522_v57 = vmul.f32 %v2564_v55, %v2421_v9 }
 0x1c1   : > { %v534_v3 = vmax.f32 %v519_v51, %v523_v1  ;;  %v547_v4 = vmax.f32 %v520_v52, %v524_v2 }
 0x1c2   : > { %v2574_v59 = vpop.eup %2074  ;;  %v560_v5 = vadd.f32 %v559_v0, %v521_v56  ;;  %v573_v60 = vadd.f32 %v572_v58, %v522_v57  ;;  %v533_v7 = vmax.f32 %v517_v49, %v521_v56  ;;  %v546_v10 = vmax.f32 %v518_v50, %v522_v57 }
 0x1c3   : > { %v2576_v61 = vpop.eup %2076  ;;  %v527_v8 = vmul.f32 %v2574_v59, %v2448_v20  ;;  %v528_v9 = vmul.f32 %v2574_v59, %v2451_v21  ;;  %v598_v57 = vunpack.c.0.s8 %v597_v43  ;;  %v2599_v0 = vshrl.u32 %v587_v53, 7 }
 0x1c4   : > { %v525_v62 = vmul.f32 %v2576_v61, %v2438_v16  ;;  %v526_v12 = vmul.f32 %v2576_v61, %v2441_v17  ;;  %v561_v63 = vadd.f32 %v560_v5, %v523_v1  ;;  %v574_v13 = vadd.f32 %v573_v60, %v524_v2 }
 0x1c5   : > { %v536_v15 = vmax.f32 %v534_v3, %v527_v8  ;;  %v549_v17 = vmax.f32 %v547_v4, %v528_v9  ;;  %v945_v43 = vstv %s1895_s14  ;;  %s1910_s14 = sld [smem:[#allocation9 + $0x11]] }
 0x1c6   : > { %v2586_v6 = vpop.eup %2078  ;;  %v562_v11 = vadd.f32 %v561_v63, %v525_v62  ;;  %v575_v14 = vadd.f32 %v574_v13, %v526_v12  ;;  %v535_v22 = vmax.f32 %v533_v7, %v525_v62  ;;  %v548_v23 = vmax.f32 %v546_v10, %v526_v12 }
 0x1c7   : > { %v2588_v20 = vpop.eup %2080  ;;  %v531_v21 = vmul.f32 %v2586_v6, %v2468_v28  ;;  %v532_v16 = vmul.f32 %v2586_v6, %v2471_v29  ;;  %v601_v12 = vsub.s32 %v598_v57, %v2599_v0 }
 0x1c8   : > { %v529_v18 = vmul.f32 %v2588_v20, %v2458_v24  ;;  %v530_v19 = vmul.f32 %v2588_v20, %v2461_v25  ;;  %v563_v30 = vadd.f32 %v562_v11, %v527_v8  ;;  %v576_v31 = vadd.f32 %v575_v14, %v528_v9 }
 0x1c9   : > { %v538_v26 = vmax.f32 %v536_v15, %v531_v21  ;;  %v551_v27 = vmax.f32 %v549_v17, %v532_v16 }
 0x1ca   : > { %v537_v32 = vmax.f32 %v535_v22, %v529_v18  ;;  %v550_v33 = vmax.f32 %v548_v23, %v530_v19  ;;  %v564_v28 = vadd.f32 %v563_v30, %v529_v18  ;;  %v577_v34 = vadd.f32 %v576_v31, %v530_v19 }
 0x1cb   : > { %v650_v30 = vstv %s1864_s30  ;;  %s1909_s30 = sld [smem:[#allocation9 + $0xa]] }
 0x1cc   : > { %v539_v35 = vmax.f32 %v537_v32, %v538_v26  ;;  %v552_v29 = vmax.f32 %v550_v33, %v551_v27  ;;  %v565_v36 = vadd.f32 %v564_v28, %v531_v21  ;;  %v578_v37 = vadd.f32 %v577_v34, %v532_v16 }
 0x1cd   : > { %v672_v27 = vstv %s1866_s27  ;;  %v1007_v33 = vstv %s1901_s8  ;;  %v661_v28 = vstv %s1865_s20  ;;  %s1931_s27 = sld [smem:[#allocation9 + $0x3c]] }
 0x1ce   : > { %v540_v38 = vrot.slane %v539_v35, 4  ;;  %v553_v39 = vrot.slane %v552_v29, 4  ;;  %v566_v24 = vrot.slane %v565_v36, 4  ;;  %v579_v40 = vrot.slane %v578_v37, 4  ;;  %s1887_s8 = sld [smem:[#allocation9 + $0x40]] }
 0x1cf   : > { %s1924_s20 = sld [smem:[#allocation9 + $0xb]] }
 0x1d0   : > { %v541_v41 = vmax.f32 %v539_v35, %v540_v38  ;;  %v554_v25 = vmax.f32 %v552_v29, %v553_v39  ;;  %v567_v44 = vadd.f32 %v566_v24, %v565_v36  ;;  %v580_v45 = vadd.f32 %v579_v40, %v578_v37 }
 0x1d1   : > { %v862_v36 = vstv %s1886_s15  ;;  %v935_v37 = vstv %s1894_s21  ;;  %v1017_v24 = vstv %s1902_s9  ;;  %v790_v40 = vstv %s1879_s12  ;;  %s1903_s15 = sld [smem:[#allocation9 + $0x48]] }
 0x1d2   : > { %v542_v46 = vrot.slane %v541_v41, 2  ;;  %v555_v49 = vrot.slane %v554_v25, 2  ;;  %v568_v50 = vrot.slane %v567_v44, 2  ;;  %v581_v51 = vrot.slane %v580_v45, 2  ;;  %s1880_s21 = sld [smem:[#allocation9 + $0xf]] }
 0x1d3   : > { %s1917_s9 = sld [smem:[#allocation9 + $0x42]] }
 0x1d4   : > { %v543_v52 = vmax.f32 %v541_v41, %v542_v46  ;;  %v556_v56 = vmax.f32 %v554_v25, %v555_v49  ;;  %v569_v58 = vadd.f32 %v568_v50, %v567_v44  ;;  %v582_v1 = vadd.f32 %v581_v51, %v580_v45  ;;  %s1896_s12 = sld [smem:[#allocation9 + $0x17]] }
 0x1d5   : > { %v1297_v46 = vstv %s1931_s27  ;;  %v1080_v49 = vstv %s1909_s30  ;;  %s1946_s27 = sld [smem:[#allocation9 + $0x3d]] }
 0x1d6   : > { %v544_v2 = vrot.slane %v543_v52, 1  ;;  %v557_v5 = vrot.slane %v556_v56, 1  ;;  %v570_v60 = vrot.slane %v569_v58, 1  ;;  %v583_v8 = vrot.slane %v582_v1, 1  ;;  %s1925_s30 = sld [smem:[#allocation9 + $0x12]] }
 0x1d8   : > { %v545_v9 = vmax.f32 %v543_v52, %v544_v2  ;;  %v558_v62 = vmax.f32 %v556_v56, %v557_v5  ;;  %v571_v63 = vadd.f32 %v570_v60, %v569_v58  ;;  %v584_v13 = vadd.f32 %v583_v8, %v582_v1 }
 0x1d9   : > { %v872_v52 = vstv %s1887_s8  ;;  %v1225_v56 = vstv %s1924_s20  ;;  %v1027_v1 = vstv %s1903_s15  ;;  %v800_v2 = vstv %s1880_s21  ;;  %s1961_s8 = sld [smem:[#allocation9 + $0x3e]] }
 0x1da   : > { %v595_v3 = vcombine.low %v545_v9, %v558_v62  ;;  %v585_v4 = vmul.f32 0.015625, %v571_v63  ;;  %v586_v7 = vmul.f32 0.015625, %v584_v13  ;;  %v1162_v8 = vstv %s1917_s9  ;;  %s1939_s20 = sld [smem:[#allocation9 + $0xc]] }
 0x1db   : > { %v955_v9 = vstv %s1896_s12  ;;  %v1307_v63 = vstv %s1932_s13  ;;  %v1090_v13 = vstv %s1910_s14  ;;  %s1888_s15 = sld [smem:[#allocation9 + $0x47]] }
 0x1dc   : > { %v602_v10 = vrot.slane %v595_v3, %v601_v12  ;;  %v622_v11 = vcombine.low %v585_v4, %v586_v7  ;;  %v1442_v7 = vstv %s1946_s27  ;;  %s1954_s21 = sld [smem:[#allocation9 + $0xd]] }
 0x1dd   : > { %s1904_s9 = sld [smem:[#allocation9 + $0x4f]] }
 0x1de   : > { %v609_v14 = vrot.slane %v602_v10, %v601_v12  ;;  %v629_v21 = vrot.slane %v622_v11, %v601_v12  ;;  %v1235_v10 = vstv %s1925_s30  ;;  %s1881_s12 = sld [smem:[#allocation9 + $0x16]] }
 0x1df   : > { %s1918_s13 = sld [smem:[#allocation9 + $0x49]] }
 0x1e0   : > { %610 = vrot.lane.b32.xlu0 %v609_v14, %s2207_s17  ;;  %v636_v16 = vrot.slane %v629_v21, %v601_v12  ;;  %v1587_v21 = vstv %s1961_s8  ;;  %s1897_s14 = sld [smem:[#allocation9 + $0x1e]] }
 0x1e1   : > { %s1933_s27 = sld [smem:[#allocation9 + $0x4a]] }
 0x1e2   : > { %637 = vrot.lane.b32.xlu1 %v636_v16, %s2207_s17  ;;  %s3267_s17 = smov 96   ;;  %v1370_v16 = vstv %s1939_s20  ;;  %s1911_s30 = sld [smem:[#allocation9 + $0x18]] }
 0x1e3   : > { %s1947_s8 = sld [smem:[#allocation9 + $0x44]] }
 0x1e4   : > { %s1926_s20 = sld [smem:[#allocation9 + $0x19]] }
 0x252   : > { %v611_v17 = vpop.permute.xlu0 %610 }
 0x253   : > { %v612_v18 = vrot.slane %v611_v17, 7 }
 0x254   : > { %v638_v22 = vpop.permute.xlu1 %637 }
 0x255   : > { %v614_v19 = vsel %vm613_vm4, %v612_v18, %v611_v17  ;;  %v639_v23 = vrot.slane %v638_v22, 7  ;;  %v882_v18 = vstv %s1888_s15  ;;  %s2211_s15 = smov 64  }
 0x256   : > { %619 = vst.msk [vmem:[#allocation2] sm:$0x7] %vm618_vm5, %v614_v19  ;;  %v1515_v19 = vstv %s1954_s21  ;;  %s1962_s21 = sld [smem:[#allocation9 + $0x45]] }
 0x257   : > { %v640_v26 = vsel %vm613_vm4, %v639_v23, %v638_v22 }
 0x258   : > { %642 = vst.msk [vmem:[#allocation3] sm:$0x7] %vm618_vm5, %v640_v26  ;;  %v1037_v26 = vstv %s1904_s9  ;;  %s1940_s9 = sld [smem:[#allocation9 + $0x13]] }
 0x25d   : > { %v2610_v53 = vld [vmem:[#allocation2] sm:$0x7] }
 0x25e   : > { %v673_v31 = vmul.f32 %v672_v27, %v2610_v53  ;;  %v651_v32 = vmul.f32 %v650_v30, %v2610_v53  ;;  %v662_v29 = vmul.f32 %v661_v28, %v2610_v53  ;;  %v936_v39 = vmul.f32 %v935_v37, %v2610_v53 }
 0x25f   : > { %v2614_v34 = vld [vmem:[#allocation3] sm:$0x7]  ;;  %v791_v25 = vmul.f32 %v790_v40, %v2610_v53  ;;  %v946_v45 = vmul.f32 %v945_v43, %v2610_v53  ;;  %v1081_v51 = vmul.f32 %v1080_v49, %v2610_v53  ;;  %v1226_v58 = vmul.f32 %v1225_v56, %v2610_v53 }
 0x260   : > { %675 = vrot.lane.b32.xlu0 %v673_v31, %s3266_s18  ;;  %653 = vrot.lane.b32.xlu1 %v651_v32, %s3265_s29  ;;  %v1008_v35 = vmul.f32 %v1007_v33, %v2614_v34  ;;  %v863_v38 = vmul.f32 %v862_v36, %v2614_v34  ;;  %v1018_v41 = vmul.f32 %v1017_v24, %v2614_v34  ;;  %v810_v27 = vstv %s1881_s12  ;;  %s1889_s12 = sld [smem:[#allocation9 + $0x4e]] }
 0x261   : > { %v1153_v44 = vmul.f32 %v1152_v42, %v2614_v34  ;;  %v1298_v50 = vmul.f32 %v1297_v46, %v2614_v34  ;;  %v873_v57 = vmul.f32 %v872_v52, %v2614_v34  ;;  %v1028_v5 = vmul.f32 %v1027_v1, %v2614_v34 }
 0x262   : > { %v801_v60 = vmul.f32 %v800_v2, %v2610_v53  ;;  %v1163_v62 = vmul.f32 %v1162_v8, %v2614_v34  ;;  %v956_v12 = vmul.f32 %v955_v9, %v2610_v53  ;;  %v1308_v3 = vmul.f32 %v1307_v63, %v2614_v34 }
 0x263   : > { %v1091_v4 = vmul.f32 %v1090_v13, %v2610_v53  ;;  %v1443_v11 = vmul.f32 %v1442_v7, %v2614_v34  ;;  %v1236_v14 = vmul.f32 %v1235_v10, %v2610_v53  ;;  %v1588_v15 = vmul.f32 %v1587_v21, %v2614_v34 }
 0x264   : > { %1010 = vrot.lane.b32.xlu0 %v1008_v35, %s3265_s29  ;;  %664 = vrot.lane.b32.xlu1 %v662_v29, %s3267_s17  ;;  %v1371_v17 = vmul.f32 %v1370_v16, %v2610_v53  ;;  %v883_v22 = vmul.f32 %v882_v18, %v2614_v34  ;;  %v1516_v23 = vmul.f32 %v1515_v19, %v2610_v53  ;;  %v1172_v32 = vstv %s1918_s13  ;;  %s1955_s13 = sld [smem:[#allocation9 + $0x14]] }
 0x265   : > { %v1038_v30 = vmul.f32 %v1037_v26, %v2614_v34  ;;  %v811_v31 = vmul.f32 %v810_v27, %v2610_v53  ;;  %v965_v33 = vstv %s1897_s14  ;;  %v1173_v28 = vmul.f32 %v1172_v32, %v2614_v34  ;;  %s1905_s14 = sld [smem:[#allocation9 + $0x56]] }
 0x266   : > { %v966_v35 = vmul.f32 %v965_v33, %v2610_v53  ;;  %v1317_v29 = vstv %s1933_s27  ;;  %v1100_v36 = vstv %s1911_s30  ;;  %v1245_v24 = vstv %s1926_s20  ;;  %s1882_s27 = sld [smem:[#allocation9 + $0x1d]] }
 0x267   : > { %v1318_v37 = vmul.f32 %v1317_v29, %v2614_v34  ;;  %v1380_v42 = vstv %s1940_s9  ;;  %s1919_s30 = sld [smem:[#allocation9 + $0x50]] }
 0x268   : > { %865 = vrot.lane.b32.xlu0 %v863_v38, %s3265_s29  ;;  %938 = vrot.lane.b32.xlu1 %v936_v39, %s3265_s29  ;;  %v1101_v38 = vmul.f32 %v1100_v36, %v2610_v53  ;;  %v1452_v39 = vstv %s1947_s8  ;;  %s1898_s8 = sld [smem:[#allocation9 + $0x25]] }
 0x269   : > { %v1453_v40 = vmul.f32 %v1452_v39, %v2614_v34  ;;  %s1934_s20 = sld [smem:[#allocation9 + $0x51]] }
 0x26a   : > { %v1525_v46 = vstv %s1955_s13  ;;  %s1948_s9 = sld [smem:[#allocation9 + $0x4b]]  ;;  %s2212_s13 = smov 48  }
 0x26c   : > { %1020 = vrot.lane.b32.xlu0 %v1018_v41, %s3267_s17  ;;  %793 = vrot.lane.b32.xlu1 %v791_v25, %s3265_s29  ;;  %v1246_v41 = vmul.f32 %v1245_v24, %v2610_v53  ;;  %v1597_v25 = vstv %s1962_s21  ;;  %v820_v52 = vstv %s1882_s27  ;;  %s1912_s21 = sld [smem:[#allocation9 + $0x1f]] }
 0x26d   : > { %v1598_v43 = vmul.f32 %v1597_v25, %v2614_v34  ;;  %s1941_s27 = sld [smem:[#allocation9 + $0x1a]] }
 0x26e   : > { %v975_v1 = vstv %s1898_s8  ;;  %s1956_s8 = sld [smem:[#allocation9 + $0x1b]] }
 0x270   : > { %1155 = vrot.lane.b32.xlu0 %v1153_v44, %s3265_s29  ;;  %948 = vrot.lane.b32.xlu1 %v946_v45, %s3267_s17  ;;  %v1381_v44 = vmul.f32 %v1380_v42, %v2610_v53  ;;  %v892_v45 = vstv %s1889_s12  ;;  %s1927_s12 = sld [smem:[#allocation9 + $0x20]] }
 0x271   : > { %v893_v49 = vmul.f32 %v892_v45, %v2614_v34 }
 0x272   : > { %v1110_v8 = vstv %s1912_s21  ;;  %s1883_s21 = sld [smem:[#allocation9 + $0x24]] }
 0x273   : > { %v1390_v7 = vstv %s1941_s27  ;;  %s1913_s27 = sld [smem:[#allocation9 + $0x26]] }
 0x274   : > { %1300 = vrot.lane.b32.xlu0 %v1298_v50, %s3265_s29  ;;  %1083 = vrot.lane.b32.xlu1 %v1081_v51, %s3265_s29  ;;  %v1526_v50 = vmul.f32 %v1525_v46, %v2610_v53  ;;  %v1047_v51 = vstv %s1905_s14  ;;  %s1963_s14 = sld [smem:[#allocation9 + $0x4c]]  ;;  %v1535_v21 = vstv %s1956_s8 }
 0x275   : > { %v1048_v56 = vmul.f32 %v1047_v51, %v2614_v34  ;;  %s1928_s8 = sld [smem:[#allocation9 + $0x27]] }
 0x276   : > { %v1255_v63 = vstv %s1927_s12  ;;  %s1899_s12 = sld [smem:[#allocation9 + $0x2c]] }
 0x278   : > { %875 = vrot.lane.b32.xlu0 %v873_v57, %s3267_s17  ;;  %1228 = vrot.lane.b32.xlu1 %v1226_v58, %s3265_s29  ;;  %v821_v57 = vmul.f32 %v820_v52, %v2610_v53  ;;  %v1182_v58 = vstv %s1919_s30  ;;  %s1890_s30 = sld [smem:[#allocation9 + $0x55]]  ;;  %v830_v18 = vstv %s1883_s21 }
 0x279   : > { %v1183_v2 = vmul.f32 %v1182_v58, %v2614_v34  ;;  %v1120_v32 = vstv %s1913_s27  ;;  %s1942_s21 = sld [smem:[#allocation9 + $0x21]] }
 0x27a   : > { %s2734_s27 = sld [smem:[#allocation9 + $0x5e]] }
 0x27b   : > { %v1265_v29 = vstv %s1928_s8  ;;  %s2744_s8 = sld [smem:[#allocation9 + $0x2]] }
 0x27c   : > { %1030 = vrot.lane.b32.xlu0 %v1028_v5, %s3266_s18  ;;  %803 = vrot.lane.b32.xlu1 %v801_v60, %s3267_s17  ;;  %v976_v5 = vmul.f32 %v975_v1, %v2610_v53  ;;  %v1327_v60 = vstv %s1934_s20  ;;  %s1906_s20 = sld [smem:[#allocation9 + $0x5d]]  ;;  %v985_v26 = vstv %s1899_s12 }
 0x27d   : > { %v1328_v9 = vmul.f32 %v1327_v60, %v2614_v34  ;;  %s2726_s12 = sld [smem:[#allocation9 + $0x5c]] }
 0x27f   : > { %v1400_v39 = vstv %s1942_s21  ;;  %s2760_s21 = sld [smem:[#allocation9 + $0x1]] }
 0x280   : > { %1165 = vrot.lane.b32.xlu0 %v1163_v62, %s3267_s17  ;;  %958 = vrot.lane.b32.xlu1 %v956_v12, %s3266_s18  ;;  %v1111_v62 = vmul.f32 %v1110_v8, %v2610_v53  ;;  %v1462_v12 = vstv %s1948_s9  ;;  %s1920_s9 = sld [smem:[#allocation9 + $0x57]]  ;;  %v1401_v25 = vmul.f32 %v1400_v39, %v2610_v53  ;;  %v1202_v51 = vstv %s2734_s27 }
 0x281   : > { %v1463_v13 = vmul.f32 %v1462_v12, %v2614_v34  ;;  %s2798_s27 = sld [smem:[#allocation9 + $0x3]] }
 0x283   : > { %v912_v45 = vstv %s2726_s12  ;;  %s2777_s12 = sld [smem:[#allocation9 + $0x34]] }
 0x284   : > { %1310 = vrot.lane.b32.xlu0 %v1308_v3, %s3267_s17  ;;  %1093 = vrot.lane.b32.xlu1 %v1091_v4, %s3267_s17  ;;  %v1256_v3 = vmul.f32 %v1255_v63, %v2610_v53  ;;  %v1607_v4 = vstv %s1963_s14  ;;  %s1935_s14 = sld [smem:[#allocation9 + $0x58]]  ;;  %v913_v58 = vmul.f32 %v912_v45, %v2614_v34 }
 0x285   : > { %v1608_v10 = vmul.f32 %v1607_v4, %v2614_v34 }
 0x288   : > { %1445 = vrot.lane.b32.xlu0 %v1443_v11, %s3265_s29  ;;  %1238 = vrot.lane.b32.xlu1 %v1236_v14, %s3267_s17  ;;  %v1391_v11 = vmul.f32 %v1390_v7, %v2610_v53  ;;  %v902_v14 = vstv %s1890_s30  ;;  %s1949_s30 = sld [smem:[#allocation9 + $0x52]] }
 0x289   : > { %v903_v16 = vmul.f32 %v902_v14, %v2614_v34 }
 0x28c   : > { %1590 = vrot.lane.b32.xlu0 %v1588_v15, %s3265_s29  ;;  %1373 = vrot.lane.b32.xlu1 %v1371_v17, %s3265_s29  ;;  %v1536_v15 = vmul.f32 %v1535_v21, %v2610_v53  ;;  %v1057_v17 = vstv %s1906_s20  ;;  %s1964_s20 = sld [smem:[#allocation9 + $0x53]]  ;;  %v1203_v21 = vmul.f32 %v1202_v51, %v2614_v34 }
 0x28d   : > { %v1058_v19 = vmul.f32 %v1057_v17, %v2614_v34 }
 0x290   : > { %885 = vrot.lane.b32.xlu0 %v883_v22, %s3266_s18  ;;  %1518 = vrot.lane.b32.xlu1 %v1516_v23, %s3265_s29  ;;  %v831_v22 = vmul.f32 %v830_v18, %v2610_v53  ;;  %v1192_v23 = vstv %s1920_s9  ;;  %s2722_s9 = sld [smem:[#allocation9]] }
 0x291   : > { %v1193_v27 = vmul.f32 %v1192_v23, %v2614_v34  ;;  %s2728_s29 = sld [smem:[#allocation9 + $0x22]] }
 0x294   : > { %1040 = vrot.lane.b32.xlu0 %v1038_v30, %s2211_s15  ;;  %813 = vrot.lane.b32.xlu1 %v811_v31, %s3266_s18  ;;  %v986_v30 = vmul.f32 %v985_v26, %v2610_v53  ;;  %v1337_v31 = vstv %s1935_s14  ;;  %s2732_s14 = sld [smem:[#allocation9 + $0x33]] }
 0x295   : > { %v1338_v33 = vmul.f32 %v1337_v31, %v2614_v34  ;;  %v787_v31 = vstv %s2760_s21  ;;  %s2824_s21 = sld [smem:[#allocation9 + $0x61]] }
 0x296   : > { %v646_v42 = vstv %s2722_s9  ;;  %s2767_s9 = sld [smem:[#allocation9 + $0x2e]] }
 0x297   : > { %v1545_v46 = vstv %s2728_s29  ;;  %s2764_s29 = sld [smem:[#allocation9 + $0x59]] }
 0x298   : > { %1175 = vrot.lane.b32.xlu0 %v1173_v28, %s3266_s18  ;;  %968 = vrot.lane.b32.xlu1 %v966_v35, %s2211_s15  ;;  %v1121_v28 = vmul.f32 %v1120_v32, %v2610_v53  ;;  %v1472_v35 = vstv %s1949_s30  ;;  %s2740_s30 = sld [smem:[#allocation9 + $0x2b]]  ;;  %v1546_v1 = vmul.f32 %v1545_v46, %v2610_v53 }
 0x299   : > { %v1473_v36 = vmul.f32 %v1472_v35, %v2614_v34 }
 0x29c   : > { %1320 = vrot.lane.b32.xlu0 %v1318_v37, %s3266_s18  ;;  %1103 = vrot.lane.b32.xlu1 %v1101_v38, %s3266_s18  ;;  %v1266_v37 = vmul.f32 %v1265_v29, %v2610_v53  ;;  %v1617_v38 = vstv %s1964_s20  ;;  %s2753_s20 = sld [smem:[#allocation9 + $0x2d]] }
 0x29d   : > { %v1482_v39 = vstv %s2764_s29  ;;  %s2828_s29 = sld [smem:[#allocation9 + $0x2f]] }
 0x29e   : > { %v840_v8 = vstv %s2740_s30  ;;  %s2804_s30 = sld [smem:[#allocation9 + $0x60]] }
 0x2a0   : > { %1455 = vrot.lane.b32.xlu0 %v1453_v40, %s3267_s17  ;;  %1248 = vrot.lane.b32.xlu1 %v1246_v41, %s3266_s18  ;;  %v1618_v41 = vmul.f32 %v1617_v38, %v2614_v34 }
 0x2a4   : > { %1600 = vrot.lane.b32.xlu0 %v1598_v43, %s3267_s17  ;;  %1383 = vrot.lane.b32.xlu1 %v1381_v44, %s3267_s17  ;;  %v645_v43 = vld [vmem:[#allocation2] sm:$0x3] }
 0x2a5   : > { %v647_v52 = vmul.f32 %v646_v42, %v645_v43  ;;  %v1149_v42 = vstv %s2777_s12  ;;  %s2847_s12 = sld [smem:[#allocation9 + $0x30]] }
 0x2a8   : > { %895 = vrot.lane.b32.xlu0 %v893_v49, %s2211_s15  ;;  %1528 = vrot.lane.b32.xlu1 %v1526_v50, %s3267_s17  ;;  %s2746_s17 = sld [smem:[#allocation9 + $0x5f]]  ;;  %v1004_v50 = vstv %s2732_s14 }
 0x2a9   : > { %s2781_s14 = sld [smem:[#allocation9 + $0x5a]] }
 0x2ac   : > { %1050 = vrot.lane.b32.xlu0 %v1048_v56, %s2212_s13  ;;  %823 = vrot.lane.b32.xlu1 %v821_v57, %s2211_s15 }
 0x2ae   : > { %v1347_v4 = vstv %s2746_s17  ;;  %s2791_s17 = sld [smem:[#allocation9 + $0x35]] }
 0x2af   : > { %v1348_v29 = vmul.f32 %v1347_v4, %v2614_v34 }
 0x2b0   : > { %1185 = vrot.lane.b32.xlu0 %v1183_v2, %s2211_s15  ;;  %978 = vrot.lane.b32.xlu1 %v976_v5, %s2212_s13 }
 0x2b4   : > { %1330 = vrot.lane.b32.xlu0 %v1328_v9, %s2211_s15  ;;  %1113 = vrot.lane.b32.xlu1 %v1111_v62, %s2211_s15  ;;  %v1005_v62 = vmul.f32 %v1004_v50, %v2614_v34 }
 0x2b8   : > { %1465 = vrot.lane.b32.xlu0 %v1463_v13, %s3266_s18  ;;  %1258 = vrot.lane.b32.xlu1 %v1256_v3, %s2211_s15  ;;  %v932_v3 = vstv %s2744_s8  ;;  %s2808_s8 = sld [smem:[#allocation9 + $0x29]] }
 0x2b9   : > { %v933_v23 = vmul.f32 %v932_v3, %v2610_v53 }
 0x2bc   : > { %1610 = vrot.lane.b32.xlu0 %v1608_v10, %s3266_s18  ;;  %1393 = vrot.lane.b32.xlu1 %v1391_v11, %s3266_s18 }
 0x2c0   : > { %905 = vrot.lane.b32.xlu0 %v903_v16, %s2212_s13  ;;  %1538 = vrot.lane.b32.xlu1 %v1536_v15, %s3266_s18  ;;  %s2738_s18 = sld [smem:[#allocation9 + $0x32]]  ;;  %v841_v16 = vmul.f32 %v840_v8, %v2610_v53 }
 0x2c4   : > { %1060 = vrot.lane.b32.xlu0 %v1058_v19, %s2213_s19  ;;  %833 = vrot.lane.b32.xlu1 %v831_v22, %s2212_s13  ;;  %v1130_v19 = vstv %s2753_s20  ;;  %s2816_s20 = sld [smem:[#allocation9 + $0x4]] }
 0x2c6   : > { %v859_v12 = vstv %s2738_s18  ;;  %s2785_s18 = sld [smem:[#allocation9 + $0x28]] }
 0x2c7   : > { %v860_v22 = vmul.f32 %v859_v12, %v2614_v34 }
 0x2c8   : > { %1195 = vrot.lane.b32.xlu0 %v1193_v27, %s2212_s13  ;;  %988 = vrot.lane.b32.xlu1 %v986_v30, %s2213_s19 }
 0x2cc   : > { %1340 = vrot.lane.b32.xlu0 %v1338_v33, %s2212_s13  ;;  %1123 = vrot.lane.b32.xlu1 %v1121_v28, %s2212_s13 }
 0x2d0   : > { %1475 = vrot.lane.b32.xlu0 %v1473_v36, %s2211_s15  ;;  %1268 = vrot.lane.b32.xlu1 %v1266_v37, %s2212_s13  ;;  %v1131_v36 = vmul.f32 %v1130_v19, %v2610_v53 }
 0x2d2   : > { %v676_v24 = vpop.permute.xlu0 %675  ;;  %v654_v40 = vpop.permute.xlu1 %653 }
 0x2d3   : > { %v655_v44 = vrot.slane %v654_v40, 1  ;;  %v677_v2 = vrot.slane %v676_v24, 1 }
 0x2d4   : > { %1620 = vrot.lane.b32.xlu0 %v1618_v41, %s2211_s15  ;;  %1403 = vrot.lane.b32.xlu1 %v1401_v25, %s2211_s15 }
 0x2d5   : > { %v657_v49 = vsel %vm656_vm6, %v654_v40, %v655_v44  ;;  %v679_v15 = vsel %vm678_vm8, %v676_v24, %v677_v2  ;;  %v1275_v24 = vstv %s2767_s9  ;;  %v788_v40 = vmul.f32 %v787_v31, %v2610_v53  ;;  %s2843_s9 = sld [smem:[#allocation9 + $0x3f]] }
 0x2d6   : > { %v1011_v56 = vpop.permute.xlu0 %1010  ;;  %v665_v57 = vpop.permute.xlu1 %664  ;;  %v659_v9 = vadd.f32 %v657_v49, %v647_v52  ;;  %v1483_v49 = vmul.f32 %v1482_v39, %v2614_v34  ;;  %v1276_v50 = vmul.f32 %v1275_v24, %v2610_v53 }
 0x2d7   : > { %v1012_v5 = vrot.slane %v1011_v56, 1  ;;  %v666_v60 = vrot.slane %v665_v57, 1 }
 0x2d8   : > { %915 = vrot.lane.b32.xlu0 %v913_v58, %s2213_s19  ;;  %1548 = vrot.lane.b32.xlu1 %v1546_v1, %s2211_s15  ;;  %v1150_v58 = vmul.f32 %v1149_v42, %v2614_v34 }
 0x2d9   : > { %v1013_v63 = vsel %vm656_vm6, %v1011_v56, %v1012_v5  ;;  %v668_v13 = vsel %vm667_vm7, %v665_v57, %v666_v60  ;;  %v1627_v56 = vstv %s2781_s14  ;;  %v1410_v57 = vstv %s2785_s18  ;;  %s2862_s14 = sld [smem:[#allocation9 + $0x46]] }
 0x2da   : > { %v1015_v7 = vadd.f32 %v1013_v63, %v1005_v62  ;;  %v670_v10 = vadd.f32 %v668_v13, %v659_v9  ;;  %v866_v11 = vpop.permute.xlu0 %865  ;;  %v939_v14 = vpop.permute.xlu1 %938  ;;  %v1294_v5 = vstv %s2791_s17  ;;  %v1077_v60 = vstv %s2798_s27  ;;  %s2866_s18 = sld [smem:[#allocation9 + $0x1c]] }
 0x2db   : > { %v867_v17 = vrot.slane %v866_v11, 1  ;;  %v940_v18 = vrot.slane %v939_v14, 1  ;;  %v1628_v63 = vmul.f32 %v1627_v56, %v2614_v34  ;;  %v1411_v13 = vmul.f32 %v1410_v57, %v2610_v53  ;;  %s2880_s17 = sld [smem:[#allocation9 + $0x4d]] }
 0x2dc   : > { %1205 = vrot.lane.b32.xlu0 %v1203_v21, %s2213_s19  ;;  %843 = vrot.lane.b32.xlu1 %v841_v16, %s2213_s19  ;;  %v2793_v26 = vadd.f32 %v679_v15, %v670_v10  ;;  %v1555_v10 = vstv %s2808_s8  ;;  %v1222_v15 = vstv %s2816_s20  ;;  %s2884_s27 = sld [smem:[#allocation9 + $0x23]] }
 0x2dd   : > { %v868_v27 = vsel %vm656_vm6, %v866_v11, %v867_v17  ;;  %v941_v30 = vsel %vm656_vm6, %v939_v14, %v940_v18  ;;  %v1295_v11 = vmul.f32 %v1294_v5, %v2614_v34  ;;  %v1078_v14 = vmul.f32 %v1077_v60, %v2610_v53  ;;  %s2900_s8 = sld [smem:[#allocation9 + $0x54]] }
 0x2de   : > { %v2800_v32 = vadd.f32 %v868_v27, %v860_v22  ;;  %v943_v33 = vadd.f32 %v941_v30, %v933_v23  ;;  %v1021_v28 = vpop.permute.xlu0 %1020  ;;  %v794_v35 = vpop.permute.xlu1 %793  ;;  %v1556_v27 = vmul.f32 %v1555_v10, %v2610_v53  ;;  %s2904_s20 = sld [smem:[#allocation9 + $0x2a]] }
 0x2df   : > { %v1022_v37 = vrot.slane %v1021_v28, 1  ;;  %v795_v38 = vrot.slane %v794_v35, 1  ;;  %v743_v5 = vstv %s2862_s14  ;;  %s3282_s14 = smov 80  }
 0x2e0   : > { %1350 = vrot.lane.b32.xlu0 %v1348_v29, %s2213_s19  ;;  %1133 = vrot.lane.b32.xlu1 %v1131_v36, %s2213_s19  ;;  %v683_v60 = vstv %s2866_s18  ;;  %s2931_s18 = sld [smem:[#allocation9 + $0x6]] }
 0x2e1   : > { %v1023_v41 = vsel %vm667_vm7, %v1021_v28, %v1022_v37  ;;  %v796_v25 = vsel %vm656_vm6, %v794_v35, %v795_v38  ;;  %v1420_v28 = vstv %s2828_s29  ;;  %v1223_v35 = vmul.f32 %v1222_v15, %v2610_v53  ;;  %s2908_s29 = sld [smem:[#allocation9 + $0x37]] }
 0x2e2   : > { %v2818_v43 = vadd.f32 %v1023_v41, %v1015_v7  ;;  %v2820_v44 = vadd.f32 %v796_v25, %v788_v40  ;;  %v1156_v45 = vpop.permute.xlu0 %1155  ;;  %v949_v46 = vpop.permute.xlu1 %948  ;;  %v1492_v7 = vstv %s2804_s30  ;;  %v1421_v41 = vmul.f32 %v1420_v28, %v2610_v53  ;;  %s2890_s30 = sld [smem:[#allocation9 + $0x36]] }
 0x2e3   : > { %v1157_v51 = vrot.slane %v1156_v45, 1  ;;  %v950_v52 = vrot.slane %v949_v46, 1  ;;  %v1493_v23 = vmul.f32 %v1492_v7, %v2614_v34 }
 0x2e4   : > { %1485 = vrot.lane.b32.xlu0 %v1483_v49, %s2212_s13  ;;  %1278 = vrot.lane.b32.xlu1 %v1276_v50, %s2213_s19  ;;  %v705_v28 = vstv %s2904_s20  ;;  %s2219_s20 = smov 122  }
 0x2e5   : > { %v1158_v1 = vsel %vm656_vm6, %v1156_v45, %v1157_v51  ;;  %v951_v2 = vsel %vm667_vm7, %v949_v46, %v950_v52  ;;  %v733_v45 = vstv %s2843_s9  ;;  %v1565_v46 = vstv %s2847_s12  ;;  %s2912_s9 = sld [smem:[#allocation9 + $0x5]] }
 0x2e6   : > { %v2837_v8 = vadd.f32 %v1158_v1, %v1150_v58  ;;  %v2839_v9 = vadd.f32 %v951_v2, %v943_v33  ;;  %v1301_v62 = vpop.permute.xlu0 %1300  ;;  %v1084_v12 = vpop.permute.xlu1 %1083  ;;  %v1637_v33 = vstv %s2824_s21  ;;  %v734_v57 = vmul.f32 %v733_v45, %v2614_v34  ;;  %s3281_s21 = smov 96   ;;  %s2924_s12 = sld [smem:[#allocation9 + $0x38]] }
 0x2e7   : > { %v1302_v3 = vrot.slane %v1301_v62, 1  ;;  %v1085_v4 = vrot.slane %v1084_v12, 1  ;;  %v1638_v40 = vmul.f32 %v1637_v33, %v2614_v34  ;;  %v1566_v58 = vmul.f32 %v1565_v46, %v2610_v53 }
 0x2e8   : > { %1630 = vrot.lane.b32.xlu0 %v1628_v63, %s2212_s13  ;;  %1413 = vrot.lane.b32.xlu1 %v1411_v13, %s2212_s13  ;;  %v763_v33 = vstv %s2900_s8  ;;  %s2218_s8 = smov 123  }
 0x2e9   : > { %v1303_v21 = vsel %vm656_vm6, %v1301_v62, %v1302_v3  ;;  %v1086_v16 = vsel %vm656_vm6, %v1084_v12, %v1085_v4  ;;  %v744_v3 = vmul.f32 %v743_v5, %v2614_v34  ;;  %v684_v4 = vmul.f32 %v683_v60, %v2610_v53 }
 0x2ea   : > { %v2856_v17 = vadd.f32 %v1303_v21, %v1295_v11  ;;  %v2858_v18 = vadd.f32 %v1086_v16, %v1078_v14  ;;  %v876_v19 = vpop.permute.xlu0 %875  ;;  %v1229_v22 = vpop.permute.xlu1 %1228  ;;  %v753_v11 = vstv %s2880_s17  ;;  %v694_v14 = vstv %s2884_s27  ;;  %s2943_s17 = sld [smem:[#allocation9 + $0x5b]]  ;;  %s2216_s27 = smov 125  }
 0x2eb   : > { %v877_v30 = vrot.slane %v876_v19, 1  ;;  %v1230_v31 = vrot.slane %v1229_v22, 1  ;;  %v1439_v21 = vstv %s2890_s30  ;;  %s2217_s30 = smov 124  }
 0x2ec   : > { %1495 = vrot.lane.b32.xlu0 %v1493_v23, %s2213_s19  ;;  %1558 = vrot.lane.b32.xlu1 %v1556_v27, %s2212_s13  ;;  %v754_v23 = vmul.f32 %v753_v11, %v2614_v34  ;;  %v695_v27 = vmul.f32 %v694_v14, %v2610_v53 }
 0x2ed   : > { %v878_v29 = vsel %vm667_vm7, %v876_v19, %v877_v30  ;;  %v1231_v36 = vsel %vm656_vm6, %v1229_v22, %v1230_v31 }
 0x2ee   : > { %v2874_v37 = vadd.f32 %v878_v29, %v2800_v32  ;;  %v2876_v38 = vadd.f32 %v1231_v36, %v1223_v35  ;;  %v1031_v39 = vpop.permute.xlu0 %1030  ;;  %v804_v24 = vpop.permute.xlu1 %803  ;;  %v1584_v29 = vstv %s2908_s29  ;;  %v1367_v36 = vstv %s2912_s9  ;;  %s3108_s29 = sld [smem:[#allocation4]]  ;;  %s3284_s9 = sshll.u32 %s2381_s16, 7 }
 0x2ef   : > { %v1032_v25 = vrot.slane %v1031_v39, 1  ;;  %v805_v42 = vrot.slane %v804_v24, 1 }
 0x2f0   : > { %1640 = vrot.lane.b32.xlu0 %v1638_v40, %s2213_s19  ;;  %1423 = vrot.lane.b32.xlu1 %v1421_v41, %s2213_s19 }
 0x2f1   : > { %v1033_v32 = vsel %vm678_vm8, %v1031_v39, %v1032_v25  ;;  %v806_v49 = vsel %vm667_vm7, %v804_v24, %v805_v42  ;;  %v764_v25 = vmul.f32 %v763_v33, %v2614_v34  ;;  %v706_v42 = vmul.f32 %v705_v28, %v2610_v53 }
 0x2f2   : > { %v2893_v50 = vadd.f32 %v1033_v32, %v2818_v43  ;;  %v2896_v51 = vadd.f32 %v806_v49, %v2820_v44  ;;  %v1166_v52 = vpop.permute.xlu0 %1165  ;;  %v959_v56 = vpop.permute.xlu1 %958  ;;  %v723_v32 = vstv %s2924_s12  ;;  %v1585_v49 = vmul.f32 %v1584_v29, %v2614_v34  ;;  %s3186_s12 = scalar_lea.vmem [#allocation10], %s3284_s9 }
 0x2f3   : > { %v1167_v1 = vrot.slane %v1166_v52, 1  ;;  %v960_v2 = vrot.slane %v959_v56, 1  ;;  %v724_v60 = vmul.f32 %v723_v32, %v2614_v34 }
 0x2f4   : > { %736 = vrot.lane.b32.xlu0 %v734_v57, %s3281_s21  ;;  %1568 = vrot.lane.b32.xlu1 %v1566_v58, %s2213_s19  ;;  %v1512_v57 = vstv %s2931_s18  ;;  %s1870_s21 = sld [smem:[#allocation9 + $0x31]] }
 0x2f5   : > { %v1168_v43 = vsel %vm667_vm7, %v1166_v52, %v1167_v1  ;;  %v961_v44 = vsel %vm678_vm8, %v959_v56, %v960_v2  ;;  %v1368_v52 = vmul.f32 %v1367_v36, %v2610_v53 }
 0x2f6   : > { %v2915_v62 = vadd.f32 %v1168_v43, %v2837_v8  ;;  %v2918_v12 = vadd.f32 %v961_v44, %v2839_v9  ;;  %v1311_v63 = vpop.permute.xlu0 %1310  ;;  %v1094_v13 = vpop.permute.xlu1 %1093 }
 0x2f7   : > { %v1312_v7 = vrot.slane %v1311_v63, 1  ;;  %v1095_v10 = vrot.slane %v1094_v13, 1 }
 0x2f8   : > { %746 = vrot.lane.b32.xlu0 %v744_v3, %s3282_s14  ;;  %686 = vrot.lane.b32.xlu1 %v684_v4, %s2211_s15  ;;  %s1768_s14 = sshll.u32 %s3186_s12, 4  ;;  %s3198_s14 = int_to_ptr.vmem [resolvable:$true] %s1768_s14 }
 0x2f9   : > { %v1313_v8 = vsel %vm667_vm7, %v1311_v63, %v1312_v7  ;;  %v1096_v9 = vsel %vm667_vm7, %v1094_v13, %v1095_v10  ;;  %v773_v63 = vstv %s2943_s17  ;;  %v1513_v13 = vmul.f32 %v1512_v57, %v2610_v53 }
 0x2fa   : > { %v2934_v16 = vadd.f32 %v1313_v8, %v2856_v17  ;;  %v2937_v15 = vadd.f32 %v1096_v9, %v2858_v18  ;;  %v1446_v19 = vpop.permute.xlu0 %1445  ;;  %v1239_v22 = vpop.permute.xlu1 %1238  ;;  %v1440_v17 = vmul.f32 %v1439_v21, %v2614_v34  ;;  %v774_v8 = vmul.f32 %v773_v63, %v2614_v34 }
 0x2fb   : > { %v1447_v30 = vrot.slane %v1446_v19, 1  ;;  %v1240_v31 = vrot.slane %v1239_v22, 1 }
 0x2fc   : > { %756 = vrot.lane.b32.xlu0 %v754_v23, %s2211_s15  ;;  %697 = vrot.lane.b32.xlu1 %v695_v27, %s2212_s13  ;;  %s3283_s15 = smov 112  }
 0x2fd   : > { %v1448_v18 = vsel %vm656_vm6, %v1446_v19, %v1447_v30  ;;  %v1241_v35 = vsel %vm667_vm7, %v1239_v22, %v1240_v31 }
 0x2fe   : > { %v1450_v39 = vadd.f32 %v1448_v18, %v1440_v17  ;;  %v1243_v24 = vadd.f32 %v1241_v35, %v2876_v38  ;;  %v1591_v40 = vpop.permute.xlu0 %1590  ;;  %v1374_v41 = vpop.permute.xlu1 %1373 }
 0x2ff   : > { %v1592_v45 = vrot.slane %v1591_v40, 1  ;;  %v1375_v46 = vrot.slane %v1374_v41, 1 }
 0x300   : > { %766 = vrot.lane.b32.xlu0 %v764_v25, %s2212_s13  ;;  %708 = vrot.lane.b32.xlu1 %v706_v42, %s2213_s19  ;;  %s2215_s13 = smov 127  }
 0x301   : > { %v1593_v38 = vsel %vm656_vm6, %v1591_v40, %v1592_v45  ;;  %v1376_v56 = vsel %vm656_vm6, %v1374_v41, %v1375_v46 }
 0x302   : > { %v1595_v58 = vadd.f32 %v1593_v38, %v1585_v49  ;;  %v1378_v1 = vadd.f32 %v1376_v56, %v1368_v52  ;;  %v886_v2 = vpop.permute.xlu0 %885  ;;  %v1519_v5 = vpop.permute.xlu1 %1518 }
 0x303   : > { %v887_v43 = vrot.slane %v886_v2, 1  ;;  %v1520_v44 = vrot.slane %v1519_v5, 1 }
 0x304   : > { %726 = vrot.lane.b32.xlu1 %v724_v60, %s3283_s15  ;;  %s1755_s15 = scalar_lea.sflag [#allocation7], %s2381_s16 }
 0x305   : > { %v888_v3 = vsel %vm678_vm8, %v886_v2, %v887_v43  ;;  %v1521_v4 = vsel %vm656_vm6, %v1519_v5, %v1520_v44 }
 0x306   : > { %v2970_v7 = vadd.f32 %v888_v3, %v2874_v37  ;;  %v1523_v10 = vadd.f32 %v1521_v4, %v1513_v13  ;;  %v1041_v11 = vpop.permute.xlu0 %1040  ;;  %v814_v14 = vpop.permute.xlu1 %813 }
 0x307   : > { %v815_v9 = vrot.slane %v814_v14, 1 }
 0x308   : > { %776 = vrot.lane.b32.xlu1 %v774_v8, %s2213_s19  ;;  %s2214_s19 = smov 126  }
 0x309   : > { %v816_v21 = vsel %vm678_vm8, %v814_v14, %v815_v9  ;;  %v1042_v14 = vrot.slane %v1041_v11, 1 }
 0x30a   : > { %v2976_v53 = vadd.f32 %v816_v21, %v2896_v51  ;;  %v1176_v19 = vpop.permute.xlu0 %1175  ;;  %v969_v22 = vpop.permute.xlu1 %968 }
 0x30b   : > { %v1177_v23 = vrot.slane %v1176_v19, 1  ;;  %v1043_v21 = vsel %vm689_vm9, %v1041_v11, %v1042_v14 }
 0x30d   : > { %v1178_v27 = vsel %vm678_vm8, %v1176_v19, %v1177_v23  ;;  %v970_v19 = vrot.slane %v969_v22, 1 }
 0x30e   : > { %v2980_v37 = vadd.f32 %v1178_v27, %v2915_v62  ;;  %v1321_v30 = vpop.permute.xlu0 %1320  ;;  %v1104_v31 = vpop.permute.xlu1 %1103 }
 0x30f   : > { %v1322_v33 = vrot.slane %v1321_v30, 1  ;;  %v1105_v34 = vrot.slane %v1104_v31, 1 }
 0x311   : > { %v1323_v28 = vsel %vm678_vm8, %v1321_v30, %v1322_v33  ;;  %v1106_v17 = vsel %vm678_vm8, %v1104_v31, %v1105_v34  ;;  %v1045_v30 = vadd.f32 %v1043_v21, %v2893_v50  ;;  %v971_v34 = vsel %vm689_vm9, %v969_v22, %v970_v19 }
 0x312   : > { %v2985_v18 = vadd.f32 %v1323_v28, %v2934_v16  ;;  %v2988_v51 = vadd.f32 %v1106_v17, %v2937_v15  ;;  %v1456_v35 = vpop.permute.xlu0 %1455  ;;  %v1249_v29 = vpop.permute.xlu1 %1248 }
 0x313   : > { %v1457_v36 = vrot.slane %v1456_v35, 1  ;;  %v1250_v40 = vrot.slane %v1249_v29, 1 }
 0x315   : > { %v1458_v62 = vsel %vm667_vm7, %v1456_v35, %v1457_v36  ;;  %v1251_v41 = vsel %vm678_vm8, %v1249_v29, %v1250_v40  ;;  %v973_v36 = vadd.f32 %v971_v34, %v2918_v12 }
 0x316   : > { %v2992_v25 = vadd.f32 %v1458_v62, %v1450_v39  ;;  %v2994_v42 = vadd.f32 %v1251_v41, %v1243_v24  ;;  %v1601_v45 = vpop.permute.xlu0 %1600  ;;  %v1384_v46 = vpop.permute.xlu1 %1383 }
 0x317   : > { %v1602_v32 = vrot.slane %v1601_v45, 1  ;;  %v1385_v16 = vrot.slane %v1384_v46, 1 }
 0x319   : > { %v1603_v49 = vsel %vm667_vm7, %v1601_v45, %v1602_v32  ;;  %v1386_v15 = vsel %vm667_vm7, %v1384_v46, %v1385_v16 }
 0x31a   : > { %v2998_v52 = vadd.f32 %v1603_v49, %v1595_v58  ;;  %v3000_v38 = vadd.f32 %v1386_v15, %v1378_v1  ;;  %v896_v56 = vpop.permute.xlu0 %895  ;;  %v1529_v57 = vpop.permute.xlu1 %1528 }
 0x31b   : > { %v1530_v2 = vrot.slane %v1529_v57, 1  ;;  %v897_v15 = vrot.slane %v896_v56, 1 }
 0x31d   : > { %v1531_v39 = vsel %vm667_vm7, %v1529_v57, %v1530_v2 }
 0x31e   : > { %v3003_v5 = vadd.f32 %v1531_v39, %v1523_v10  ;;  %v1051_v24 = vpop.permute.xlu0 %1050  ;;  %v824_v60 = vpop.permute.xlu1 %823  ;;  %v898_v39 = vsel %vm689_vm9, %v896_v56, %v897_v15 }
 0x31f   : > { %v1052_v10 = vrot.slane %v1051_v24, 1  ;;  %v900_v19 = vadd.f32 %v898_v39, %v2970_v7 }
 0x321   : > { %v1053_v23 = vsel %vm700_vm10, %v1051_v24, %v1052_v10  ;;  %v825_v24 = vrot.slane %v824_v60, 1 }
 0x322   : > { %v1186_v43 = vpop.permute.xlu0 %1185  ;;  %v979_v44 = vpop.permute.xlu1 %978  ;;  %v1055_v17 = vadd.f32 %v1053_v23, %v1045_v30 }
 0x323   : > { %v980_v27 = vrot.slane %v979_v44, 1 }
 0x325   : > { %v981_v35 = vsel %vm700_vm10, %v979_v44, %v980_v27  ;;  %v1187_v44 = vrot.slane %v1186_v43, 1 }
 0x326   : > { %v3005_v63 = vpop.permute.xlu0 %1330  ;;  %v3007_v13 = vpop.permute.xlu1 %1113  ;;  %v983_v45 = vadd.f32 %v981_v35, %v973_v36 }
 0x327   : > { %v1332_v23 = vrot.slane %v3005_v63, 1  ;;  %v1188_v34 = vsel %vm689_vm9, %v1186_v43, %v1187_v44 }
 0x32a   : > { %v3009_v3 = vpop.permute.xlu0 %1465  ;;  %v3011_v58 = vpop.permute.xlu1 %1258 }
 0x32e   : > { %v3013_v1 = vpop.permute.xlu0 %1610  ;;  %v3015_v4 = vpop.permute.xlu1 %1393 }
 0x332   : > { %v906_v8 = vpop.permute.xlu0 %905  ;;  %v3017_v9 = vpop.permute.xlu1 %1538 }
 0x333   : > { %v907_v57 = vrot.slane %v906_v8, 1 }
 0x335   : > { %v908_v14 = vsel %vm700_vm10, %v906_v8, %v907_v57 }
 0x336   : > { %v1061_v31 = vpop.permute.xlu0 %1060  ;;  %v834_v33 = vpop.permute.xlu1 %833 }
 0x337   : > { %v1062_v28 = vrot.slane %v1061_v31, 1  ;;  %v835_v10 = vrot.slane %v834_v33, 1 }
 0x339   : > { %v1063_v29 = vsel %vm711_vm11, %v1061_v31, %v1062_v28  ;;  %v826_v31 = vsel %vm689_vm9, %v824_v60, %v825_v24  ;;  %v1115_v28 = vrot.slane %v3007_v13, 1  ;;  %v836_v8 = vsel %vm700_vm10, %v834_v33, %v835_v10 }
 0x33a   : > { %v1065_v11 = vadd.f32 %v1063_v29, %v1055_v17  ;;  %v1196_v40 = vpop.permute.xlu0 %1195  ;;  %v989_v62 = vpop.permute.xlu1 %988  ;;  %v910_v17 = vadd.f32 %v908_v14, %v900_v19  ;;  %v1333_v60 = vsel %vm689_vm9, %v3005_v63, %v1332_v23  ;;  %v1260_v33 = vrot.slane %v3011_v58, 1 }
 0x33b   : > { %v990_v41 = vrot.slane %v989_v62, 1  ;;  %v1197_v21 = vrot.slane %v1196_v40, 1  ;;  %v1335_v44 = vadd.f32 %v1333_v60, %v2985_v18 }
 0x33c   : > { %1067 = vrot.lane.b32.xlu1 %v1065_v11, %s2214_s19  ;;  %v828_v11 = vadd.f32 %v826_v31, %v2976_v53 }
 0x33d   : > { %v991_v50 = vsel %vm711_vm11, %v989_v62, %v990_v41  ;;  %v1198_v29 = vsel %vm700_vm10, %v1196_v40, %v1197_v21  ;;  %v1190_v62 = vadd.f32 %v1188_v34, %v2980_v37  ;;  %v1467_v34 = vrot.slane %v3009_v3, 1 }
 0x33e   : > { %v993_v46 = vadd.f32 %v991_v50, %v983_v45  ;;  %v1341_v32 = vpop.permute.xlu0 %1340  ;;  %v1124_v22 = vpop.permute.xlu1 %1123  ;;  %v1116_v50 = vsel %vm689_vm9, %v3007_v13, %v1115_v28  ;;  %v838_v15 = vadd.f32 %v836_v8, %v828_v11 }
 0x33f   : > { %v1342_v35 = vrot.slane %v1341_v32, 1  ;;  %v1125_v36 = vrot.slane %v1124_v22, 1  ;;  %v1200_v57 = vadd.f32 %v1198_v29, %v1190_v62  ;;  %v1118_v13 = vadd.f32 %v1116_v50, %v2988_v51 }
 0x340   : > { %995 = vrot.lane.b32.xlu0 %v993_v46, %s2214_s19  ;;  %v1395_v62 = vrot.slane %v3015_v4, 1  ;;  %s2131_s19 = scalar_lea.vmem %s3198_s14, 2048 }
 0x341   : > { %v1343_v39 = vsel %vm700_vm10, %v1341_v32, %v1342_v35  ;;  %v1126_v53 = vsel %vm700_vm10, %v1124_v22, %v1125_v36  ;;  %v1261_v32 = vsel %vm689_vm9, %v3011_v58, %v1260_v33  ;;  %p2132_p12 = scmp.ne.s32.totalorder %s3198_s14, %s2131_s19 }
 0x342   : > { %v3027_v16 = vpop.permute.xlu0 %1475  ;;  %v1269_v49 = vpop.permute.xlu1 %1268  ;;  %v1345_v31 = vadd.f32 %v1343_v39, %v1335_v44  ;;  %v1128_v22 = vadd.f32 %v1126_v53, %v1118_v13 }
 0x343   : > { %v1270_v37 = vrot.slane %v1269_v49, 1  ;;  %v1477_v29 = vrot.slane %v3027_v16, 1  ;;  %p2133_p2 = pnand %p2132_p12, %p3285_p0 }
 0x345   : > { %v1271_v18 = vsel %vm700_vm10, %v1269_v49, %v1270_v37  ;;  %v1468_v49 = vsel %vm678_vm8, %v3009_v3, %v1467_v34  ;;  %v1478_v50 = vsel %vm689_vm9, %v3027_v16, %v1477_v29  ;;  %p2134_p7 = pneg %p2133_p2 }
 0x346   : > { %v3029_v2 = vpop.permute.xlu0 %1620  ;;  %v3031_v12 = vpop.permute.xlu1 %1403 }
 0x347   : > { %v1622_v33 = vrot.slane %v3029_v2, 1 }
 0x349   : > { %v1623_v44 = vsel %vm689_vm9, %v3029_v2, %v1622_v33 }
 0x34a   : > { %v916_v27 = vpop.permute.xlu0 %915  ;;  %v3037_v30 = vpop.permute.xlu1 %1548 }
 0x34b   : > { %v917_v56 = vrot.slane %v916_v27, 1 }
 0x34d   : > { %v918_v7 = vsel %vm711_vm11, %v916_v27, %v917_v56  ;;  %v1263_v56 = vadd.f32 %v1261_v32, %v2994_v42 }
 0x34e   : > { %v920_v43 = vadd.f32 %v918_v7, %v910_v17  ;;  %v1206_v41 = vpop.permute.xlu0 %1205  ;;  %v844_v45 = vpop.permute.xlu1 %843  ;;  %v1612_v7 = vrot.slane %v3013_v1, 1 }
 0x34f   : > { %v1207_v46 = vrot.slane %v1206_v41, 1  ;;  %v845_v40 = vrot.slane %v844_v45, 1  ;;  %v1273_v11 = vadd.f32 %v1271_v18, %v1263_v56 }
 0x350   : > { %922 = vrot.lane.b32.xlu1 %v920_v43, %s2215_s13  ;;  %v1613_v3 = vsel %vm678_vm8, %v3013_v1, %v1612_v7  ;;  %v1550_v1 = vrot.slane %v3037_v30, 1 }
 0x351   : > { %v1208_v63 = vsel %vm711_vm11, %v1206_v41, %v1207_v46  ;;  %v846_v24 = vsel %vm711_vm11, %v844_v45, %v845_v40  ;;  %v1405_v46 = vrot.slane %v3031_v12, 1  ;;  %v1470_v40 = vadd.f32 %v1468_v49, %v2992_v25 }
 0x352   : > { %v1210_v14 = vadd.f32 %v1208_v63, %v1200_v57  ;;  %v848_v10 = vadd.f32 %v846_v24, %v838_v15  ;;  %v1351_v21 = vpop.permute.xlu0 %1350  ;;  %v1134_v19 = vpop.permute.xlu1 %1133  ;;  %v1540_v15 = vrot.slane %v3017_v9, 1  ;;  %v1396_v57 = vsel %vm678_vm8, %v3015_v4, %v1395_v62 }
 0x353   : > { %v1352_v23 = vrot.slane %v1351_v21, 1  ;;  %v1135_v27 = vrot.slane %v1134_v19, 1  ;;  %v1480_v16 = vadd.f32 %v1478_v50, %v1470_v40  ;;  %v1406_v25 = vsel %vm689_vm9, %v3031_v12, %v1405_v46  ;;  %v718_v46 = vld [vmem:[#allocation3] sm:$0x3] }
 0x354   : > { %1212 = vrot.lane.b32.xlu1 %v1210_v14, %s2216_s27  ;;  %850 = vrot.lane.b32.xlu0 %v848_v10, %s2215_s13  ;;  %v1615_v14 = vadd.f32 %v1613_v3, %v2998_v52  ;;  %v1398_v4 = vadd.f32 %v1396_v57, %v3000_v38  ;;  %v1541_v10 = vsel %vm678_vm8, %v3017_v9, %v1540_v15  ;;  %v719_v40 = vstv %s1870_s21  ;;  %s2220_s13 = smov [#allocation10]  }
 0x355   : > { %v1353_v51 = vsel %vm711_vm11, %v1351_v21, %v1352_v23  ;;  %v1136_v28 = vsel %vm711_vm11, %v1134_v19, %v1135_v27  ;;  %v1551_v52 = vsel %vm689_vm9, %v3037_v30, %v1550_v1  ;;  %v1543_v9 = vadd.f32 %v1541_v10, %v3003_v5 }
 0x356   : > { %v1355_v17 = vadd.f32 %v1353_v51, %v1345_v31  ;;  %v1138_v35 = vadd.f32 %v1136_v28, %v1128_v22  ;;  %v1486_v58 = vpop.permute.xlu0 %1485  ;;  %v1279_v8 = vpop.permute.xlu1 %1278  ;;  %v1625_v27 = vadd.f32 %v1623_v44, %v1615_v14  ;;  %v1408_v12 = vadd.f32 %v1406_v25, %v1398_v4 }
 0x357   : > { %v1280_v36 = vrot.slane %v1279_v8, 1  ;;  %v1487_v60 = vrot.slane %v1486_v58, 1  ;;  %v720_v57 = vmul.f32 %v719_v40, %v718_v46 }
 0x358   : > { %1357 = vrot.lane.b32.xlu1 %v1355_v17, %s2217_s30  ;;  %1140 = vrot.lane.b32.xlu0 %v1138_v35, %s2216_s27  ;;  %s2135_s27 = sshll.u32 %s2220_s13, 4  ;;  %s2136_s27 = int_to_ptr.vmem [resolvable:$false] %s2135_s27 }
 0x359   : > { %v1281_v42 = vsel %vm711_vm11, %v1279_v8, %v1280_v36  ;;  %v1488_v39 = vsel %vm700_vm10, %v1486_v58, %v1487_v60  ;;  %v1553_v58 = vadd.f32 %v1551_v52, %v1543_v9  ;;  %p2138_p8 = scmp.lt.s32.totalorder %s3198_s14, %s2136_s27 }
 0x35a   : > { %v1283_v43 = vadd.f32 %v1281_v42, %v1273_v11  ;;  %v1631_v41 = vpop.permute.xlu0 %1630  ;;  %v1414_v45 = vpop.permute.xlu1 %1413  ;;  %v1490_v21 = vadd.f32 %v1488_v39, %v1480_v16 }
 0x35b   : > { %v1632_v53 = vrot.slane %v1631_v41, 1  ;;  %v1415_v37 = vrot.slane %v1414_v45, 1 }
 0x35c   : > { %1285 = vrot.lane.b32.xlu0 %v1283_v43, %s2217_s30  ;;  %s2137_s30 = scalar_lea.vmem %s2136_s27, 4096 }
 0x35d   : > { %v1633_v19 = vsel %vm700_vm10, %v1631_v41, %v1632_v53  ;;  %v1416_v32 = vsel %vm700_vm10, %v1414_v45, %v1415_v37  ;;  %p2139_p9 = scmp.lt.s32.totalorder %s2137_s30, %s2131_s19 }
 0x35e   : > { %v1496_v63 = vpop.permute.xlu0 %1495  ;;  %v1559_v24 = vpop.permute.xlu1 %1558  ;;  %v1635_v51 = vadd.f32 %v1633_v19, %v1625_v27  ;;  %v1418_v28 = vadd.f32 %v1416_v32, %v1408_v12 }
 0x35f   : > { %v1497_v13 = vrot.slane %v1496_v63, 1  ;;  %v1560_v23 = vrot.slane %v1559_v24, 1  ;;  %p2140_p10 = por %p2139_p9, %p2138_p8 }
 0x361   : > { %v1498_v2 = vsel %vm711_vm11, %v1496_v63, %v1497_v13  ;;  %v1561_v56 = vsel %vm700_vm10, %v1559_v24, %v1560_v23  ;;  %p2141_p1 = pnand %p2140_p10, %p2134_p7 }
 0x362   : > { %v1500_v31 = vadd.f32 %v1498_v2, %v1490_v21  ;;  %v1641_v22 = vpop.permute.xlu0 %1640  ;;  %v1424_v34 = vpop.permute.xlu1 %1423  ;;  %v1563_v30 = vadd.f32 %v1561_v56, %v1553_v58  ;;  %v302_v58 = vstv %s3108_s29 }
 0x363   : > { %v1642_v38 = vrot.slane %v1641_v22, 1  ;;  %v1425_v18 = vrot.slane %v1424_v34, 1 }
 0x364   : > { %1502 = vrot.lane.b32.xlu1 %v1500_v31, %s2218_s8 }
 0x365   : > { %v1643_v17 = vsel %vm711_vm11, %v1641_v22, %v1642_v38  ;;  %v1426_v35 = vsel %vm711_vm11, %v1424_v34, %v1425_v18 }
 0x366   : > { %v1645_v8 = vadd.f32 %v1643_v17, %v1635_v51  ;;  %v1428_v29 = vadd.f32 %v1426_v35, %v1418_v28  ;;  %v1569_v36 = vpop.permute.xlu1 %1568  ;;  %v737_v60 = vpop.permute.xlu0 %736  ;;  %v643_v28 = vld [vmem:[%s3256_s3] ss:$8 sm:$0x3] }
 0x367   : > { %v1570_v7 = vrot.slane %v1569_v36, 1  ;;  %v738_v53 = vrot.slane %v737_v60, 1 }
 0x368   : > { %1647 = vrot.lane.b32.xlu1 %v1645_v8, %s2219_s20  ;;  %1430 = vrot.lane.b32.xlu0 %v1428_v29, %s2218_s8 }
 0x369   : > { %v1571_v5 = vsel %vm711_vm11, %v1569_v36, %v1570_v7  ;;  %v739_v24 = vsel %vm667_vm7, %v737_v60, %v738_v53 }
 0x36a   : > { %v1573_v11 = vadd.f32 %v1571_v5, %v1563_v30  ;;  %v687_v49 = vpop.permute.xlu1 %686  ;;  %v747_v43 = vpop.permute.xlu0 %746 }
 0x36b   : > { %v748_v44 = vrot.slane %v747_v43, 1  ;;  %v688_v25 = vrot.slane %v687_v49, 1 }
 0x36c   : > { %1575 = vrot.lane.b32.xlu0 %v1573_v11, %s2219_s20 }
 0x36d   : > { %v749_v4 = vsel %vm678_vm8, %v747_v43, %v748_v44  ;;  %v690_v10 = vsel %vm689_vm9, %v687_v49, %v688_v25  ;;  %v1892_v49 = vld [vmem:[%s3256_s3 + $0x2] ss:$8 sm:$0x3] }
 0x36e   : > { %v698_v62 = vpop.permute.xlu1 %697  ;;  %v757_v45 = vpop.permute.xlu0 %756  ;;  %v692_v27 = vadd.f32 %v690_v10, %v2793_v26 }
 0x36f   : > { %v699_v14 = vrot.slane %v698_v62, 1  ;;  %v758_v21 = vrot.slane %v757_v45, 1 }
 0x371   : > { %v701_v23 = vsel %vm700_vm10, %v698_v62, %v699_v14  ;;  %v759_v31 = vsel %vm689_vm9, %v757_v45, %v758_v21 }
 0x372   : > { %v709_v42 = vpop.permute.xlu1 %708  ;;  %v767_v3 = vpop.permute.xlu0 %766  ;;  %v703_v52 = vadd.f32 %v701_v23, %v692_v27  ;;  %v1952_v23 = vld [vmem:[%s3256_s3 + $0x6] ss:$8 sm:$0x3] }
 0x373   : > { %v710_v19 = vrot.slane %v709_v42, 1  ;;  %v768_v22 = vrot.slane %v767_v3, 1 }
 0x375   : > { %v712_v34 = vsel %vm711_vm11, %v709_v42, %v710_v19  ;;  %v769_v51 = vsel %vm700_vm10, %v767_v3, %v768_v22  ;;  %v1937_v19 = vld [vmem:[%s3256_s3 + $0x5] ss:$8 sm:$0x3] }
 0x376   : > { %v727_v41 = vpop.permute.xlu1 %726  ;;  %v714_v18 = vadd.f32 %v712_v34, %v703_v52 }
 0x377   : > { %v728_v50 = vrot.slane %v727_v41, 1 }
 0x378   : > { %v715_v36 = vmul.f32 %v714_v18, %v643_v28 }
 0x379   : > { %v729_v15 = vsel %vm656_vm6, %v727_v41, %v728_v50 }
 0x37a   : > { %v777_v33 = vpop.permute.xlu1 %776  ;;  %v731_v37 = vadd.f32 %v729_v15, %v720_v57  ;;  %v716_v40 = vadd.f32 %v715_v36, %v302_v58  ;;  %v1907_v15 = vld [vmem:[%s3256_s3 + $0x3] ss:$8 sm:$0x3] }
 0x37b   : > { %v778_v56 = vrot.slane %v777_v33, 1 }
 0x37c   : > { %v741_v1 = vadd.f32 %v739_v24, %v731_v37  ;;  %v1922_v37 = vld [vmem:[%s3256_s3 + $0x4] ss:$8 sm:$0x3] }
 0x37d   : > { %v779_v11 = vsel %vm711_vm11, %v777_v33, %v778_v56 }
 0x37e   : > { %v751_v32 = vadd.f32 %v749_v4, %v741_v1 }
 0x380   : > { %v761_v38 = vadd.f32 %v759_v31, %v751_v32 }
 0x382   : > { %v771_v26 = vadd.f32 %v769_v51, %v761_v38 }
 0x384   : > { %v781_v43 = vadd.f32 %v779_v11, %v771_v26 }
 0x386   : > { %v782_v1 = vmul.f32 %v781_v43, %v643_v28 }
 0x3ae   : > { %v1068_v39 = vpop.permute.xlu1 %1067 }
 0x3af   : > { %v1069_v17 = vrot.slane %v1068_v39, 1 }
 0x3b1   : > { %v1070_v62 = vsel %vm998_vm12, %v1068_v39, %v1069_v17 }
 0x3b2   : > { %v996_v16 = vpop.permute.xlu0 %995  ;;  %v1072_v33 = vmul.f32 %v1892_v49, %v1070_v62 }
 0x3b3   : > { %v997_v8 = vrot.slane %v996_v16, 1 }
 0x3b4   : > { %v1073_v52 = vadd.f32 %v1072_v33, %v782_v1  ;;  %v1667_v33 = vld [vmem:[%s2387_s22 + $0x20] sm:$0xff]  ;;  %v1677_v1 = vld [vmem:[%s2387_s22 + $0x70] sm:$0xff] }
 0x3b5   : > { %v999_v45 = vsel %vm998_vm12, %v996_v16, %v997_v8 }
 0x3b6   : > { %v1001_v14 = vmul.f32 %v1892_v49, %v999_v45  ;;  %v1664_v45 = vld [vmem:[%s2387_s22 + $0x8] sm:$0xff] }
 0x3c2   : > { %v3102_v63 = vpop.permute.xlu1 %922 }
 0x3c3   : > { %v924_v41 = vrot.slane %v3102_v63, 1 }
 0x3c5   : > { %v925_v4 = vsel %vm853_vm13, %v3102_v63, %v924_v41  ;;  %v1663_v41 = vld [vmem:[%s2387_s22] sm:$0xff] }
 0x3c6   : > { %v851_v13 = vpop.permute.xlu0 %850  ;;  %v1213_v2 = vpop.permute.xlu1 %1212 }
 0x3c7   : > { %v852_v7 = vrot.slane %v851_v13, 1  ;;  %v1214_v30 = vrot.slane %v1213_v2, 1 }
 0x3c9   : > { %v854_v3 = vsel %vm853_vm13, %v851_v13, %v852_v7  ;;  %v1215_v57 = vsel %vm1143_vm14, %v1213_v2, %v1214_v30  ;;  %v1877_v13 = vld [vmem:[%s3256_s3 + $0x1] ss:$8 sm:$0x3] }
 0x3ca   : > { %v1141_v12 = vpop.permute.xlu0 %1140  ;;  %v1358_v9 = vpop.permute.xlu1 %1357  ;;  %v1217_v21 = vmul.f32 %v1907_v15, %v1215_v57  ;;  %v927_v38 = vmul.f32 %v1877_v13, %v925_v4  ;;  %v1702_v57 = vsub.s32 1, %v2599_v0  ;;  %v1680_v4 = vmul.f32 %v2552_v48, %v1664_v45 }
 0x3cb   : > { %v1142_v29 = vrot.slane %v1141_v12, 1  ;;  %v1359_v60 = vrot.slane %v1358_v9, 1 }
 0x3cc   : > { %v1218_v17 = vadd.f32 %v1217_v21, %v927_v38 }
 0x3cd   : > { %v1144_v50 = vsel %vm1143_vm14, %v1141_v12, %v1142_v29  ;;  %v1360_v16 = vsel %vm1288_vm15, %v1358_v9, %v1359_v60  ;;  %v856_v12 = vmul.f32 %v1877_v13, %v854_v3  ;;  %v1002_v9 = vadd.f32 %v1001_v14, %v716_v40  ;;  %v1669_v40 = vld [vmem:[%s2387_s22 + $0x30] sm:$0xff]  ;;  %v1670_v3 = vld [vmem:[%s2387_s22 + $0x38] sm:$0xff] }
 0x3ce   : > { %v1286_v35 = vpop.permute.xlu0 %1285  ;;  %v1146_v10 = vmul.f32 %v1907_v15, %v1144_v50  ;;  %v1362_v31 = vmul.f32 %v1922_v37, %v1360_v16  ;;  %v1665_v50 = vld [vmem:[%s2387_s22 + $0x10] sm:$0xff]  ;;  %v1698_v15 = vsub.s32 0, %v2599_v0  ;;  %v1671_v16 = vld [vmem:[%s2387_s22 + $0x40] sm:$0xff]  ;;  %v1678_v14 = vld [vmem:[%s2387_s22 + $0x78] sm:$0xff]  ;;  %v1679_v13 = vmul.f32 %v2552_v48, %v1663_v41 }
 0x3cf   : > { %v1287_v42 = vrot.slane %v1286_v35, 1  ;;  %v1686_v0 = vmul.f32 %v2562_v54, %v1670_v3  ;;  %v2086_v48 = vld [vmem:[%s2387_s22 + $0x60] sm:$0xff] }
 0x3d0   : > { %v1147_v51 = vadd.f32 %v1146_v10, %v856_v12  ;;  %v1685_v10 = vmul.f32 %v2562_v54, %v1669_v40 }
 0x3d1   : > { %v1289_v24 = vsel %vm1288_vm15, %v1286_v35, %v1287_v42  ;;  %v1363_v35 = vadd.f32 %v1362_v31, %v1073_v52 }
 0x3d2   : > { %v1291_v22 = vmul.f32 %v1922_v37, %v1289_v24  ;;  %v1674_v37 = vld [vmem:[%s2387_s22 + $0x58] sm:$0xff]  ;;  %v1672_v24 = vld [vmem:[%s2387_s22 + $0x48] sm:$0xff] }
 0x3d4   : > { %v1292_v58 = vadd.f32 %v1291_v22, %v1002_v9  ;;  %v1691_v22 = vmul.f32 %v2086_v48, %v2588_v20 }
 0x3d6   : > { %v1503_v5 = vpop.permute.xlu1 %1502 }
 0x3d7   : > { %v1504_v46 = vrot.slane %v1503_v5, 1 }
 0x3d9   : > { %v1505_v32 = vsel %vm1433_vm0, %v1503_v5, %v1504_v46  ;;  %v1666_v46 = vld [vmem:[%s2387_s22 + $0x18] sm:$0xff] }
 0x3da   : > { %v1431_v39 = vpop.permute.xlu0 %1430  ;;  %v1648_v53 = vpop.permute.xlu1 %1647  ;;  %v1507_v28 = vmul.f32 %v1937_v19, %v1505_v32 }
 0x3db   : > { %v1432_v44 = vrot.slane %v1431_v39, 1  ;;  %v1649_v25 = vrot.slane %v1648_v53, 1 }
 0x3dc   : > { %v1508_v36 = vadd.f32 %v1507_v28, %v1218_v17 }
 0x3dd   : > { %v1434_v2 = vsel %vm1433_vm0, %v1431_v39, %v1432_v44  ;;  %v1650_v27 = vsel %vm1578_vm1, %v1648_v53, %v1649_v25  ;;  %v1668_v39 = vld [vmem:[%s2387_s22 + $0x28] sm:$0xff]  ;;  %v1673_v53 = vld [vmem:[%s2387_s22 + $0x50] sm:$0xff]  ;;  %v1681_v44 = vmul.f32 %v2550_v47, %v1665_v50  ;;  %v1682_v25 = vmul.f32 %v2550_v47, %v1666_v46 }
 0x3de   : > { %v1436_v63 = vmul.f32 %v1937_v19, %v1434_v2  ;;  %v1576_v34 = vpop.permute.xlu0 %1575  ;;  %v1652_v56 = vmul.f32 %v1952_v23, %v1650_v27  ;;  %v1683_v19 = vmul.f32 %v2564_v55, %v1667_v33  ;;  %v1684_v32 = vmul.f32 %v2564_v55, %v1668_v39 }
 0x3df   : > { %v1577_v18 = vrot.slane %v1576_v34, 1  ;;  %v1689_v2 = vmul.f32 %v2574_v59, %v1673_v53  ;;  %v1690_v47 = vmul.f32 %v2574_v59, %v1674_v37  ;;  %v1688_v27 = vmul.f32 %v2576_v61, %v1672_v24 }
 0x3e0   : > { %v1437_v8 = vadd.f32 %v1436_v63, %v1147_v51  ;;  %v1653_v7 = vadd.f32 %v1652_v56, %v1363_v35  ;;  %v2087_v63 = vld [vmem:[%s2387_s22 + $0x68] sm:$0xff]  ;;  %v1694_v55 = vmul.f32 %v2586_v6, %v1678_v14  ;;  %s1973_s22 = sshll.u32 %s2282_s5, 11 }
 0x3e1   : > { %v1579_v26 = vsel %vm1578_vm1, %v1576_v34, %v1577_v18  ;;  %v1692_v54 = vmul.f32 %v2087_v63, %v2588_v20  ;;  %v1693_v34 = vmul.f32 %v2586_v6, %v1677_v1  ;;  %s3196_s17 = scalar_lea.hbm %s3259_s6, %s1973_s22 }
 0x3e2   : > { %v1581_v29 = vmul.f32 %v1952_v23, %v1579_v26  ;;  %v1655_v5 = vadd.f32 %v1508_v36, %v1437_v8  ;;  %v1687_v23 = vmul.f32 %v2576_v61, %v1671_v16 }
 0x3e4   : > { %v1582_v30 = vadd.f32 %v1581_v29, %v1292_v58 }
 0x3e6   : > { %v1654_v11 = vadd.f32 %v1653_v7, %v1582_v30 }
 0x3e8   : > { %v1656_v49 = vadd.f32 %v1655_v5, %v1654_v11 }
 0x3ea   : > { %v1657_v62 = vsub.f32 0.0, %v1656_v49 }
 0x3ec   : > { %v1658_v60 = vmul.f32 1.442695, %v1657_v62 }
 0x3ee   : > { %2082 = vpow2.f32 %v1658_v60 }
 0x3fb   : > { %v2083_v42 = vpop.eup %2082 }
 0x3fc   : > { %v1660_v43 = vadd.f32 1.0, %v2083_v42 }
 0x3fe   : > { %2084 = vrcp.f32 %v1660_v43 }
 0x40b   : > { %v2085_v21 = vpop.eup %2084 }
 0x40c   : > { %v1699_v12 = vrot.slane %v2085_v21, %v1698_v15  ;;  %v1703_v31 = vrot.slane %v2085_v21, %v1702_v57 }
 0x40e   : > { %v1706_v52 = vmul.f32 %v1699_v12, %v1679_v13  ;;  %v1707_v38 = vmul.f32 %v1703_v31, %v1680_v4  ;;  %v1708_v59 = vmul.f32 %v1699_v12, %v1681_v44  ;;  %v1709_v18 = vmul.f32 %v1703_v31, %v1682_v25 }
 0x40f   : > { %v1710_v9 = vmul.f32 %v1699_v12, %v1683_v19  ;;  %v1711_v61 = vmul.f32 %v1703_v31, %v1684_v32  ;;  %v1712_v51 = vmul.f32 %v1699_v12, %v1685_v10  ;;  %v1713_v28 = vmul.f32 %v1703_v31, %v1686_v0 }
 0x410   : > { %v1714_v56 = vmul.f32 %v1699_v12, %v1687_v23  ;;  %v1715_v17 = vmul.f32 %v1703_v31, %v1688_v27  ;;  %v1716_v26 = vmul.f32 %v1699_v12, %v1689_v2  ;;  %v1717_v35 = vmul.f32 %v1703_v31, %v1690_v47 }
 0x411   : > { %v1718_v58 = vmul.f32 %v1699_v12, %v1691_v22  ;;  %v1719_v20 = vmul.f32 %v1703_v31, %v1692_v54  ;;  %v1720_v8 = vmul.f32 %v1699_v12, %v1693_v34  ;;  %v1721_v29 = vmul.f32 %v1703_v31, %v1694_v55 }
 0x412   : > { %v1722_v6 = vadd.f32 %v1706_v52, %v1663_v41  ;;  %v1723_v36 = vadd.f32 %v1707_v38, %v1664_v45  ;;  %v1724_v7 = vadd.f32 %v1708_v59, %v1665_v50  ;;  %v1725_v30 = vadd.f32 %v1709_v18, %v1666_v46 }
 0x413   : > { %v1726_v5 = vadd.f32 %v1710_v9, %v1667_v33  ;;  %v1727_v11 = vadd.f32 %v1711_v61, %v1668_v39  ;;  %v1728_v49 = vadd.f32 %v1712_v51, %v1669_v40  ;;  %v1729_v62 = vadd.f32 %v1713_v28, %v1670_v3 }
 0x414   : > { %v1730_v60 = vadd.f32 %v1714_v56, %v1671_v16  ;;  %v1731_v42 = vadd.f32 %v1715_v17, %v1672_v24  ;;  %v1732_v43 = vadd.f32 %v1716_v26, %v1673_v53  ;;  %v1733_v15 = vadd.f32 %v1717_v35, %v1674_v37  ;;  %1738 = vst [vmem:[%s3186_s12] sm:$0xff] %v1722_v6 }
 0x415   : > { %1739 = vst [vmem:[%s3186_s12 + $0x8] sm:$0xff] %v1723_v36  ;;  %1740 = vst [vmem:[%s3186_s12 + $0x10] sm:$0xff] %v1724_v7  ;;  %v1734_v41 = vadd.f32 %v2086_v48, %v1718_v58  ;;  %v1735_v45 = vadd.f32 %v2087_v63, %v1719_v20  ;;  %v1736_v50 = vadd.f32 %v1720_v8, %v1677_v1 }
 0x416   : > { %1741 = vst [vmem:[%s3186_s12 + $0x18] sm:$0xff] %v1725_v30  ;;  %v1737_v46 = vadd.f32 %v1721_v29, %v1678_v14  ;;  %1742 = vst [vmem:[%s3186_s12 + $0x20] sm:$0xff] %v1726_v5 }
 0x417   : > { %1743 = vst [vmem:[%s3186_s12 + $0x28] sm:$0xff] %v1727_v11  ;;  %1744 = vst [vmem:[%s3186_s12 + $0x30] sm:$0xff] %v1728_v49 }
 0x418   : > { %1745 = vst [vmem:[%s3186_s12 + $0x38] sm:$0xff] %v1729_v62  ;;  %1746 = vst [vmem:[%s3186_s12 + $0x40] sm:$0xff] %v1730_v60 }
 0x419   : > { %1747 = vst [vmem:[%s3186_s12 + $0x48] sm:$0xff] %v1731_v42  ;;  %1748 = vst [vmem:[%s3186_s12 + $0x50] sm:$0xff] %v1732_v43 }
 0x41a   : > { %1749 = vst [vmem:[%s3186_s12 + $0x58] sm:$0xff] %v1733_v15  ;;  %1750 = vst [vmem:[%s3186_s12 + $0x60] sm:$0xff] %v1734_v41 }
 0x41b   : > { %1751 = vst [vmem:[%s3186_s12 + $0x68] sm:$0xff] %v1735_v45  ;;  %1752 = vst [vmem:[%s3186_s12 + $0x70] sm:$0xff] %v1736_v50 }
 0x41c   : > { %1753 = vst [vmem:[%s3186_s12 + $0x78] sm:$0xff] %v1737_v46 }
 0x41d   : > { %2144 = shalt.err (!%p2141_p1)
}
 0x41e   : > { %s2145_s8 = scalar_lea.hbm %s3196_s17, 2048  ;;  %s2149_s29 = scalar_lea.hbm %s3259_s6, 4096 }
 0x41f   : > { %p2146_p4 = scmp.ne.s32.totalorder %s3196_s17, %s2145_s8  ;;  %p2150_p6 = scmp.lt.s32.totalorder %s3196_s17, %s3259_s6 }
 0x420   : > { %p2151_p13 = scmp.lt.s32.totalorder %s2149_s29, %s2145_s8 }
 0x421   : > { %p2147_p11 = pnand %p2146_p4, %p3285_p0 }
 0x422   : > { %p2152_p3 = por %p2151_p13, %p2150_p6 }
 0x423   : > { %p2148_p5 = pneg %p2147_p11 }
 0x425   : > { %p2153_p12 = pnand %p2152_p3, %p2148_p5 }
 0x427   : > { %2156 = shalt.err (!%p2153_p12)
}
 0x428   : > { %s2221_s12 = smov 256   ;;  %s2222_s5 = smov 16  }
 0x429   : > { %1980 = dma.vmem_to_hbm [thread:$0]  (%p3285_p0), %s3198_s14, 2048, %s3196_s17, %s1755_s15, %s2221_s12, %s2221_s12, %s2222_s5  }
 0x42a PF: > { %s1783_s18 = sand.u32 1, %s2187_s23   ;;  %p3286_p2 = scmp.ne.s32.totalorder %s3271_s11, 0 }
 0x42b   : > { %p3287_p7 = scmp.ge.s32.totalorder %s2199_s26, 2  ;;  %s1784_s19 = scalar_lea.sflag [#allocation7], %s1783_s18 }
 0x42d   : > { %p1991_p8 = pnand %p3287_p7, %p3286_p2 }
 0x42f   : > { %p1992_p9 = pneg %p1991_p8 }
 0x431   : > { %2182 = dma.done.wait (%p1992_p9), %s1784_s19, 2048  }
 0x432   : > { %2184 = vsyncadd (%p1992_p9), %s1784_s19, 4294965248  ;;  %p21_p10 = scmp.ge.s32.totalorder %s2286_s28, 4   ;;  %s3288_s23 = smov %s2191_s24 }
 0x433   : > { %s3289_s24 = smov %s2195_s25  ;;  %s3290_s25 = smov %s2298_s7 }
 0x434   : > { %s3291_s26 = smov %s2286_s28  ;;  %23 = sbr.rel (!%p21_p10) target bundleno = 8 (0x8), region = 100 }
 0x439   :  { %1789 = vsyncpa [#allocation6], 1 }
 0x43a   :  { %1791 = vsyncpa [#allocation6 + $0x1], 1 }
 0x43b   :  { %1792 = vsyncpa [#allocation7], 1 }
 0x43c   :  { %1794 = vsyncpa [#allocation7 + $0x1], 1 }
 0x43d   :  { %1795 = vsyncpa [#allocation8], 1 }
 0x43e   :  { %1797 = vsyncpa [#allocation8 + $0x1], 1 }

</bundles_post_ra>
